<compile_context>
chip_gen: v7x
topology: tpu7x:2x2x1
jax: 0.10.0
libtpu: 0.0.40
codegen_flags: <defaults>
</compile_context>

<pallas_src>
import functools

import jax
import jax.numpy as jnp
from jax.experimental import pallas as pl
from jax.experimental.pallas import tpu as pltpu

# -------------------- model configuration (small, self-consistent) ----------
EMBED = 32          # embed_size
HIDDEN = 32         # hidden_size  (4H = 128 -> one MXU pass / one vreg width)
VOCAB = 64          # vocab_size
LAYERS = 2          # num_layers
FEAT = 64           # stand-in for inception_v3's 2048-dim pooled feature
KH = KW = 3         # stand-in conv-stem kernel size
C_IN = 4            # input image channels

SUBLANE = 8         # batch padded to a multiple of this (full sublane tiles)
BF16 = jnp.bfloat16


# ============================ Pallas kernel =================================
def _lstm_cell(gates, c_prev, H):
    """LSTM cell from pre-activation gates (PyTorch order i,f,g,o).

    sigmoid runs over the full 128-lane gate vector (one EUP push); tanh is
    applied only to the g slice and to c_new (review item 6).
    """
    sg = jax.nn.sigmoid(gates)
    i = sg[:, 0 * H:1 * H]
    f = sg[:, 1 * H:2 * H]
    o = sg[:, 3 * H:4 * H]
    g = jnp.tanh(gates[:, 2 * H:3 * H])
    c_new = f * c_prev + i * g
    h_new = o * jnp.tanh(c_new)
    return h_new, c_new


def _fused_kernel(patches_ref, cw_ref, cb_ref, pool_ref, fw_ref, fb_ref,
                  emb_ref, wih0_ref, b0_ref, whh0_ref, wih_ref, whh_ref,
                  bl_ref, lwt_ref, lb_ref, h0_ref, c0_ref,
                  logits_ref, hn_ref, cn_ref,
                  pre0_acc, h_acc, *, T, Bp, H, L):
    """Encoder prologue + whole-sequence multi-layer LSTM + fused vocab epilogue."""
    # -------- EncoderCNN stand-in: conv stem -> ReLU -> GAP -> fc -> ReLU ----
    y = jnp.maximum(
        jnp.dot(patches_ref[...], cw_ref[...],
                preferred_element_type=jnp.float32) + cb_ref[...], 0.0)   # (B*P, F)
    # pool_ref both mean-pools each image's patches AND zero-pads batch to Bp rows
    pooled = jnp.dot(pool_ref[...], y.astype(BF16),
                     preferred_element_type=jnp.float32)                  # (Bp, F)
    feats = jnp.maximum(
        jnp.dot(pooled.astype(BF16), fw_ref[...],
                preferred_element_type=jnp.float32) + fb_ref[...], 0.0)   # (Bp, E)

    # -------- layer-0 input projection for ALL timesteps (staged in VMEM) ----
    wih0 = wih0_ref[...]                                                  # (E, 4H) bf16
    b0 = b0_ref[...]                                                      # (1, 4H) f32
    pre0_acc[0:Bp, :] = (
        jnp.dot(feats.astype(BF16), wih0, preferred_element_type=jnp.float32) + b0)
    pre0_acc[Bp:T * Bp, :] = (
        jnp.dot(emb_ref[...], wih0, preferred_element_type=jnp.float32) + b0)

    # -------- recurrence (statically unrolled, T*L steps on the serial path) -
    whh0 = whh0_ref[...]                                                  # (H, 4H)
    wih = wih_ref[...]                                                    # (L-1, H, 4H)
    whh = whh_ref[...]                                                    # (L-1, H, 4H)
    bl = bl_ref[...]                                                      # (L-1, 4H)

    h = [h0_ref[l] for l in range(L)]                                     # (Bp, H) f32
    c = [c0_ref[l] for l in range(L)]

    for t in range(T):
        # layer 0: only the recurrent matmul + per-step pre0 load remain here
        gates = pre0_acc[t * Bp:(t + 1) * Bp, :] + jnp.dot(
            h[0].astype(BF16), whh0, preferred_element_type=jnp.float32)
        h[0], c[0] = _lstm_cell(gates, c[0], H)
        x = h[0]
        # layers >= 1: two independent small dots, no lane-domain concat
        for l in range(1, L):
            gates = (jnp.dot(x.astype(BF16), wih[l - 1],
                             preferred_element_type=jnp.float32)
                     + jnp.dot(h[l].astype(BF16), whh[l - 1],
                               preferred_element_type=jnp.float32)
                     + bl[l - 1:l, :])
            h[l], c[l] = _lstm_cell(gates, c[l], H)
            x = h[l]
        h_acc[t * Bp:(t + 1) * Bp, :] = x           # full (8, H) sublane tile

    # -------- fused vocab projection epilogue: one lane-dense HBM write ------
    logits_ref[...] = (jnp.dot(h_acc[...].astype(BF16), lwt_ref[...],
                               preferred_element_type=jnp.float32)
                       + lb_ref[...])
    for l in range(L):
        hn_ref[l] = h[l]
        cn_ref[l] = c[l]


# ============================ Pallas wrapper ================================
def pallas_cnn_to_rnn(patches2d, conv_wt, conv_b, pool, fc_wt, fc_b,
                      emb_flat, w_ih0_t, b0, w_hh0_t, w_ih_t, w_hh_t, b_l,
                      lin_wt, lin_b, h0, c0, *, T):
    BP, K = patches2d.shape
    Bp = pool.shape[0]
    F = conv_wt.shape[1]
    E = fc_wt.shape[1]
    L, _, H = h0.shape
    Lm1 = w_ih_t.shape[0]
    VP = lin_wt.shape[1]
    TB = T * Bp

    kernel = functools.partial(_fused_kernel, T=T, Bp=Bp, H=H, L=L)

    def spec2(shape):
        return pl.BlockSpec(shape, lambda i: (0, 0))

    def spec3(shape):
        return pl.BlockSpec(shape, lambda i: (0, 0, 0))

    return pl.pallas_call(
        kernel,
        out_shape=(jax.ShapeDtypeStruct((TB, VP), jnp.float32),    # logits, time-major
                   jax.ShapeDtypeStruct((L, Bp, H), jnp.float32),  # h_n (padded batch)
                   jax.ShapeDtypeStruct((L, Bp, H), jnp.float32)),  # c_n (padded batch)
        grid=(1,),
        in_specs=[spec2((BP, K)), spec2((K, F)), spec2((1, F)),
                  spec2((Bp, BP)), spec2((F, E)), spec2((1, E)),
                  spec2(((T - 1) * Bp, E)),
                  spec2((E, 4 * H)), spec2((1, 4 * H)), spec2((H, 4 * H)),
                  spec3((Lm1, H, 4 * H)), spec3((Lm1, H, 4 * H)),
                  spec2((Lm1, 4 * H)),
                  spec2((H, VP)), spec2((1, VP)),
                  spec3((L, Bp, H)), spec3((L, Bp, H))],
        out_specs=(spec2((TB, VP)), spec3((L, Bp, H)), spec3((L, Bp, H))),
        scratch_shapes=[pltpu.VMEM((TB, 4 * H), jnp.float32),   # staged pre0
                        pltpu.VMEM((TB, H), jnp.float32)],      # top-layer hiddens
        compiler_params=pltpu.CompilerParams(
            dimension_semantics=("arbitrary",)),
    )(patches2d, conv_wt, conv_b, pool, fc_wt, fc_b, emb_flat,
      w_ih0_t, b0, w_hh0_t, w_ih_t, w_hh_t, b_l, lin_wt, lin_b, h0, c0)


# ============================ glue (jitted JAX) =============================
def _im2col(x_nhwc, kh, kw):
    """(B, H, W, C) -> (B, OH*OW, kh*kw*C) valid-conv patches (runs under jit)."""
    B, H, W, C = x_nhwc.shape
    oh, ow = H - kh + 1, W - kw + 1
    cols = []
    for di in range(kh):
        for dj in range(kw):
            cols.append(x_nhwc[:, di:di + oh, dj:dj + ow, :])
    p = jnp.stack(cols, axis=3)                 # (B, oh, ow, kh*kw, C)
    return p.reshape(B, oh * ow, kh * kw * C)


@jax.jit
def _forward_jit(params, images, captions, h0, c0):
    B = images.shape[0]
    Bp = ((B + SUBLANE - 1) // SUBLANE) * SUBLANE      # batch padded to sublane multiple
    L, _, H = h0.shape
    E = params["fc_wt"].shape[1]
    V = params["embed"].shape[0]

    # -------- EncoderCNN stand-in inputs (fused into the kernel prologue) ----
    x_nhwc = jnp.transpose(images, (0, 2, 3, 1))       # NCHW -> NHWC
    patches = _im2col(x_nhwc, KH, KW)                  # (B, P, K)
    P = patches.shape[1]
    patches2d = patches.reshape(B * P, patches.shape[2]).astype(BF16)

    # block-diagonal mean-pool matrix that ALSO zero-pads the batch to Bp rows;
    # input-independent -> constant-folded at compile time under jit.
    row = jax.lax.broadcasted_iota(jnp.int32, (Bp, B * P), 0)
    col = jax.lax.broadcasted_iota(jnp.int32, (Bp, B * P), 1)
    pool = jnp.where(col // P == row, 1.0 / P, 0.0).astype(BF16)

    # -------- DecoderRNN inputs: pre-gathered embeddings (dropout = identity) -
    emb = jnp.take(params["embed"], captions, axis=0)  # (B, S, E) bf16
    S = emb.shape[1]
    emb_tm = jnp.transpose(emb, (1, 0, 2))             # time-major (S, B, E)
    emb_tm = jnp.pad(emb_tm, ((0, 0), (0, Bp - B), (0, 0)))
    emb_flat = emb_tm.reshape(S * Bp, E)
    T = S + 1

    h0p = jnp.pad(h0, ((0, 0), (0, Bp - B), (0, 0)))
    c0p = jnp.pad(c0, ((0, 0), (0, Bp - B), (0, 0)))

    logits_pad, h_np, c_np = pallas_cnn_to_rnn(
        patches2d, params["conv_wt"], params["conv_b"], pool,
        params["fc_wt"], params["fc_b"], emb_flat,
        params["w_ih0_t"], params["b0"], params["w_hh0_t"],
        params["w_ih_t"], params["w_hh_t"], params["b_l"],
        params["lin_wt"], params["lin_b"], h0p, c0p, T=T)

    VP = logits_pad.shape[1]
    # drop batch/vocab padding; reorder time-major -> PyTorch batch_first layout
    logits = logits_pad.reshape(T, Bp, VP)[:, :B, :V]  # (T, B, V)
    outputs = jnp.transpose(logits, (1, 0, 2)).reshape(B * T, V)
    return outputs, h_np[:, :B, :], c_np[:, :B, :]


def _uniform(key, shape, scale):
    return jax.random.uniform(key, shape, jnp.float32, -scale, scale)


class CNNtoRNN:
    """Pallas/JAX re-implementation of the PyTorch CNNtoRNN forward pass."""

    def __init__(self, embed_size, hidden_size, vocab_size, num_layers, key):
        self.embed_size = embed_size
        self.hidden_size = hidden_size
        self.vocab_size = vocab_size
        self.num_layers = num_layers

        H = hidden_size
        ks = jax.random.split(key, 6 + 4 * num_layers)
        s_h = 1.0 / jnp.sqrt(H)
        s_f = 1.0 / jnp.sqrt(FEAT)
        s_c = 1.0 / jnp.sqrt(KH * KW * C_IN)

        # Encoder stand-in stem + replaced inception.fc
        conv_w = _uniform(ks[0], (FEAT, KH * KW * C_IN), s_c)
        conv_b = _uniform(ks[1], (FEAT,), s_c)
        fc_w = _uniform(ks[2], (embed_size, FEAT), s_f)            # Linear(FEAT, embed)
        fc_b = _uniform(ks[3], (embed_size,), s_f)

        # Decoder: embedding, LSTM (PyTorch per-layer param shapes), output Linear
        embed = jax.random.normal(ks[4], (vocab_size, embed_size), jnp.float32)
        w_ih, w_hh, b_ih, b_hh = [], [], [], []
        for l in range(num_layers):
            in_dim = embed_size if l == 0 else H
            k0, k1, k2, k3 = ks[5 + 4 * l: 9 + 4 * l]
            w_ih.append(_uniform(k0, (4 * H, in_dim), s_h))
            w_hh.append(_uniform(k1, (4 * H, H), s_h))
            b_ih.append(_uniform(k2, (4 * H,), s_h))
            b_hh.append(_uniform(k3, (4 * H,), s_h))
        lin_w = _uniform(ks[5 + 4 * num_layers], (vocab_size, H), s_h)
        lin_b = jnp.zeros((vocab_size,), jnp.float32)

        # vocab projection zero-padded to a 128-lane multiple (lane-dense store)
        v_pad = ((vocab_size + 127) // 128) * 128
        lin_wt_pad = jnp.zeros((H, v_pad), jnp.float32).at[:, :vocab_size].set(
            jnp.transpose(lin_w))
        lin_b_pad = jnp.zeros((1, v_pad), jnp.float32).at[0, :vocab_size].set(lin_b)

        # layers >= 1 weights kept separate (no fused concat matmul)
        if num_layers > 1:
            w_ih_t = jnp.stack([jnp.transpose(w_ih[l]) for l in range(1, num_layers)], 0)
            w_hh_t = jnp.stack([jnp.transpose(w_hh[l]) for l in range(1, num_layers)], 0)
            b_l = jnp.stack([b_ih[l] + b_hh[l] for l in range(1, num_layers)], 0)
        else:  # dummy (unused) block so the kernel signature stays uniform
            w_ih_t = jnp.zeros((1, H, 4 * H), jnp.float32)
            w_hh_t = jnp.zeros((1, H, 4 * H), jnp.float32)
            b_l = jnp.zeros((1, 4 * H), jnp.float32)

        # Kernel-layout params: pre-transposed; MXU operands stored in bf16,
        # biases / accumulation-path values stay f32.
        self.p = dict(
            conv_wt=jnp.transpose(conv_w).astype(BF16),      # (K, F)
            conv_b=conv_b.reshape(1, FEAT),
            fc_wt=jnp.transpose(fc_w).astype(BF16),          # (FEAT, E)
            fc_b=fc_b.reshape(1, embed_size),
            embed=embed.astype(BF16),                        # (V, E)
            w_ih0_t=jnp.transpose(w_ih[0]).astype(BF16),     # (E, 4H)
            w_hh0_t=jnp.transpose(w_hh[0]).astype(BF16),     # (H, 4H)
            b0=(b_ih[0] + b_hh[0]).reshape(1, 4 * H),        # summed biases (equivalent)
            w_ih_t=w_ih_t.astype(BF16),                      # (L-1, H, 4H)
            w_hh_t=w_hh_t.astype(BF16),                      # (L-1, H, 4H)
            b_l=b_l,                                         # (L-1, 4H)
            lin_wt=lin_wt_pad.astype(BF16),                  # (H, Vpad)
            lin_b=lin_b_pad)                                 # (1, Vpad)

    def forward(self, images, captions, states=None):
        B = images.shape[0]
        if states is None:
            h0 = jnp.zeros((self.num_layers, B, self.hidden_size), jnp.float32)
            c0 = jnp.zeros_like(h0)
        else:
            h0, c0 = states
        outputs, h_n, c_n = _forward_jit(self.p, images, captions, h0, c0)
        return outputs, (h_n, c_n)


# ================================ main ======================================
if __name__ == "__main__":
    B, IMG, SEQ = 2, 16, 8

    key = jax.random.PRNGKey(0)
    k_param, k_img, k_cap = jax.random.split(key, 3)

    model = CNNtoRNN(EMBED, HIDDEN, VOCAB, LAYERS, k_param)

    images = jax.random.normal(k_img, (B, C_IN, IMG, IMG), jnp.float32)
    captions = jax.random.randint(k_cap, (B, SEQ), 0, VOCAB, dtype=jnp.int32)

    outputs, (h_n, c_n) = model.forward(images, captions)
    jax.block_until_ready((outputs, h_n, c_n))

    assert outputs.shape == (B * (SEQ + 1), VOCAB)
    assert h_n.shape == (LAYERS, B, HIDDEN) and c_n.shape == (LAYERS, B, HIDDEN)
    assert bool(jnp.all(jnp.isfinite(outputs)))
    print("KERNEL_OK")
</pallas_src>

<mosaic_0001>
module attributes {stable_mosaic.version = 11 : i64} {
  func.func @_fused_kernel(%arg0: i32, %arg1: memref<392x36xbf16, #tpu.memory_space<vmem>>, %arg2: memref<36x64xbf16, #tpu.memory_space<vmem>>, %arg3: memref<1x64xf32, #tpu.memory_space<vmem>>, %arg4: memref<8x392xbf16, #tpu.memory_space<vmem>>, %arg5: memref<64x32xbf16, #tpu.memory_space<vmem>>, %arg6: memref<1x32xf32, #tpu.memory_space<vmem>>, %arg7: memref<64x32xbf16, #tpu.memory_space<vmem>>, %arg8: memref<32x128xbf16, #tpu.memory_space<vmem>>, %arg9: memref<1x128xf32, #tpu.memory_space<vmem>>, %arg10: memref<32x128xbf16, #tpu.memory_space<vmem>>, %arg11: memref<1x32x128xbf16, #tpu.memory_space<vmem>>, %arg12: memref<1x32x128xbf16, #tpu.memory_space<vmem>>, %arg13: memref<1x128xf32, #tpu.memory_space<vmem>>, %arg14: memref<32x128xbf16, #tpu.memory_space<vmem>>, %arg15: memref<1x128xf32, #tpu.memory_space<vmem>>, %arg16: memref<2x8x32xf32, #tpu.memory_space<vmem>>, %arg17: memref<2x8x32xf32, #tpu.memory_space<vmem>>, %arg18: memref<72x128xf32, #tpu.memory_space<vmem>>, %arg19: memref<2x8x32xf32, #tpu.memory_space<vmem>>, %arg20: memref<2x8x32xf32, #tpu.memory_space<vmem>>, %arg21: memref<72x128xf32, #tpu.memory_space<vmem>>, %arg22: memref<72x32xf32, #tpu.memory_space<vmem>>) attributes {dimension_semantics = [#tpu.dimension_semantics<arbitrary>], iteration_bounds = array<i64: 1>, scalar_prefetch = 0 : i64, scratch_operands = 2 : i64, tpu.core_type = #tpu.core_type<tc>, window_params = [{pipeline_mode = #tpu.pipeline_mode<synchronous>, transform_indices = @transform_0, window_bounds = array<i64: 392, 36>}, {pipeline_mode = #tpu.pipeline_mode<synchronous>, transform_indices = @transform_1, window_bounds = array<i64: 36, 64>}, {pipeline_mode = #tpu.pipeline_mode<synchronous>, transform_indices = @transform_2, window_bounds = array<i64: 1, 64>}, {pipeline_mode = #tpu.pipeline_mode<synchronous>, transform_indices = @transform_3, window_bounds = array<i64: 8, 392>}, {pipeline_mode = #tpu.pipeline_mode<synchronous>, transform_indices = @transform_4, window_bounds = array<i64: 64, 32>}, {pipeline_mode = #tpu.pipeline_mode<synchronous>, transform_indices = @transform_5, window_bounds = array<i64: 1, 32>}, {pipeline_mode = #tpu.pipeline_mode<synchronous>, transform_indices = @transform_6, window_bounds = array<i64: 64, 32>}, {pipeline_mode = #tpu.pipeline_mode<synchronous>, transform_indices = @transform_7, window_bounds = array<i64: 32, 128>}, {pipeline_mode = #tpu.pipeline_mode<synchronous>, transform_indices = @transform_8, window_bounds = array<i64: 1, 128>}, {pipeline_mode = #tpu.pipeline_mode<synchronous>, transform_indices = @transform_9, window_bounds = array<i64: 32, 128>}, {pipeline_mode = #tpu.pipeline_mode<synchronous>, transform_indices = @transform_10, window_bounds = array<i64: 1, 32, 128>}, {pipeline_mode = #tpu.pipeline_mode<synchronous>, transform_indices = @transform_11, window_bounds = array<i64: 1, 32, 128>}, {pipeline_mode = #tpu.pipeline_mode<synchronous>, transform_indices = @transform_12, window_bounds = array<i64: 1, 128>}, {pipeline_mode = #tpu.pipeline_mode<synchronous>, transform_indices = @transform_13, window_bounds = array<i64: 32, 128>}, {pipeline_mode = #tpu.pipeline_mode<synchronous>, transform_indices = @transform_14, window_bounds = array<i64: 1, 128>}, {pipeline_mode = #tpu.pipeline_mode<synchronous>, transform_indices = @transform_15, window_bounds = array<i64: 2, 8, 32>}, {pipeline_mode = #tpu.pipeline_mode<synchronous>, transform_indices = @transform_16, window_bounds = array<i64: 2, 8, 32>}, {pipeline_mode = #tpu.pipeline_mode<synchronous>, transform_indices = @transform_17, window_bounds = array<i64: 72, 128>}, {pipeline_mode = #tpu.pipeline_mode<synchronous>, transform_indices = @transform_18, window_bounds = array<i64: 2, 8, 32>}, {pipeline_mode = #tpu.pipeline_mode<synchronous>, transform_indices = @transform_19, window_bounds = array<i64: 2, 8, 32>}]} {
    %c0 = arith.constant 0 : index
    %c0_0 = arith.constant 0 : index
    %0 = vector.load %arg1[%c0, %c0_0] : memref<392x36xbf16, #tpu.memory_space<vmem>>, vector<392x36xbf16>
    %c0_1 = arith.constant 0 : index
    %c0_2 = arith.constant 0 : index
    %1 = vector.load %arg2[%c0_1, %c0_2] : memref<36x64xbf16, #tpu.memory_space<vmem>>, vector<36x64xbf16>
    %cst = arith.constant dense<0.000000e+00> : vector<392x64xf32>
    %2 = tpu.matmul %0, %1, %cst {dimension_numbers = #tpu.dot_dimension_numbers<[1], [0], [0], [1], [0, 0, 1, 1], [], []>} : vector<392x36xbf16>, vector<36x64xbf16>, vector<392x64xf32> -> vector<392x64xf32>
    %c0_3 = arith.constant 0 : index
    %c0_4 = arith.constant 0 : index
    %3 = vector.load %arg3[%c0_3, %c0_4] : memref<1x64xf32, #tpu.memory_space<vmem>>, vector<1x64xf32>
    %4 = vector.broadcast %3 : vector<1x64xf32> to vector<392x64xf32>
    %5 = arith.addf %2, %4 : vector<392x64xf32>
    %cst_5 = arith.constant 0.000000e+00 : f32
    %6 = vector.broadcast %cst_5 : f32 to vector<392x64xf32>
    %7 = arith.maximumf %5, %6 : vector<392x64xf32>
    %c0_6 = arith.constant 0 : index
    %c0_7 = arith.constant 0 : index
    %8 = vector.load %arg4[%c0_6, %c0_7] : memref<8x392xbf16, #tpu.memory_space<vmem>>, vector<8x392xbf16>
    %9 = arith.truncf %7 : vector<392x64xf32> to vector<392x64xbf16>
    %cst_8 = arith.constant dense<0.000000e+00> : vector<8x64xf32>
    %10 = tpu.matmul %8, %9, %cst_8 {dimension_numbers = #tpu.dot_dimension_numbers<[1], [0], [0], [1], [0, 0, 1, 1], [], []>} : vector<8x392xbf16>, vector<392x64xbf16>, vector<8x64xf32> -> vector<8x64xf32>
    %11 = arith.truncf %10 : vector<8x64xf32> to vector<8x64xbf16>
    %c0_9 = arith.constant 0 : index
    %c0_10 = arith.constant 0 : index
    %12 = vector.load %arg5[%c0_9, %c0_10] : memref<64x32xbf16, #tpu.memory_space<vmem>>, vector<64x32xbf16>
    %cst_11 = arith.constant dense<0.000000e+00> : vector<8x32xf32>
    %13 = tpu.matmul %11, %12, %cst_11 {dimension_numbers = #tpu.dot_dimension_numbers<[1], [0], [0], [1], [0, 0, 1, 1], [], []>} : vector<8x64xbf16>, vector<64x32xbf16>, vector<8x32xf32> -> vector<8x32xf32>
    %c0_12 = arith.constant 0 : index
    %c0_13 = arith.constant 0 : index
    %14 = vector.load %arg6[%c0_12, %c0_13] : memref<1x32xf32, #tpu.memory_space<vmem>>, vector<1x32xf32>
    %15 = vector.broadcast %14 : vector<1x32xf32> to vector<8x32xf32>
    %16 = arith.addf %13, %15 : vector<8x32xf32>
    %cst_14 = arith.constant 0.000000e+00 : f32
    %17 = vector.broadcast %cst_14 : f32 to vector<8x32xf32>
    %18 = arith.maximumf %16, %17 : vector<8x32xf32>
    %c0_15 = arith.constant 0 : index
    %c0_16 = arith.constant 0 : index
    %19 = vector.load %arg8[%c0_15, %c0_16] : memref<32x128xbf16, #tpu.memory_space<vmem>>, vector<32x128xbf16>
    %c0_17 = arith.constant 0 : index
    %c0_18 = arith.constant 0 : index
    %20 = vector.load %arg9[%c0_17, %c0_18] : memref<1x128xf32, #tpu.memory_space<vmem>>, vector<1x128xf32>
    %21 = arith.truncf %18 : vector<8x32xf32> to vector<8x32xbf16>
    %cst_19 = arith.constant dense<0.000000e+00> : vector<8x128xf32>
    %22 = tpu.matmul %21, %19, %cst_19 {dimension_numbers = #tpu.dot_dimension_numbers<[1], [0], [0], [1], [0, 0, 1, 1], [], []>} : vector<8x32xbf16>, vector<32x128xbf16>, vector<8x128xf32> -> vector<8x128xf32>
    %23 = vector.broadcast %20 : vector<1x128xf32> to vector<8x128xf32>
    %24 = arith.addf %22, %23 : vector<8x128xf32>
    %c0_20 = arith.constant 0 : index
    %c0_21 = arith.constant 0 : index
    %25 = vector.load %arg21[%c0_20, %c0_21] : memref<72x128xf32, #tpu.memory_space<vmem>>, vector<8x128xf32>
    tpu.vector_store %arg21[%c0_20, %c0_21], %24 {strides = array<i32>} : memref<72x128xf32, #tpu.memory_space<vmem>>, vector<8x128xf32>,
    %c0_22 = arith.constant 0 : index
    %c0_23 = arith.constant 0 : index
    %26 = vector.load %arg7[%c0_22, %c0_23] : memref<64x32xbf16, #tpu.memory_space<vmem>>, vector<64x32xbf16>
    %cst_24 = arith.constant dense<0.000000e+00> : vector<64x128xf32>
    %27 = tpu.matmul %26, %19, %cst_24 {dimension_numbers = #tpu.dot_dimension_numbers<[1], [0], [0], [1], [0, 0, 1, 1], [], []>} : vector<64x32xbf16>, vector<32x128xbf16>, vector<64x128xf32> -> vector<64x128xf32>
    %28 = vector.broadcast %20 : vector<1x128xf32> to vector<64x128xf32>
    %29 = arith.addf %27, %28 : vector<64x128xf32>
    %c8 = arith.constant 8 : index
    %c0_25 = arith.constant 0 : index
    %30 = vector.load %arg21[%c8, %c0_25] : memref<72x128xf32, #tpu.memory_space<vmem>>, vector<64x128xf32>
    tpu.vector_store %arg21[%c8, %c0_25], %29 {strides = array<i32>} : memref<72x128xf32, #tpu.memory_space<vmem>>, vector<64x128xf32>,
    %c0_26 = arith.constant 0 : index
    %c0_27 = arith.constant 0 : index
    %31 = vector.load %arg10[%c0_26, %c0_27] : memref<32x128xbf16, #tpu.memory_space<vmem>>, vector<32x128xbf16>
    %c0_28 = arith.constant 0 : index
    %c0_29 = arith.constant 0 : index
    %c0_30 = arith.constant 0 : index
    %32 = vector.load %arg11[%c0_28, %c0_29, %c0_30] : memref<1x32x128xbf16, #tpu.memory_space<vmem>>, vector<1x32x128xbf16>
    %c0_31 = arith.constant 0 : index
    %c0_32 = arith.constant 0 : index
    %c0_33 = arith.constant 0 : index
    %33 = vector.load %arg12[%c0_31, %c0_32, %c0_33] : memref<1x32x128xbf16, #tpu.memory_space<vmem>>, vector<1x32x128xbf16>
    %c0_34 = arith.constant 0 : index
    %c0_35 = arith.constant 0 : index
    %34 = vector.load %arg13[%c0_34, %c0_35] : memref<1x128xf32, #tpu.memory_space<vmem>>, vector<1x128xf32>
    %c0_36 = arith.constant 0 : index
    %c0_37 = arith.constant 0 : index
    %c0_38 = arith.constant 0 : index
    %35 = vector.load %arg16[%c0_36, %c0_37, %c0_38] : memref<2x8x32xf32, #tpu.memory_space<vmem>>, vector<1x8x32xf32>
    %36 = vector.shape_cast %35 : vector<1x8x32xf32> to vector<8x32xf32>
    %c1 = arith.constant 1 : index
    %c0_39 = arith.constant 0 : index
    %c0_40 = arith.constant 0 : index
    %37 = vector.load %arg16[%c1, %c0_39, %c0_40] : memref<2x8x32xf32, #tpu.memory_space<vmem>>, vector<1x8x32xf32>
    %38 = vector.shape_cast %37 : vector<1x8x32xf32> to vector<8x32xf32>
    %c0_41 = arith.constant 0 : index
    %c0_42 = arith.constant 0 : index
    %c0_43 = arith.constant 0 : index
    %39 = vector.load %arg17[%c0_41, %c0_42, %c0_43] : memref<2x8x32xf32, #tpu.memory_space<vmem>>, vector<1x8x32xf32>
    %40 = vector.shape_cast %39 : vector<1x8x32xf32> to vector<8x32xf32>
    %c1_44 = arith.constant 1 : index
    %c0_45 = arith.constant 0 : index
    %c0_46 = arith.constant 0 : index
    %41 = vector.load %arg17[%c1_44, %c0_45, %c0_46] : memref<2x8x32xf32, #tpu.memory_space<vmem>>, vector<1x8x32xf32>
    %42 = vector.shape_cast %41 : vector<1x8x32xf32> to vector<8x32xf32>
    %c0_47 = arith.constant 0 : index
    %c0_48 = arith.constant 0 : index
    %43 = vector.load %arg21[%c0_47, %c0_48] : memref<72x128xf32, #tpu.memory_space<vmem>>, vector<8x128xf32>
    %44 = arith.truncf %36 : vector<8x32xf32> to vector<8x32xbf16>
    %cst_49 = arith.constant dense<0.000000e+00> : vector<8x128xf32>
    %45 = tpu.matmul %44, %31, %cst_49 {dimension_numbers = #tpu.dot_dimension_numbers<[1], [0], [0], [1], [0, 0, 1, 1], [], []>} : vector<8x32xbf16>, vector<32x128xbf16>, vector<8x128xf32> -> vector<8x128xf32>
    %46 = arith.addf %43, %45 : vector<8x128xf32>
    %47 = arith.negf %46 : vector<8x128xf32>
    %48 = math.exp %47 : vector<8x128xf32>
    %cst_50 = arith.constant 1.000000e+00 : f32
    %49 = vector.broadcast %cst_50 : f32 to vector<8x128xf32>
    %50 = arith.addf %49, %48 : vector<8x128xf32>
    %51 = arith.divf %49, %50 : vector<8x128xf32>
    %52 = vector.extract_strided_slice %51 {offsets = [0, 0], sizes = [8, 32], strides = [1, 1]} : vector<8x128xf32> to vector<8x32xf32>
    %53 = vector.extract_strided_slice %51 {offsets = [0, 32], sizes = [8, 32], strides = [1, 1]} : vector<8x128xf32> to vector<8x32xf32>
    %54 = vector.extract_strided_slice %51 {offsets = [0, 96], sizes = [8, 32], strides = [1, 1]} : vector<8x128xf32> to vector<8x32xf32>
    %55 = vector.extract_strided_slice %46 {offsets = [0, 64], sizes = [8, 32], strides = [1, 1]} : vector<8x128xf32> to vector<8x32xf32>
    %56 = math.tanh %55 : vector<8x32xf32>
    %57 = arith.mulf %53, %40 : vector<8x32xf32>
    %58 = arith.mulf %52, %56 : vector<8x32xf32>
    %59 = arith.addf %57, %58 : vector<8x32xf32>
    %60 = math.tanh %59 : vector<8x32xf32>
    %61 = arith.mulf %54, %60 : vector<8x32xf32>
    %62 = arith.truncf %61 : vector<8x32xf32> to vector<8x32xbf16>
    %63 = vector.shape_cast %32 : vector<1x32x128xbf16> to vector<32x128xbf16>
    %cst_51 = arith.constant dense<0.000000e+00> : vector<8x128xf32>
    %64 = tpu.matmul %62, %63, %cst_51 {dimension_numbers = #tpu.dot_dimension_numbers<[1], [0], [0], [1], [0, 0, 1, 1], [], []>} : vector<8x32xbf16>, vector<32x128xbf16>, vector<8x128xf32> -> vector<8x128xf32>
    %65 = arith.truncf %38 : vector<8x32xf32> to vector<8x32xbf16>
    %66 = vector.shape_cast %33 : vector<1x32x128xbf16> to vector<32x128xbf16>
    %cst_52 = arith.constant dense<0.000000e+00> : vector<8x128xf32>
    %67 = tpu.matmul %65, %66, %cst_52 {dimension_numbers = #tpu.dot_dimension_numbers<[1], [0], [0], [1], [0, 0, 1, 1], [], []>} : vector<8x32xbf16>, vector<32x128xbf16>, vector<8x128xf32> -> vector<8x128xf32>
    %68 = arith.addf %64, %67 : vector<8x128xf32>
    %69 = vector.broadcast %34 : vector<1x128xf32> to vector<8x128xf32>
    %70 = arith.addf %68, %69 : vector<8x128xf32>
    %71 = arith.negf %70 : vector<8x128xf32>
    %72 = math.exp %71 : vector<8x128xf32>
    %cst_53 = arith.constant 1.000000e+00 : f32
    %73 = vector.broadcast %cst_53 : f32 to vector<8x128xf32>
    %74 = arith.addf %73, %72 : vector<8x128xf32>
    %75 = arith.divf %73, %74 : vector<8x128xf32>
    %76 = vector.extract_strided_slice %75 {offsets = [0, 0], sizes = [8, 32], strides = [1, 1]} : vector<8x128xf32> to vector<8x32xf32>
    %77 = vector.extract_strided_slice %75 {offsets = [0, 32], sizes = [8, 32], strides = [1, 1]} : vector<8x128xf32> to vector<8x32xf32>
    %78 = vector.extract_strided_slice %75 {offsets = [0, 96], sizes = [8, 32], strides = [1, 1]} : vector<8x128xf32> to vector<8x32xf32>
    %79 = vector.extract_strided_slice %70 {offsets = [0, 64], sizes = [8, 32], strides = [1, 1]} : vector<8x128xf32> to vector<8x32xf32>
    %80 = math.tanh %79 : vector<8x32xf32>
    %81 = arith.mulf %77, %42 : vector<8x32xf32>
    %82 = arith.mulf %76, %80 : vector<8x32xf32>
    %83 = arith.addf %81, %82 : vector<8x32xf32>
    %84 = math.tanh %83 : vector<8x32xf32>
    %85 = arith.mulf %78, %84 : vector<8x32xf32>
    %c0_54 = arith.constant 0 : index
    %c0_55 = arith.constant 0 : index
    %86 = vector.load %arg22[%c0_54, %c0_55] : memref<72x32xf32, #tpu.memory_space<vmem>>, vector<8x32xf32>
    tpu.vector_store %arg22[%c0_54, %c0_55], %85 {strides = array<i32>} : memref<72x32xf32, #tpu.memory_space<vmem>>, vector<8x32xf32>,
    %c8_56 = arith.constant 8 : index
    %c0_57 = arith.constant 0 : index
    %87 = vector.load %arg21[%c8_56, %c0_57] : memref<72x128xf32, #tpu.memory_space<vmem>>, vector<8x128xf32>
    %88 = arith.truncf %61 : vector<8x32xf32> to vector<8x32xbf16>
    %cst_58 = arith.constant dense<0.000000e+00> : vector<8x128xf32>
    %89 = tpu.matmul %88, %31, %cst_58 {dimension_numbers = #tpu.dot_dimension_numbers<[1], [0], [0], [1], [0, 0, 1, 1], [], []>} : vector<8x32xbf16>, vector<32x128xbf16>, vector<8x128xf32> -> vector<8x128xf32>
    %90 = arith.addf %87, %89 : vector<8x128xf32>
    %91 = arith.negf %90 : vector<8x128xf32>
    %92 = math.exp %91 : vector<8x128xf32>
    %cst_59 = arith.constant 1.000000e+00 : f32
    %93 = vector.broadcast %cst_59 : f32 to vector<8x128xf32>
    %94 = arith.addf %93, %92 : vector<8x128xf32>
    %95 = arith.divf %93, %94 : vector<8x128xf32>
    %96 = vector.extract_strided_slice %95 {offsets = [0, 0], sizes = [8, 32], strides = [1, 1]} : vector<8x128xf32> to vector<8x32xf32>
    %97 = vector.extract_strided_slice %95 {offsets = [0, 32], sizes = [8, 32], strides = [1, 1]} : vector<8x128xf32> to vector<8x32xf32>
    %98 = vector.extract_strided_slice %95 {offsets = [0, 96], sizes = [8, 32], strides = [1, 1]} : vector<8x128xf32> to vector<8x32xf32>
    %99 = vector.extract_strided_slice %90 {offsets = [0, 64], sizes = [8, 32], strides = [1, 1]} : vector<8x128xf32> to vector<8x32xf32>
    %100 = math.tanh %99 : vector<8x32xf32>
    %101 = arith.mulf %97, %59 : vector<8x32xf32>
    %102 = arith.mulf %96, %100 : vector<8x32xf32>
    %103 = arith.addf %101, %102 : vector<8x32xf32>
    %104 = math.tanh %103 : vector<8x32xf32>
    %105 = arith.mulf %98, %104 : vector<8x32xf32>
    %106 = arith.truncf %105 : vector<8x32xf32> to vector<8x32xbf16>
    %107 = vector.shape_cast %32 : vector<1x32x128xbf16> to vector<32x128xbf16>
    %cst_60 = arith.constant dense<0.000000e+00> : vector<8x128xf32>
    %108 = tpu.matmul %106, %107, %cst_60 {dimension_numbers = #tpu.dot_dimension_numbers<[1], [0], [0], [1], [0, 0, 1, 1], [], []>} : vector<8x32xbf16>, vector<32x128xbf16>, vector<8x128xf32> -> vector<8x128xf32>
    %109 = arith.truncf %85 : vector<8x32xf32> to vector<8x32xbf16>
    %110 = vector.shape_cast %33 : vector<1x32x128xbf16> to vector<32x128xbf16>
    %cst_61 = arith.constant dense<0.000000e+00> : vector<8x128xf32>
    %111 = tpu.matmul %109, %110, %cst_61 {dimension_numbers = #tpu.dot_dimension_numbers<[1], [0], [0], [1], [0, 0, 1, 1], [], []>} : vector<8x32xbf16>, vector<32x128xbf16>, vector<8x128xf32> -> vector<8x128xf32>
    %112 = arith.addf %108, %111 : vector<8x128xf32>
    %113 = vector.broadcast %34 : vector<1x128xf32> to vector<8x128xf32>
    %114 = arith.addf %112, %113 : vector<8x128xf32>
    %115 = arith.negf %114 : vector<8x128xf32>
    %116 = math.exp %115 : vector<8x128xf32>
    %cst_62 = arith.constant 1.000000e+00 : f32
    %117 = vector.broadcast %cst_62 : f32 to vector<8x128xf32>
    %118 = arith.addf %117, %116 : vector<8x128xf32>
    %119 = arith.divf %117, %118 : vector<8x128xf32>
    %120 = vector.extract_strided_slice %119 {offsets = [0, 0], sizes = [8, 32], strides = [1, 1]} : vector<8x128xf32> to vector<8x32xf32>
    %121 = vector.extract_strided_slice %119 {offsets = [0, 32], sizes = [8, 32], strides = [1, 1]} : vector<8x128xf32> to vector<8x32xf32>
    %122 = vector.extract_strided_slice %119 {offsets = [0, 96], sizes = [8, 32], strides = [1, 1]} : vector<8x128xf32> to vector<8x32xf32>
    %123 = vector.extract_strided_slice %114 {offsets = [0, 64], sizes = [8, 32], strides = [1, 1]} : vector<8x128xf32> to vector<8x32xf32>
    %124 = math.tanh %123 : vector<8x32xf32>
    %125 = arith.mulf %121, %83 : vector<8x32xf32>
    %126 = arith.mulf %120, %124 : vector<8x32xf32>
    %127 = arith.addf %125, %126 : vector<8x32xf32>
    %128 = math.tanh %127 : vector<8x32xf32>
    %129 = arith.mulf %122, %128 : vector<8x32xf32>
    %c8_63 = arith.constant 8 : index
    %c0_64 = arith.constant 0 : index
    %130 = vector.load %arg22[%c8_63, %c0_64] : memref<72x32xf32, #tpu.memory_space<vmem>>, vector<8x32xf32>
    tpu.vector_store %arg22[%c8_63, %c0_64], %129 {strides = array<i32>} : memref<72x32xf32, #tpu.memory_space<vmem>>, vector<8x32xf32>,
    %c16 = arith.constant 16 : index
    %c0_65 = arith.constant 0 : index
    %131 = vector.load %arg21[%c16, %c0_65] : memref<72x128xf32, #tpu.memory_space<vmem>>, vector<8x128xf32>
    %132 = arith.truncf %105 : vector<8x32xf32> to vector<8x32xbf16>
    %cst_66 = arith.constant dense<0.000000e+00> : vector<8x128xf32>
    %133 = tpu.matmul %132, %31, %cst_66 {dimension_numbers = #tpu.dot_dimension_numbers<[1], [0], [0], [1], [0, 0, 1, 1], [], []>} : vector<8x32xbf16>, vector<32x128xbf16>, vector<8x128xf32> -> vector<8x128xf32>
    %134 = arith.addf %131, %133 : vector<8x128xf32>
    %135 = arith.negf %134 : vector<8x128xf32>
    %136 = math.exp %135 : vector<8x128xf32>
    %cst_67 = arith.constant 1.000000e+00 : f32
    %137 = vector.broadcast %cst_67 : f32 to vector<8x128xf32>
    %138 = arith.addf %137, %136 : vector<8x128xf32>
    %139 = arith.divf %137, %138 : vector<8x128xf32>
    %140 = vector.extract_strided_slice %139 {offsets = [0, 0], sizes = [8, 32], strides = [1, 1]} : vector<8x128xf32> to vector<8x32xf32>
    %141 = vector.extract_strided_slice %139 {offsets = [0, 32], sizes = [8, 32], strides = [1, 1]} : vector<8x128xf32> to vector<8x32xf32>
    %142 = vector.extract_strided_slice %139 {offsets = [0, 96], sizes = [8, 32], strides = [1, 1]} : vector<8x128xf32> to vector<8x32xf32>
    %143 = vector.extract_strided_slice %134 {offsets = [0, 64], sizes = [8, 32], strides = [1, 1]} : vector<8x128xf32> to vector<8x32xf32>
    %144 = math.tanh %143 : vector<8x32xf32>
    %145 = arith.mulf %141, %103 : vector<8x32xf32>
    %146 = arith.mulf %140, %144 : vector<8x32xf32>
    %147 = arith.addf %145, %146 : vector<8x32xf32>
    %148 = math.tanh %147 : vector<8x32xf32>
    %149 = arith.mulf %142, %148 : vector<8x32xf32>
    %150 = arith.truncf %149 : vector<8x32xf32> to vector<8x32xbf16>
    %151 = vector.shape_cast %32 : vector<1x32x128xbf16> to vector<32x128xbf16>
    %cst_68 = arith.constant dense<0.000000e+00> : vector<8x128xf32>
    %152 = tpu.matmul %150, %151, %cst_68 {dimension_numbers = #tpu.dot_dimension_numbers<[1], [0], [0], [1], [0, 0, 1, 1], [], []>} : vector<8x32xbf16>, vector<32x128xbf16>, vector<8x128xf32> -> vector<8x128xf32>
    %153 = arith.truncf %129 : vector<8x32xf32> to vector<8x32xbf16>
    %154 = vector.shape_cast %33 : vector<1x32x128xbf16> to vector<32x128xbf16>
    %cst_69 = arith.constant dense<0.000000e+00> : vector<8x128xf32>
    %155 = tpu.matmul %153, %154, %cst_69 {dimension_numbers = #tpu.dot_dimension_numbers<[1], [0], [0], [1], [0, 0, 1, 1], [], []>} : vector<8x32xbf16>, vector<32x128xbf16>, vector<8x128xf32> -> vector<8x128xf32>
    %156 = arith.addf %152, %155 : vector<8x128xf32>
    %157 = vector.broadcast %34 : vector<1x128xf32> to vector<8x128xf32>
    %158 = arith.addf %156, %157 : vector<8x128xf32>
    %159 = arith.negf %158 : vector<8x128xf32>
    %160 = math.exp %159 : vector<8x128xf32>
    %cst_70 = arith.constant 1.000000e+00 : f32
    %161 = vector.broadcast %cst_70 : f32 to vector<8x128xf32>
    %162 = arith.addf %161, %160 : vector<8x128xf32>
    %163 = arith.divf %161, %162 : vector<8x128xf32>
    %164 = vector.extract_strided_slice %163 {offsets = [0, 0], sizes = [8, 32], strides = [1, 1]} : vector<8x128xf32> to vector<8x32xf32>
    %165 = vector.extract_strided_slice %163 {offsets = [0, 32], sizes = [8, 32], strides = [1, 1]} : vector<8x128xf32> to vector<8x32xf32>
    %166 = vector.extract_strided_slice %163 {offsets = [0, 96], sizes = [8, 32], strides = [1, 1]} : vector<8x128xf32> to vector<8x32xf32>
    %167 = vector.extract_strided_slice %158 {offsets = [0, 64], sizes = [8, 32], strides = [1, 1]} : vector<8x128xf32> to vector<8x32xf32>
    %168 = math.tanh %167 : vector<8x32xf32>
    %169 = arith.mulf %165, %127 : vector<8x32xf32>
    %170 = arith.mulf %164, %168 : vector<8x32xf32>
    %171 = arith.addf %169, %170 : vector<8x32xf32>
    %172 = math.tanh %171 : vector<8x32xf32>
    %173 = arith.mulf %166, %172 : vector<8x32xf32>
    %c16_71 = arith.constant 16 : index
    %c0_72 = arith.constant 0 : index
    %174 = vector.load %arg22[%c16_71, %c0_72] : memref<72x32xf32, #tpu.memory_space<vmem>>, vector<8x32xf32>
    tpu.vector_store %arg22[%c16_71, %c0_72], %173 {strides = array<i32>} : memref<72x32xf32, #tpu.memory_space<vmem>>, vector<8x32xf32>,
    %c24 = arith.constant 24 : index
    %c0_73 = arith.constant 0 : index
    %175 = vector.load %arg21[%c24, %c0_73] : memref<72x128xf32, #tpu.memory_space<vmem>>, vector<8x128xf32>
    %176 = arith.truncf %149 : vector<8x32xf32> to vector<8x32xbf16>
    %cst_74 = arith.constant dense<0.000000e+00> : vector<8x128xf32>
    %177 = tpu.matmul %176, %31, %cst_74 {dimension_numbers = #tpu.dot_dimension_numbers<[1], [0], [0], [1], [0, 0, 1, 1], [], []>} : vector<8x32xbf16>, vector<32x128xbf16>, vector<8x128xf32> -> vector<8x128xf32>
    %178 = arith.addf %175, %177 : vector<8x128xf32>
    %179 = arith.negf %178 : vector<8x128xf32>
    %180 = math.exp %179 : vector<8x128xf32>
    %cst_75 = arith.constant 1.000000e+00 : f32
    %181 = vector.broadcast %cst_75 : f32 to vector<8x128xf32>
    %182 = arith.addf %181, %180 : vector<8x128xf32>
    %183 = arith.divf %181, %182 : vector<8x128xf32>
    %184 = vector.extract_strided_slice %183 {offsets = [0, 0], sizes = [8, 32], strides = [1, 1]} : vector<8x128xf32> to vector<8x32xf32>
    %185 = vector.extract_strided_slice %183 {offsets = [0, 32], sizes = [8, 32], strides = [1, 1]} : vector<8x128xf32> to vector<8x32xf32>
    %186 = vector.extract_strided_slice %183 {offsets = [0, 96], sizes = [8, 32], strides = [1, 1]} : vector<8x128xf32> to vector<8x32xf32>
    %187 = vector.extract_strided_slice %178 {offsets = [0, 64], sizes = [8, 32], strides = [1, 1]} : vector<8x128xf32> to vector<8x32xf32>
    %188 = math.tanh %187 : vector<8x32xf32>
    %189 = arith.mulf %185, %147 : vector<8x32xf32>
    %190 = arith.mulf %184, %188 : vector<8x32xf32>
    %191 = arith.addf %189, %190 : vector<8x32xf32>
    %192 = math.tanh %191 : vector<8x32xf32>
    %193 = arith.mulf %186, %192 : vector<8x32xf32>
    %194 = arith.truncf %193 : vector<8x32xf32> to vector<8x32xbf16>
    %195 = vector.shape_cast %32 : vector<1x32x128xbf16> to vector<32x128xbf16>
    %cst_76 = arith.constant dense<0.000000e+00> : vector<8x128xf32>
    %196 = tpu.matmul %194, %195, %cst_76 {dimension_numbers = #tpu.dot_dimension_numbers<[1], [0], [0], [1], [0, 0, 1, 1], [], []>} : vector<8x32xbf16>, vector<32x128xbf16>, vector<8x128xf32> -> vector<8x128xf32>
    %197 = arith.truncf %173 : vector<8x32xf32> to vector<8x32xbf16>
    %198 = vector.shape_cast %33 : vector<1x32x128xbf16> to vector<32x128xbf16>
    %cst_77 = arith.constant dense<0.000000e+00> : vector<8x128xf32>
    %199 = tpu.matmul %197, %198, %cst_77 {dimension_numbers = #tpu.dot_dimension_numbers<[1], [0], [0], [1], [0, 0, 1, 1], [], []>} : vector<8x32xbf16>, vector<32x128xbf16>, vector<8x128xf32> -> vector<8x128xf32>
    %200 = arith.addf %196, %199 : vector<8x128xf32>
    %201 = vector.broadcast %34 : vector<1x128xf32> to vector<8x128xf32>
    %202 = arith.addf %200, %201 : vector<8x128xf32>
    %203 = arith.negf %202 : vector<8x128xf32>
    %204 = math.exp %203 : vector<8x128xf32>
    %cst_78 = arith.constant 1.000000e+00 : f32
    %205 = vector.broadcast %cst_78 : f32 to vector<8x128xf32>
    %206 = arith.addf %205, %204 : vector<8x128xf32>
    %207 = arith.divf %205, %206 : vector<8x128xf32>
    %208 = vector.extract_strided_slice %207 {offsets = [0, 0], sizes = [8, 32], strides = [1, 1]} : vector<8x128xf32> to vector<8x32xf32>
    %209 = vector.extract_strided_slice %207 {offsets = [0, 32], sizes = [8, 32], strides = [1, 1]} : vector<8x128xf32> to vector<8x32xf32>
    %210 = vector.extract_strided_slice %207 {offsets = [0, 96], sizes = [8, 32], strides = [1, 1]} : vector<8x128xf32> to vector<8x32xf32>
    %211 = vector.extract_strided_slice %202 {offsets = [0, 64], sizes = [8, 32], strides = [1, 1]} : vector<8x128xf32> to vector<8x32xf32>
    %212 = math.tanh %211 : vector<8x32xf32>
    %213 = arith.mulf %209, %171 : vector<8x32xf32>
    %214 = arith.mulf %208, %212 : vector<8x32xf32>
    %215 = arith.addf %213, %214 : vector<8x32xf32>
    %216 = math.tanh %215 : vector<8x32xf32>
    %217 = arith.mulf %210, %216 : vector<8x32xf32>
    %c24_79 = arith.constant 24 : index
    %c0_80 = arith.constant 0 : index
    %218 = vector.load %arg22[%c24_79, %c0_80] : memref<72x32xf32, #tpu.memory_space<vmem>>, vector<8x32xf32>
    tpu.vector_store %arg22[%c24_79, %c0_80], %217 {strides = array<i32>} : memref<72x32xf32, #tpu.memory_space<vmem>>, vector<8x32xf32>,
    %c32 = arith.constant 32 : index
    %c0_81 = arith.constant 0 : index
    %219 = vector.load %arg21[%c32, %c0_81] : memref<72x128xf32, #tpu.memory_space<vmem>>, vector<8x128xf32>
    %220 = arith.truncf %193 : vector<8x32xf32> to vector<8x32xbf16>
    %cst_82 = arith.constant dense<0.000000e+00> : vector<8x128xf32>
    %221 = tpu.matmul %220, %31, %cst_82 {dimension_numbers = #tpu.dot_dimension_numbers<[1], [0], [0], [1], [0, 0, 1, 1], [], []>} : vector<8x32xbf16>, vector<32x128xbf16>, vector<8x128xf32> -> vector<8x128xf32>
    %222 = arith.addf %219, %221 : vector<8x128xf32>
    %223 = arith.negf %222 : vector<8x128xf32>
    %224 = math.exp %223 : vector<8x128xf32>
    %cst_83 = arith.constant 1.000000e+00 : f32
    %225 = vector.broadcast %cst_83 : f32 to vector<8x128xf32>
    %226 = arith.addf %225, %224 : vector<8x128xf32>
    %227 = arith.divf %225, %226 : vector<8x128xf32>
    %228 = vector.extract_strided_slice %227 {offsets = [0, 0], sizes = [8, 32], strides = [1, 1]} : vector<8x128xf32> to vector<8x32xf32>
    %229 = vector.extract_strided_slice %227 {offsets = [0, 32], sizes = [8, 32], strides = [1, 1]} : vector<8x128xf32> to vector<8x32xf32>
    %230 = vector.extract_strided_slice %227 {offsets = [0, 96], sizes = [8, 32], strides = [1, 1]} : vector<8x128xf32> to vector<8x32xf32>
    %231 = vector.extract_strided_slice %222 {offsets = [0, 64], sizes = [8, 32], strides = [1, 1]} : vector<8x128xf32> to vector<8x32xf32>
    %232 = math.tanh %231 : vector<8x32xf32>
    %233 = arith.mulf %229, %191 : vector<8x32xf32>
    %234 = arith.mulf %228, %232 : vector<8x32xf32>
    %235 = arith.addf %233, %234 : vector<8x32xf32>
    %236 = math.tanh %235 : vector<8x32xf32>
    %237 = arith.mulf %230, %236 : vector<8x32xf32>
    %238 = arith.truncf %237 : vector<8x32xf32> to vector<8x32xbf16>
    %239 = vector.shape_cast %32 : vector<1x32x128xbf16> to vector<32x128xbf16>
    %cst_84 = arith.constant dense<0.000000e+00> : vector<8x128xf32>
    %240 = tpu.matmul %238, %239, %cst_84 {dimension_numbers = #tpu.dot_dimension_numbers<[1], [0], [0], [1], [0, 0, 1, 1], [], []>} : vector<8x32xbf16>, vector<32x128xbf16>, vector<8x128xf32> -> vector<8x128xf32>
    %241 = arith.truncf %217 : vector<8x32xf32> to vector<8x32xbf16>
    %242 = vector.shape_cast %33 : vector<1x32x128xbf16> to vector<32x128xbf16>
    %cst_85 = arith.constant dense<0.000000e+00> : vector<8x128xf32>
    %243 = tpu.matmul %241, %242, %cst_85 {dimension_numbers = #tpu.dot_dimension_numbers<[1], [0], [0], [1], [0, 0, 1, 1], [], []>} : vector<8x32xbf16>, vector<32x128xbf16>, vector<8x128xf32> -> vector<8x128xf32>
    %244 = arith.addf %240, %243 : vector<8x128xf32>
    %245 = vector.broadcast %34 : vector<1x128xf32> to vector<8x128xf32>
    %246 = arith.addf %244, %245 : vector<8x128xf32>
    %247 = arith.negf %246 : vector<8x128xf32>
    %248 = math.exp %247 : vector<8x128xf32>
    %cst_86 = arith.constant 1.000000e+00 : f32
    %249 = vector.broadcast %cst_86 : f32 to vector<8x128xf32>
    %250 = arith.addf %249, %248 : vector<8x128xf32>
    %251 = arith.divf %249, %250 : vector<8x128xf32>
    %252 = vector.extract_strided_slice %251 {offsets = [0, 0], sizes = [8, 32], strides = [1, 1]} : vector<8x128xf32> to vector<8x32xf32>
    %253 = vector.extract_strided_slice %251 {offsets = [0, 32], sizes = [8, 32], strides = [1, 1]} : vector<8x128xf32> to vector<8x32xf32>
    %254 = vector.extract_strided_slice %251 {offsets = [0, 96], sizes = [8, 32], strides = [1, 1]} : vector<8x128xf32> to vector<8x32xf32>
    %255 = vector.extract_strided_slice %246 {offsets = [0, 64], sizes = [8, 32], strides = [1, 1]} : vector<8x128xf32> to vector<8x32xf32>
    %256 = math.tanh %255 : vector<8x32xf32>
    %257 = arith.mulf %253, %215 : vector<8x32xf32>
    %258 = arith.mulf %252, %256 : vector<8x32xf32>
    %259 = arith.addf %257, %258 : vector<8x32xf32>
    %260 = math.tanh %259 : vector<8x32xf32>
    %261 = arith.mulf %254, %260 : vector<8x32xf32>
    %c32_87 = arith.constant 32 : index
    %c0_88 = arith.constant 0 : index
    %262 = vector.load %arg22[%c32_87, %c0_88] : memref<72x32xf32, #tpu.memory_space<vmem>>, vector<8x32xf32>
    tpu.vector_store %arg22[%c32_87, %c0_88], %261 {strides = array<i32>} : memref<72x32xf32, #tpu.memory_space<vmem>>, vector<8x32xf32>,
    %c40 = arith.constant 40 : index
    %c0_89 = arith.constant 0 : index
    %263 = vector.load %arg21[%c40, %c0_89] : memref<72x128xf32, #tpu.memory_space<vmem>>, vector<8x128xf32>
    %264 = arith.truncf %237 : vector<8x32xf32> to vector<8x32xbf16>
    %cst_90 = arith.constant dense<0.000000e+00> : vector<8x128xf32>
    %265 = tpu.matmul %264, %31, %cst_90 {dimension_numbers = #tpu.dot_dimension_numbers<[1], [0], [0], [1], [0, 0, 1, 1], [], []>} : vector<8x32xbf16>, vector<32x128xbf16>, vector<8x128xf32> -> vector<8x128xf32>
    %266 = arith.addf %263, %265 : vector<8x128xf32>
    %267 = arith.negf %266 : vector<8x128xf32>
    %268 = math.exp %267 : vector<8x128xf32>
    %cst_91 = arith.constant 1.000000e+00 : f32
    %269 = vector.broadcast %cst_91 : f32 to vector<8x128xf32>
    %270 = arith.addf %269, %268 : vector<8x128xf32>
    %271 = arith.divf %269, %270 : vector<8x128xf32>
    %272 = vector.extract_strided_slice %271 {offsets = [0, 0], sizes = [8, 32], strides = [1, 1]} : vector<8x128xf32> to vector<8x32xf32>
    %273 = vector.extract_strided_slice %271 {offsets = [0, 32], sizes = [8, 32], strides = [1, 1]} : vector<8x128xf32> to vector<8x32xf32>
    %274 = vector.extract_strided_slice %271 {offsets = [0, 96], sizes = [8, 32], strides = [1, 1]} : vector<8x128xf32> to vector<8x32xf32>
    %275 = vector.extract_strided_slice %266 {offsets = [0, 64], sizes = [8, 32], strides = [1, 1]} : vector<8x128xf32> to vector<8x32xf32>
    %276 = math.tanh %275 : vector<8x32xf32>
    %277 = arith.mulf %273, %235 : vector<8x32xf32>
    %278 = arith.mulf %272, %276 : vector<8x32xf32>
    %279 = arith.addf %277, %278 : vector<8x32xf32>
    %280 = math.tanh %279 : vector<8x32xf32>
    %281 = arith.mulf %274, %280 : vector<8x32xf32>
    %282 = arith.truncf %281 : vector<8x32xf32> to vector<8x32xbf16>
    %283 = vector.shape_cast %32 : vector<1x32x128xbf16> to vector<32x128xbf16>
    %cst_92 = arith.constant dense<0.000000e+00> : vector<8x128xf32>
    %284 = tpu.matmul %282, %283, %cst_92 {dimension_numbers = #tpu.dot_dimension_numbers<[1], [0], [0], [1], [0, 0, 1, 1], [], []>} : vector<8x32xbf16>, vector<32x128xbf16>, vector<8x128xf32> -> vector<8x128xf32>
    %285 = arith.truncf %261 : vector<8x32xf32> to vector<8x32xbf16>
    %286 = vector.shape_cast %33 : vector<1x32x128xbf16> to vector<32x128xbf16>
    %cst_93 = arith.constant dense<0.000000e+00> : vector<8x128xf32>
    %287 = tpu.matmul %285, %286, %cst_93 {dimension_numbers = #tpu.dot_dimension_numbers<[1], [0], [0], [1], [0, 0, 1, 1], [], []>} : vector<8x32xbf16>, vector<32x128xbf16>, vector<8x128xf32> -> vector<8x128xf32>
    %288 = arith.addf %284, %287 : vector<8x128xf32>
    %289 = vector.broadcast %34 : vector<1x128xf32> to vector<8x128xf32>
    %290 = arith.addf %288, %289 : vector<8x128xf32>
    %291 = arith.negf %290 : vector<8x128xf32>
    %292 = math.exp %291 : vector<8x128xf32>
    %cst_94 = arith.constant 1.000000e+00 : f32
    %293 = vector.broadcast %cst_94 : f32 to vector<8x128xf32>
    %294 = arith.addf %293, %292 : vector<8x128xf32>
    %295 = arith.divf %293, %294 : vector<8x128xf32>
    %296 = vector.extract_strided_slice %295 {offsets = [0, 0], sizes = [8, 32], strides = [1, 1]} : vector<8x128xf32> to vector<8x32xf32>
    %297 = vector.extract_strided_slice %295 {offsets = [0, 32], sizes = [8, 32], strides = [1, 1]} : vector<8x128xf32> to vector<8x32xf32>
    %298 = vector.extract_strided_slice %295 {offsets = [0, 96], sizes = [8, 32], strides = [1, 1]} : vector<8x128xf32> to vector<8x32xf32>
    %299 = vector.extract_strided_slice %290 {offsets = [0, 64], sizes = [8, 32], strides = [1, 1]} : vector<8x128xf32> to vector<8x32xf32>
    %300 = math.tanh %299 : vector<8x32xf32>
    %301 = arith.mulf %297, %259 : vector<8x32xf32>
    %302 = arith.mulf %296, %300 : vector<8x32xf32>
    %303 = arith.addf %301, %302 : vector<8x32xf32>
    %304 = math.tanh %303 : vector<8x32xf32>
    %305 = arith.mulf %298, %304 : vector<8x32xf32>
    %c40_95 = arith.constant 40 : index
    %c0_96 = arith.constant 0 : index
    %306 = vector.load %arg22[%c40_95, %c0_96] : memref<72x32xf32, #tpu.memory_space<vmem>>, vector<8x32xf32>
    tpu.vector_store %arg22[%c40_95, %c0_96], %305 {strides = array<i32>} : memref<72x32xf32, #tpu.memory_space<vmem>>, vector<8x32xf32>,
    %c48 = arith.constant 48 : index
    %c0_97 = arith.constant 0 : index
    %307 = vector.load %arg21[%c48, %c0_97] : memref<72x128xf32, #tpu.memory_space<vmem>>, vector<8x128xf32>
    %308 = arith.truncf %281 : vector<8x32xf32> to vector<8x32xbf16>
    %cst_98 = arith.constant dense<0.000000e+00> : vector<8x128xf32>
    %309 = tpu.matmul %308, %31, %cst_98 {dimension_numbers = #tpu.dot_dimension_numbers<[1], [0], [0], [1], [0, 0, 1, 1], [], []>} : vector<8x32xbf16>, vector<32x128xbf16>, vector<8x128xf32> -> vector<8x128xf32>
    %310 = arith.addf %307, %309 : vector<8x128xf32>
    %311 = arith.negf %310 : vector<8x128xf32>
    %312 = math.exp %311 : vector<8x128xf32>
    %cst_99 = arith.constant 1.000000e+00 : f32
    %313 = vector.broadcast %cst_99 : f32 to vector<8x128xf32>
    %314 = arith.addf %313, %312 : vector<8x128xf32>
    %315 = arith.divf %313, %314 : vector<8x128xf32>
    %316 = vector.extract_strided_slice %315 {offsets = [0, 0], sizes = [8, 32], strides = [1, 1]} : vector<8x128xf32> to vector<8x32xf32>
    %317 = vector.extract_strided_slice %315 {offsets = [0, 32], sizes = [8, 32], strides = [1, 1]} : vector<8x128xf32> to vector<8x32xf32>
    %318 = vector.extract_strided_slice %315 {offsets = [0, 96], sizes = [8, 32], strides = [1, 1]} : vector<8x128xf32> to vector<8x32xf32>
    %319 = vector.extract_strided_slice %310 {offsets = [0, 64], sizes = [8, 32], strides = [1, 1]} : vector<8x128xf32> to vector<8x32xf32>
    %320 = math.tanh %319 : vector<8x32xf32>
    %321 = arith.mulf %317, %279 : vector<8x32xf32>
    %322 = arith.mulf %316, %320 : vector<8x32xf32>
    %323 = arith.addf %321, %322 : vector<8x32xf32>
    %324 = math.tanh %323 : vector<8x32xf32>
    %325 = arith.mulf %318, %324 : vector<8x32xf32>
    %326 = arith.truncf %325 : vector<8x32xf32> to vector<8x32xbf16>
    %327 = vector.shape_cast %32 : vector<1x32x128xbf16> to vector<32x128xbf16>
    %cst_100 = arith.constant dense<0.000000e+00> : vector<8x128xf32>
    %328 = tpu.matmul %326, %327, %cst_100 {dimension_numbers = #tpu.dot_dimension_numbers<[1], [0], [0], [1], [0, 0, 1, 1], [], []>} : vector<8x32xbf16>, vector<32x128xbf16>, vector<8x128xf32> -> vector<8x128xf32>
    %329 = arith.truncf %305 : vector<8x32xf32> to vector<8x32xbf16>
    %330 = vector.shape_cast %33 : vector<1x32x128xbf16> to vector<32x128xbf16>
    %cst_101 = arith.constant dense<0.000000e+00> : vector<8x128xf32>
    %331 = tpu.matmul %329, %330, %cst_101 {dimension_numbers = #tpu.dot_dimension_numbers<[1], [0], [0], [1], [0, 0, 1, 1], [], []>} : vector<8x32xbf16>, vector<32x128xbf16>, vector<8x128xf32> -> vector<8x128xf32>
    %332 = arith.addf %328, %331 : vector<8x128xf32>
    %333 = vector.broadcast %34 : vector<1x128xf32> to vector<8x128xf32>
    %334 = arith.addf %332, %333 : vector<8x128xf32>
    %335 = arith.negf %334 : vector<8x128xf32>
    %336 = math.exp %335 : vector<8x128xf32>
    %cst_102 = arith.constant 1.000000e+00 : f32
    %337 = vector.broadcast %cst_102 : f32 to vector<8x128xf32>
    %338 = arith.addf %337, %336 : vector<8x128xf32>
    %339 = arith.divf %337, %338 : vector<8x128xf32>
    %340 = vector.extract_strided_slice %339 {offsets = [0, 0], sizes = [8, 32], strides = [1, 1]} : vector<8x128xf32> to vector<8x32xf32>
    %341 = vector.extract_strided_slice %339 {offsets = [0, 32], sizes = [8, 32], strides = [1, 1]} : vector<8x128xf32> to vector<8x32xf32>
    %342 = vector.extract_strided_slice %339 {offsets = [0, 96], sizes = [8, 32], strides = [1, 1]} : vector<8x128xf32> to vector<8x32xf32>
    %343 = vector.extract_strided_slice %334 {offsets = [0, 64], sizes = [8, 32], strides = [1, 1]} : vector<8x128xf32> to vector<8x32xf32>
    %344 = math.tanh %343 : vector<8x32xf32>
    %345 = arith.mulf %341, %303 : vector<8x32xf32>
    %346 = arith.mulf %340, %344 : vector<8x32xf32>
    %347 = arith.addf %345, %346 : vector<8x32xf32>
    %348 = math.tanh %347 : vector<8x32xf32>
    %349 = arith.mulf %342, %348 : vector<8x32xf32>
    %c48_103 = arith.constant 48 : index
    %c0_104 = arith.constant 0 : index
    %350 = vector.load %arg22[%c48_103, %c0_104] : memref<72x32xf32, #tpu.memory_space<vmem>>, vector<8x32xf32>
    tpu.vector_store %arg22[%c48_103, %c0_104], %349 {strides = array<i32>} : memref<72x32xf32, #tpu.memory_space<vmem>>, vector<8x32xf32>,
    %c56 = arith.constant 56 : index
    %c0_105 = arith.constant 0 : index
    %351 = vector.load %arg21[%c56, %c0_105] : memref<72x128xf32, #tpu.memory_space<vmem>>, vector<8x128xf32>
    %352 = arith.truncf %325 : vector<8x32xf32> to vector<8x32xbf16>
    %cst_106 = arith.constant dense<0.000000e+00> : vector<8x128xf32>
    %353 = tpu.matmul %352, %31, %cst_106 {dimension_numbers = #tpu.dot_dimension_numbers<[1], [0], [0], [1], [0, 0, 1, 1], [], []>} : vector<8x32xbf16>, vector<32x128xbf16>, vector<8x128xf32> -> vector<8x128xf32>
    %354 = arith.addf %351, %353 : vector<8x128xf32>
    %355 = arith.negf %354 : vector<8x128xf32>
    %356 = math.exp %355 : vector<8x128xf32>
    %cst_107 = arith.constant 1.000000e+00 : f32
    %357 = vector.broadcast %cst_107 : f32 to vector<8x128xf32>
    %358 = arith.addf %357, %356 : vector<8x128xf32>
    %359 = arith.divf %357, %358 : vector<8x128xf32>
    %360 = vector.extract_strided_slice %359 {offsets = [0, 0], sizes = [8, 32], strides = [1, 1]} : vector<8x128xf32> to vector<8x32xf32>
    %361 = vector.extract_strided_slice %359 {offsets = [0, 32], sizes = [8, 32], strides = [1, 1]} : vector<8x128xf32> to vector<8x32xf32>
    %362 = vector.extract_strided_slice %359 {offsets = [0, 96], sizes = [8, 32], strides = [1, 1]} : vector<8x128xf32> to vector<8x32xf32>
    %363 = vector.extract_strided_slice %354 {offsets = [0, 64], sizes = [8, 32], strides = [1, 1]} : vector<8x128xf32> to vector<8x32xf32>
    %364 = math.tanh %363 : vector<8x32xf32>
    %365 = arith.mulf %361, %323 : vector<8x32xf32>
    %366 = arith.mulf %360, %364 : vector<8x32xf32>
    %367 = arith.addf %365, %366 : vector<8x32xf32>
    %368 = math.tanh %367 : vector<8x32xf32>
    %369 = arith.mulf %362, %368 : vector<8x32xf32>
    %370 = arith.truncf %369 : vector<8x32xf32> to vector<8x32xbf16>
    %371 = vector.shape_cast %32 : vector<1x32x128xbf16> to vector<32x128xbf16>
    %cst_108 = arith.constant dense<0.000000e+00> : vector<8x128xf32>
    %372 = tpu.matmul %370, %371, %cst_108 {dimension_numbers = #tpu.dot_dimension_numbers<[1], [0], [0], [1], [0, 0, 1, 1], [], []>} : vector<8x32xbf16>, vector<32x128xbf16>, vector<8x128xf32> -> vector<8x128xf32>
    %373 = arith.truncf %349 : vector<8x32xf32> to vector<8x32xbf16>
    %374 = vector.shape_cast %33 : vector<1x32x128xbf16> to vector<32x128xbf16>
    %cst_109 = arith.constant dense<0.000000e+00> : vector<8x128xf32>
    %375 = tpu.matmul %373, %374, %cst_109 {dimension_numbers = #tpu.dot_dimension_numbers<[1], [0], [0], [1], [0, 0, 1, 1], [], []>} : vector<8x32xbf16>, vector<32x128xbf16>, vector<8x128xf32> -> vector<8x128xf32>
    %376 = arith.addf %372, %375 : vector<8x128xf32>
    %377 = vector.broadcast %34 : vector<1x128xf32> to vector<8x128xf32>
    %378 = arith.addf %376, %377 : vector<8x128xf32>
    %379 = arith.negf %378 : vector<8x128xf32>
    %380 = math.exp %379 : vector<8x128xf32>
    %cst_110 = arith.constant 1.000000e+00 : f32
    %381 = vector.broadcast %cst_110 : f32 to vector<8x128xf32>
    %382 = arith.addf %381, %380 : vector<8x128xf32>
    %383 = arith.divf %381, %382 : vector<8x128xf32>
    %384 = vector.extract_strided_slice %383 {offsets = [0, 0], sizes = [8, 32], strides = [1, 1]} : vector<8x128xf32> to vector<8x32xf32>
    %385 = vector.extract_strided_slice %383 {offsets = [0, 32], sizes = [8, 32], strides = [1, 1]} : vector<8x128xf32> to vector<8x32xf32>
    %386 = vector.extract_strided_slice %383 {offsets = [0, 96], sizes = [8, 32], strides = [1, 1]} : vector<8x128xf32> to vector<8x32xf32>
    %387 = vector.extract_strided_slice %378 {offsets = [0, 64], sizes = [8, 32], strides = [1, 1]} : vector<8x128xf32> to vector<8x32xf32>
    %388 = math.tanh %387 : vector<8x32xf32>
    %389 = arith.mulf %385, %347 : vector<8x32xf32>
    %390 = arith.mulf %384, %388 : vector<8x32xf32>
    %391 = arith.addf %389, %390 : vector<8x32xf32>
    %392 = math.tanh %391 : vector<8x32xf32>
    %393 = arith.mulf %386, %392 : vector<8x32xf32>
    %c56_111 = arith.constant 56 : index
    %c0_112 = arith.constant 0 : index
    %394 = vector.load %arg22[%c56_111, %c0_112] : memref<72x32xf32, #tpu.memory_space<vmem>>, vector<8x32xf32>
    tpu.vector_store %arg22[%c56_111, %c0_112], %393 {strides = array<i32>} : memref<72x32xf32, #tpu.memory_space<vmem>>, vector<8x32xf32>,
    %c64 = arith.constant 64 : index
    %c0_113 = arith.constant 0 : index
    %395 = vector.load %arg21[%c64, %c0_113] : memref<72x128xf32, #tpu.memory_space<vmem>>, vector<8x128xf32>
    %396 = arith.truncf %369 : vector<8x32xf32> to vector<8x32xbf16>
    %cst_114 = arith.constant dense<0.000000e+00> : vector<8x128xf32>
    %397 = tpu.matmul %396, %31, %cst_114 {dimension_numbers = #tpu.dot_dimension_numbers<[1], [0], [0], [1], [0, 0, 1, 1], [], []>} : vector<8x32xbf16>, vector<32x128xbf16>, vector<8x128xf32> -> vector<8x128xf32>
    %398 = arith.addf %395, %397 : vector<8x128xf32>
    %399 = arith.negf %398 : vector<8x128xf32>
    %400 = math.exp %399 : vector<8x128xf32>
    %cst_115 = arith.constant 1.000000e+00 : f32
    %401 = vector.broadcast %cst_115 : f32 to vector<8x128xf32>
    %402 = arith.addf %401, %400 : vector<8x128xf32>
    %403 = arith.divf %401, %402 : vector<8x128xf32>
    %404 = vector.extract_strided_slice %403 {offsets = [0, 0], sizes = [8, 32], strides = [1, 1]} : vector<8x128xf32> to vector<8x32xf32>
    %405 = vector.extract_strided_slice %403 {offsets = [0, 32], sizes = [8, 32], strides = [1, 1]} : vector<8x128xf32> to vector<8x32xf32>
    %406 = vector.extract_strided_slice %403 {offsets = [0, 96], sizes = [8, 32], strides = [1, 1]} : vector<8x128xf32> to vector<8x32xf32>
    %407 = vector.extract_strided_slice %398 {offsets = [0, 64], sizes = [8, 32], strides = [1, 1]} : vector<8x128xf32> to vector<8x32xf32>
    %408 = math.tanh %407 : vector<8x32xf32>
    %409 = arith.mulf %405, %367 : vector<8x32xf32>
    %410 = arith.mulf %404, %408 : vector<8x32xf32>
    %411 = arith.addf %409, %410 : vector<8x32xf32>
    %412 = math.tanh %411 : vector<8x32xf32>
    %413 = arith.mulf %406, %412 : vector<8x32xf32>
    %414 = arith.truncf %413 : vector<8x32xf32> to vector<8x32xbf16>
    %415 = vector.shape_cast %32 : vector<1x32x128xbf16> to vector<32x128xbf16>
    %cst_116 = arith.constant dense<0.000000e+00> : vector<8x128xf32>
    %416 = tpu.matmul %414, %415, %cst_116 {dimension_numbers = #tpu.dot_dimension_numbers<[1], [0], [0], [1], [0, 0, 1, 1], [], []>} : vector<8x32xbf16>, vector<32x128xbf16>, vector<8x128xf32> -> vector<8x128xf32>
    %417 = arith.truncf %393 : vector<8x32xf32> to vector<8x32xbf16>
    %418 = vector.shape_cast %33 : vector<1x32x128xbf16> to vector<32x128xbf16>
    %cst_117 = arith.constant dense<0.000000e+00> : vector<8x128xf32>
    %419 = tpu.matmul %417, %418, %cst_117 {dimension_numbers = #tpu.dot_dimension_numbers<[1], [0], [0], [1], [0, 0, 1, 1], [], []>} : vector<8x32xbf16>, vector<32x128xbf16>, vector<8x128xf32> -> vector<8x128xf32>
    %420 = arith.addf %416, %419 : vector<8x128xf32>
    %421 = vector.broadcast %34 : vector<1x128xf32> to vector<8x128xf32>
    %422 = arith.addf %420, %421 : vector<8x128xf32>
    %423 = arith.negf %422 : vector<8x128xf32>
    %424 = math.exp %423 : vector<8x128xf32>
    %cst_118 = arith.constant 1.000000e+00 : f32
    %425 = vector.broadcast %cst_118 : f32 to vector<8x128xf32>
    %426 = arith.addf %425, %424 : vector<8x128xf32>
    %427 = arith.divf %425, %426 : vector<8x128xf32>
    %428 = vector.extract_strided_slice %427 {offsets = [0, 0], sizes = [8, 32], strides = [1, 1]} : vector<8x128xf32> to vector<8x32xf32>
    %429 = vector.extract_strided_slice %427 {offsets = [0, 32], sizes = [8, 32], strides = [1, 1]} : vector<8x128xf32> to vector<8x32xf32>
    %430 = vector.extract_strided_slice %427 {offsets = [0, 96], sizes = [8, 32], strides = [1, 1]} : vector<8x128xf32> to vector<8x32xf32>
    %431 = vector.extract_strided_slice %422 {offsets = [0, 64], sizes = [8, 32], strides = [1, 1]} : vector<8x128xf32> to vector<8x32xf32>
    %432 = math.tanh %431 : vector<8x32xf32>
    %433 = arith.mulf %429, %391 : vector<8x32xf32>
    %434 = arith.mulf %428, %432 : vector<8x32xf32>
    %435 = arith.addf %433, %434 : vector<8x32xf32>
    %436 = math.tanh %435 : vector<8x32xf32>
    %437 = arith.mulf %430, %436 : vector<8x32xf32>
    %c64_119 = arith.constant 64 : index
    %c0_120 = arith.constant 0 : index
    %438 = vector.load %arg22[%c64_119, %c0_120] : memref<72x32xf32, #tpu.memory_space<vmem>>, vector<8x32xf32>
    tpu.vector_store %arg22[%c64_119, %c0_120], %437 {strides = array<i32>} : memref<72x32xf32, #tpu.memory_space<vmem>>, vector<8x32xf32>,
    %c0_121 = arith.constant 0 : index
    %c0_122 = arith.constant 0 : index
    %439 = vector.load %arg22[%c0_121, %c0_122] : memref<72x32xf32, #tpu.memory_space<vmem>>, vector<72x32xf32>
    %440 = arith.truncf %439 : vector<72x32xf32> to vector<72x32xbf16>
    %c0_123 = arith.constant 0 : index
    %c0_124 = arith.constant 0 : index
    %441 = vector.load %arg14[%c0_123, %c0_124] : memref<32x128xbf16, #tpu.memory_space<vmem>>, vector<32x128xbf16>
    %cst_125 = arith.constant dense<0.000000e+00> : vector<72x128xf32>
    %442 = tpu.matmul %440, %441, %cst_125 {dimension_numbers = #tpu.dot_dimension_numbers<[1], [0], [0], [1], [0, 0, 1, 1], [], []>} : vector<72x32xbf16>, vector<32x128xbf16>, vector<72x128xf32> -> vector<72x128xf32>
    %c0_126 = arith.constant 0 : index
    %c0_127 = arith.constant 0 : index
    %443 = vector.load %arg15[%c0_126, %c0_127] : memref<1x128xf32, #tpu.memory_space<vmem>>, vector<1x128xf32>
    %444 = vector.broadcast %443 : vector<1x128xf32> to vector<72x128xf32>
    %445 = arith.addf %442, %444 : vector<72x128xf32>
    %c0_128 = arith.constant 0 : index
    %c0_129 = arith.constant 0 : index
    %446 = vector.load %arg18[%c0_128, %c0_129] : memref<72x128xf32, #tpu.memory_space<vmem>>, vector<72x128xf32>
    tpu.vector_store %arg18[%c0_128, %c0_129], %445 {strides = array<i32>} : memref<72x128xf32, #tpu.memory_space<vmem>>, vector<72x128xf32>,
    %c0_130 = arith.constant 0 : index
    %c0_131 = arith.constant 0 : index
    %c0_132 = arith.constant 0 : index
    %447 = vector.load %arg19[%c0_130, %c0_131, %c0_132] : memref<2x8x32xf32, #tpu.memory_space<vmem>>, vector<1x8x32xf32>
    %448 = vector.shape_cast %447 : vector<1x8x32xf32> to vector<8x32xf32>
    %449 = vector.shape_cast %413 : vector<8x32xf32> to vector<1x8x32xf32>
    tpu.vector_store %arg19[%c0_130, %c0_131, %c0_132], %449 {strides = array<i32>} : memref<2x8x32xf32, #tpu.memory_space<vmem>>, vector<1x8x32xf32>,
    %c0_133 = arith.constant 0 : index
    %c0_134 = arith.constant 0 : index
    %c0_135 = arith.constant 0 : index
    %450 = vector.load %arg20[%c0_133, %c0_134, %c0_135] : memref<2x8x32xf32, #tpu.memory_space<vmem>>, vector<1x8x32xf32>
    %451 = vector.shape_cast %450 : vector<1x8x32xf32> to vector<8x32xf32>
    %452 = vector.shape_cast %411 : vector<8x32xf32> to vector<1x8x32xf32>
    tpu.vector_store %arg20[%c0_133, %c0_134, %c0_135], %452 {strides = array<i32>} : memref<2x8x32xf32, #tpu.memory_space<vmem>>, vector<1x8x32xf32>,
    %c1_136 = arith.constant 1 : index
    %c0_137 = arith.constant 0 : index
    %c0_138 = arith.constant 0 : index
    %453 = vector.load %arg19[%c1_136, %c0_137, %c0_138] : memref<2x8x32xf32, #tpu.memory_space<vmem>>, vector<1x8x32xf32>
    %454 = vector.shape_cast %453 : vector<1x8x32xf32> to vector<8x32xf32>
    %455 = vector.shape_cast %437 : vector<8x32xf32> to vector<1x8x32xf32>
    tpu.vector_store %arg19[%c1_136, %c0_137, %c0_138], %455 {strides = array<i32>} : memref<2x8x32xf32, #tpu.memory_space<vmem>>, vector<1x8x32xf32>,
    %c1_139 = arith.constant 1 : index
    %c0_140 = arith.constant 0 : index
    %c0_141 = arith.constant 0 : index
    %456 = vector.load %arg20[%c1_139, %c0_140, %c0_141] : memref<2x8x32xf32, #tpu.memory_space<vmem>>, vector<1x8x32xf32>
    %457 = vector.shape_cast %456 : vector<1x8x32xf32> to vector<8x32xf32>
    %458 = vector.shape_cast %435 : vector<8x32xf32> to vector<1x8x32xf32>
    tpu.vector_store %arg20[%c1_139, %c0_140, %c0_141], %458 {strides = array<i32>} : memref<2x8x32xf32, #tpu.memory_space<vmem>>, vector<1x8x32xf32>,
    return
  }
  func.func @transform_0(%arg0: i32) -> (i32, i32) {
    %c0_i32 = arith.constant 0 : i32
    %c0_i32_0 = arith.constant 0 : i32
    %c0_i32_1 = arith.constant 0 : i32
    return %c0_i32, %c0_i32_0 : i32, i32
  }
  func.func @transform_1(%arg0: i32) -> (i32, i32) {
    %c0_i32 = arith.constant 0 : i32
    %c0_i32_0 = arith.constant 0 : i32
    %c0_i32_1 = arith.constant 0 : i32
    return %c0_i32, %c0_i32_0 : i32, i32
  }
  func.func @transform_2(%arg0: i32) -> (i32, i32) {
    %c0_i32 = arith.constant 0 : i32
    %c0_i32_0 = arith.constant 0 : i32
    %c0_i32_1 = arith.constant 0 : i32
    return %c0_i32, %c0_i32_0 : i32, i32
  }
  func.func @transform_3(%arg0: i32) -> (i32, i32) {
    %c0_i32 = arith.constant 0 : i32
    %c0_i32_0 = arith.constant 0 : i32
    %c0_i32_1 = arith.constant 0 : i32
    return %c0_i32, %c0_i32_0 : i32, i32
  }
  func.func @transform_4(%arg0: i32) -> (i32, i32) {
    %c0_i32 = arith.constant 0 : i32
    %c0_i32_0 = arith.constant 0 : i32
    %c0_i32_1 = arith.constant 0 : i32
    return %c0_i32, %c0_i32_0 : i32, i32
  }
  func.func @transform_5(%arg0: i32) -> (i32, i32) {
    %c0_i32 = arith.constant 0 : i32
    %c0_i32_0 = arith.constant 0 : i32
    %c0_i32_1 = arith.constant 0 : i32
    return %c0_i32, %c0_i32_0 : i32, i32
  }
  func.func @transform_6(%arg0: i32) -> (i32, i32) {
    %c0_i32 = arith.constant 0 : i32
    %c0_i32_0 = arith.constant 0 : i32
    %c0_i32_1 = arith.constant 0 : i32
    return %c0_i32, %c0_i32_0 : i32, i32
  }
  func.func @transform_7(%arg0: i32) -> (i32, i32) {
    %c0_i32 = arith.constant 0 : i32
    %c0_i32_0 = arith.constant 0 : i32
    %c0_i32_1 = arith.constant 0 : i32
    return %c0_i32, %c0_i32_0 : i32, i32
  }
  func.func @transform_8(%arg0: i32) -> (i32, i32) {
    %c0_i32 = arith.constant 0 : i32
    %c0_i32_0 = arith.constant 0 : i32
    %c0_i32_1 = arith.constant 0 : i32
    return %c0_i32, %c0_i32_0 : i32, i32
  }
  func.func @transform_9(%arg0: i32) -> (i32, i32) {
    %c0_i32 = arith.constant 0 : i32
    %c0_i32_0 = arith.constant 0 : i32
    %c0_i32_1 = arith.constant 0 : i32
    return %c0_i32, %c0_i32_0 : i32, i32
  }
  func.func @transform_10(%arg0: i32) -> (i32, i32, i32) {
    %c0_i32 = arith.constant 0 : i32
    %c0_i32_0 = arith.constant 0 : i32
    %c0_i32_1 = arith.constant 0 : i32
    %c0_i32_2 = arith.constant 0 : i32
    return %c0_i32, %c0_i32_0, %c0_i32_1 : i32, i32, i32
  }
  func.func @transform_11(%arg0: i32) -> (i32, i32, i32) {
    %c0_i32 = arith.constant 0 : i32
    %c0_i32_0 = arith.constant 0 : i32
    %c0_i32_1 = arith.constant 0 : i32
    %c0_i32_2 = arith.constant 0 : i32
    return %c0_i32, %c0_i32_0, %c0_i32_1 : i32, i32, i32
  }
  func.func @transform_12(%arg0: i32) -> (i32, i32) {
    %c0_i32 = arith.constant 0 : i32
    %c0_i32_0 = arith.constant 0 : i32
    %c0_i32_1 = arith.constant 0 : i32
    return %c0_i32, %c0_i32_0 : i32, i32
  }
  func.func @transform_13(%arg0: i32) -> (i32, i32) {
    %c0_i32 = arith.constant 0 : i32
    %c0_i32_0 = arith.constant 0 : i32
    %c0_i32_1 = arith.constant 0 : i32
    return %c0_i32, %c0_i32_0 : i32, i32
  }
  func.func @transform_14(%arg0: i32) -> (i32, i32) {
    %c0_i32 = arith.constant 0 : i32
    %c0_i32_0 = arith.constant 0 : i32
    %c0_i32_1 = arith.constant 0 : i32
    return %c0_i32, %c0_i32_0 : i32, i32
  }
  func.func @transform_15(%arg0: i32) -> (i32, i32, i32) {
    %c0_i32 = arith.constant 0 : i32
    %c0_i32_0 = arith.constant 0 : i32
    %c0_i32_1 = arith.constant 0 : i32
    %c0_i32_2 = arith.constant 0 : i32
    return %c0_i32, %c0_i32_0, %c0_i32_1 : i32, i32, i32
  }
  func.func @transform_16(%arg0: i32) -> (i32, i32, i32) {
    %c0_i32 = arith.constant 0 : i32
    %c0_i32_0 = arith.constant 0 : i32
    %c0_i32_1 = arith.constant 0 : i32
    %c0_i32_2 = arith.constant 0 : i32
    return %c0_i32, %c0_i32_0, %c0_i32_1 : i32, i32, i32
  }
  func.func @transform_17(%arg0: i32) -> (i32, i32) {
    %c0_i32 = arith.constant 0 : i32
    %c0_i32_0 = arith.constant 0 : i32
    %c0_i32_1 = arith.constant 0 : i32
    return %c0_i32, %c0_i32_0 : i32, i32
  }
  func.func @transform_18(%arg0: i32) -> (i32, i32, i32) {
    %c0_i32 = arith.constant 0 : i32
    %c0_i32_0 = arith.constant 0 : i32
    %c0_i32_1 = arith.constant 0 : i32
    %c0_i32_2 = arith.constant 0 : i32
    return %c0_i32, %c0_i32_0, %c0_i32_1 : i32, i32, i32
  }
  func.func @transform_19(%arg0: i32) -> (i32, i32, i32) {
    %c0_i32 = arith.constant 0 : i32
    %c0_i32_0 = arith.constant 0 : i32
    %c0_i32_1 = arith.constant 0 : i32
    %c0_i32_2 = arith.constant 0 : i32
    return %c0_i32, %c0_i32_0, %c0_i32_1 : i32, i32, i32
  }
}

</mosaic_0001>

<bundles_post_ra>
// kernel: _forward_jit.1
= control target key start
LH: loop header
LB: loop body
LE: loop exit
PB: predicated region body
PF: predicated region fallthrough
CT: control target
= control target key end

     0   :  { %v3841_v0 = vmov 0.0   ;;  %vm3842_vm0 = vmmov 0   ;;  %vm335_vm1 = vcmask 1041408   ;;  %vm259_vm2 = vcmask 293888   ;;  %s4817_s1 = inlined_call_operand.vmem [shape: bf16[36,64], index: 1, kind: input, shape index: {}]   ;;  %s4818_s0 = inlined_call_operand.vmem [shape: bf16[392,36], index: 0, kind: input, shape index: {}]   ;;  %s4819_s2 = inlined_call_operand.vmem [shape: f32[1,64], index: 2, kind: input, shape index: {}]   ;;  %s4820_s3 = inlined_call_operand.vmem [shape: bf16[8,392], index: 3, kind: input, shape index: {}]   ;;  %s4821_s4 = inlined_call_operand.vmem [shape: bf16[64,32], index: 4, kind: input, shape index: {}]   ;;  %s4822_s7 = inlined_call_operand.vmem [shape: bf16[32,128], index: 7, kind: input, shape index: {}]   ;;  %s4823_s6 = inlined_call_operand.vmem [shape: bf16[64,32], index: 6, kind: input, shape index: {}]   ;;  %s4824_s9 = inlined_call_operand.vmem [shape: bf16[32,128], index: 9, kind: input, shape index: {}]   ;;  %s4825_s5 = inlined_call_operand.vmem [shape: f32[1,32], index: 5, kind: input, shape index: {}]   ;;  %s4826_s15 = inlined_call_operand.vmem [shape: f32[2,8,32], index: 15, kind: input, shape index: {}]   ;;  %s4827_s8 = inlined_call_operand.vmem [shape: f32[1,128], index: 8, kind: input, shape index: {}]   ;;  %s4828_s16 = inlined_call_operand.vmem [shape: f32[2,8,32], index: 16, kind: input, shape index: {}]   ;;  %s4829_s11 = inlined_call_operand.vmem [shape: bf16[1,32,128], index: 11, kind: input, shape index: {}]   ;;  %s4830_s10 = inlined_call_operand.vmem [shape: bf16[1,32,128], index: 10, kind: input, shape index: {}]   ;;  %s4831_s12 = inlined_call_operand.vmem [shape: f32[1,128], index: 12, kind: input, shape index: {}]   ;;  %s4832_s13 = inlined_call_operand.vmem [shape: bf16[32,128], index: 13, kind: input, shape index: {}]   ;;  %s4833_s18 = inlined_call_operand.vmem [shape: f32[2,8,32], index: 18, kind: output, shape index: {1}]   ;;  %s4834_s19 = inlined_call_operand.vmem [shape: f32[2,8,32], index: 19, kind: output, shape index: {2}]   ;;  %s4835_s14 = inlined_call_operand.vmem [shape: f32[1,128], index: 14, kind: input, shape index: {}]   ;;  %s4836_s17 = inlined_call_operand.vmem [shape: f32[72,128], index: 17, kind: output, shape index: {0}]  }
   0x1   :  { %4840 = sst [smem:[#allocation4_spill]] %s4817_s1  ;;  %3251 = vmatprep.subr.bf16.mxu0 %v3841_v0  ;;  %3257 = vmatprep.mubr.msk.bf16.mxu0 %vm3842_vm0, %v3841_v0  ;;  %v3843_v41 = vmov 0   ;;  %vm660_vm3 = vcmask 64512   ;;  %vm664_vm4 = vcmask 1043456   ;;  %vm788_vm5 = vcmask 523264  }
   0x2   :  { %4841 = sst [smem:[#allocation5_spill]] %s4818_s0  ;;  %s4844_s20 = sld [smem:[#allocation4_spill]]  ;;  %708 = vmatprep.subr.bf16.mxu1 %v3843_v41  ;;  %vm857_vm6 = vcmask 261120  }
   0x3   :  { %4842 = sst [smem:[#allocation6_spill]] %s4819_s2  ;;  %s4845_s25 = sld [smem:[#allocation5_spill]] }
   0x4   :  { %4843 = sst [smem:[#allocation7_spill]] %s4820_s3  ;;  %s4846_s21 = sld [smem:[#allocation6_spill]] }
   0x5   :  { %s4847_s22 = sld [smem:[#allocation7_spill]] }
   0x8   :  { %v3640_v1 = vld [vmem:[%s4844_s20] sm:$0xff]   ;;  %v3641_v2 = vld [vmem:[%s4844_s20 + $0x8] sm:$0xff]   ;;  %v3642_v3 = vld [vmem:[%s4844_s20 + $0x10] ss:$0 sps:$4 sm:$0x33]  }
   0x9   :  { %3252 = vmatpush3.bf16.msra.mxu0 %v3640_v1  ;;  %v337_v4 = vsel %vm335_vm1, %v3642_v3, 0  ;;  %v3643_v5 = vld [vmem:[%s4845_s25] sm:$0xff]   ;;  %v3644_v6 = vld [vmem:[%s4845_s25 + $0x8] sm:$0xff]   ;;  %v3645_v7 = vld [vmem:[%s4845_s25 + $0x10] sm:$0xff]  }
   0xa   :  { %3253 = vmatprep.subr.bf16.mxu0 %v3841_v0  ;;  %v3646_v8 = vld [vmem:[%s4845_s25 + $0x18] sm:$0xff]   ;;  %v3647_v9 = vld [vmem:[%s4845_s25 + $0x20] sm:$0xff]   ;;  %v3648_v10 = vld [vmem:[%s4845_s25 + $0x28] sm:$0xff]  }
   0xb   :  { %v3649_v11 = vld [vmem:[%s4845_s25 + $0x30] sm:$0xff]   ;;  %v3650_v12 = vld [vmem:[%s4845_s25 + $0x38] sm:$0xff]   ;;  %v3651_v13 = vld [vmem:[%s4845_s25 + $0x40] sm:$0xff]  }
   0xc   :  { %v3652_v14 = vld [vmem:[%s4845_s25 + $0x48] sm:$0xff]   ;;  %v3653_v15 = vld [vmem:[%s4845_s25 + $0x50] sm:$0xff]   ;;  %v3654_v16 = vld [vmem:[%s4845_s25 + $0x58] sm:$0xff]  }
   0xd   :  { %3254 = vmatpush3.bf16.msra.mxu0 %v3641_v2  ;;  %v3655_v17 = vld [vmem:[%s4845_s25 + $0x60] sm:$0xff]   ;;  %v3656_v18 = vld [vmem:[%s4845_s25 + $0x68] sm:$0xff]   ;;  %v3657_v19 = vld [vmem:[%s4845_s25 + $0x70] sm:$0xff]  }
   0xe   :  { %3255 = vmatprep.subr.bf16.mxu0 %v3841_v0  ;;  %v3658_v20 = vld [vmem:[%s4845_s25 + $0x78] sm:$0xff]   ;;  %v3659_v21 = vld [vmem:[%s4845_s25 + $0x80] sm:$0xff]   ;;  %v3660_v22 = vld [vmem:[%s4845_s25 + $0x88] sm:$0xff]  }
   0xf   :  { %v3661_v23 = vld [vmem:[%s4845_s25 + $0x90] sm:$0xff]   ;;  %v3662_v24 = vld [vmem:[%s4845_s25 + $0x98] sm:$0xff]   ;;  %v3663_v25 = vld [vmem:[%s4845_s25 + $0xa0] sm:$0xff]  }
  0x10   :  { %v3664_v26 = vld [vmem:[%s4845_s25 + $0xa8] sm:$0xff]   ;;  %v3665_v27 = vld [vmem:[%s4845_s25 + $0xb0] sm:$0xff]   ;;  %v3666_v28 = vld [vmem:[%s4845_s25 + $0xb8] sm:$0xff]  }
  0x11   :  { %3256 = vmatpush3.bf16.msra.mxu0 %v337_v4  ;;  %v3667_v29 = vld [vmem:[%s4845_s25 + $0xc0] ss:$0 sps:$4 sm:$0xff]  }
  0x12   :  { %v4112_v30 = vld [vmem:[%s4846_s21] ss:$0 sm:$0xff] }
  0x14   :  { %3258 = vmatmul.mubr.msk.bf16.vlgmr.msra.gmra.mrb[0].mxu0 %vm259_vm2, %v3643_v5 }
  0x15   :  { %3261 = vmatprep.mubr.msk.bf16.mxu0 %vm3842_vm0, %v3841_v0 }
  0x1c   :  { %3262 = vmatmul.mubr.msk.bf16.gmra.mrb[4].mxu0 %vm259_vm2, %v3644_v6 }
  0x1d   :  { %3265 = vmatprep.mubr.msk.bf16.mxu0 %vm3842_vm0, %v3841_v0 }
  0x24   :  { %3266 = vmatmul.mubr.msk.bf16.gmra.mrb[8].mxu0 %vm259_vm2, %v3645_v7 }
  0x25   :  { %3269 = vmatprep.mubr.msk.bf16.mxu0 %vm3842_vm0, %v3841_v0 }
  0x2c   :  { %3270 = vmatmul.mubr.msk.bf16.gmra.mrb[12].mxu0 %vm259_vm2, %v3646_v8 }
  0x2d   :  { %3273 = vmatprep.mubr.msk.bf16.mxu0 %vm3842_vm0, %v3841_v0 }
  0x34   :  { %3274 = vmatmul.mubr.msk.bf16.gmra.mrb[16].mxu0 %vm259_vm2, %v3647_v9 }
  0x35   :  { %3277 = vmatprep.mubr.msk.bf16.mxu0 %vm3842_vm0, %v3841_v0 }
  0x3c   :  { %3278 = vmatmul.mubr.msk.bf16.gmra.mrb[20].mxu0 %vm259_vm2, %v3648_v10 }
  0x3d   :  { %3281 = vmatprep.mubr.msk.bf16.mxu0 %vm3842_vm0, %v3841_v0 }
  0x44   :  { %3282 = vmatmul.mubr.msk.bf16.gmra.mrb[24].mxu0 %vm259_vm2, %v3649_v11 }
  0x45   :  { %3285 = vmatprep.mubr.msk.bf16.mxu0 %vm3842_vm0, %v3841_v0 }
  0x4c   :  { %3286 = vmatmul.mubr.msk.bf16.gmra.mrb[28].mxu0 %vm259_vm2, %v3650_v12 }
  0x4d   :  { %3289 = vmatprep.mubr.msk.bf16.mxu0 %vm3842_vm0, %v3841_v0 }
  0x54   :  { %3290 = vmatmul.mubr.msk.bf16.gmra.mrb[32].mxu0 %vm259_vm2, %v3651_v13 }
  0x55   :  { %3293 = vmatprep.mubr.msk.bf16.mxu0 %vm3842_vm0, %v3841_v0 }
  0x5c   :  { %3294 = vmatmul.mubr.msk.bf16.gmra.mrb[36].mxu0 %vm259_vm2, %v3652_v14 }
  0x5d   :  { %3297 = vmatprep.mubr.msk.bf16.mxu0 %vm3842_vm0, %v3841_v0 }
  0x64   :  { %3298 = vmatmul.mubr.msk.bf16.gmra.mrb[40].mxu0 %vm259_vm2, %v3653_v15 }
  0x65   :  { %3301 = vmatprep.mubr.msk.bf16.mxu0 %vm3842_vm0, %v3841_v0 }
  0x6c   :  { %3302 = vmatmul.mubr.msk.bf16.gmra.mrb[44].mxu0 %vm259_vm2, %v3654_v16 }
  0x6d   :  { %3305 = vmatprep.mubr.msk.bf16.mxu0 %vm3842_vm0, %v3841_v0 }
  0x74   :  { %3306 = vmatmul.mubr.msk.bf16.gmra.mrb[48].mxu0 %vm259_vm2, %v3655_v17 }
  0x75   :  { %3309 = vmatprep.mubr.msk.bf16.mxu0 %vm3842_vm0, %v3841_v0 }
  0x7c   :  { %3310 = vmatmul.mubr.msk.bf16.gmra.mrb[52].mxu0 %vm259_vm2, %v3656_v18 }
  0x7d   :  { %3313 = vmatprep.mubr.msk.bf16.mxu0 %vm3842_vm0, %v3841_v0 }
  0x84   :  { %3314 = vmatmul.mubr.msk.bf16.gmra.mrb[56].mxu0 %vm259_vm2, %v3657_v19 }
  0x85   :  { %3317 = vmatprep.mubr.msk.bf16.mxu0 %vm3842_vm0, %v3841_v0 }
  0x8c   :  { %3318 = vmatmul.mubr.msk.bf16.gmra.mrb[60].mxu0 %vm259_vm2, %v3658_v20 }
  0x8d   :  { %3321 = vmatprep.mubr.msk.bf16.mxu0 %vm3842_vm0, %v3841_v0 }
  0x94   :  { %3322 = vmatmul.mubr.msk.bf16.gmra.mrb[64].mxu0 %vm259_vm2, %v3659_v21 }
  0x95   :  { %3325 = vmatprep.mubr.msk.bf16.mxu0 %vm3842_vm0, %v3841_v0 }
  0x9c   :  { %3326 = vmatmul.mubr.msk.bf16.gmra.mrb[68].mxu0 %vm259_vm2, %v3660_v22 }
  0x9d   :  { %3329 = vmatprep.mubr.msk.bf16.mxu0 %vm3842_vm0, %v3841_v0 }
  0xa4   :  { %3330 = vmatmul.mubr.msk.bf16.gmra.mrb[72].mxu0 %vm259_vm2, %v3661_v23 }
  0xa5   :  { %3333 = vmatprep.mubr.msk.bf16.mxu0 %vm3842_vm0, %v3841_v0 }
  0xac   :  { %3334 = vmatmul.mubr.msk.bf16.gmra.mrb[76].mxu0 %vm259_vm2, %v3662_v24 }
  0xad   :  { %3337 = vmatprep.mubr.msk.bf16.mxu0 %vm3842_vm0, %v3841_v0 }
  0xb4   :  { %3338 = vmatmul.mubr.msk.bf16.gmra.mrb[80].mxu0 %vm259_vm2, %v3663_v25 }
  0xb5   :  { %3341 = vmatprep.mubr.msk.bf16.mxu0 %vm3842_vm0, %v3841_v0 }
  0xbc   :  { %3342 = vmatmul.mubr.msk.bf16.gmra.mrb[84].mxu0 %vm259_vm2, %v3664_v26 }
  0xbd   :  { %3345 = vmatprep.mubr.msk.bf16.mxu0 %vm3842_vm0, %v3841_v0 }
  0xc4   :  { %3346 = vmatmul.mubr.msk.bf16.gmra.mrb[88].mxu0 %vm259_vm2, %v3665_v27 }
  0xc5   :  { %3349 = vmatprep.mubr.msk.bf16.mxu0 %vm3842_vm0, %v3841_v0 }
  0xcc   :  { %3350 = vmatmul.mubr.msk.bf16.gmra.mrb[92].mxu0 %vm259_vm2, %v3666_v28 }
  0xcd   :  { %3353 = vmatprep.mubr.msk.bf16.mxu0 %vm3842_vm0, %v3841_v0 }
  0xd4   :  { %3354 = vmatmul.mubr.msk.bf16.gmra.mrb[96].mxu0 %vm259_vm2, %v3667_v29 }
  0xe7   :  { %v373_v31 = vpop.f32.mrb[0].mxu0 }
  0xe8   :  { %v374_v32 = vadd.f32 %v4112_v30, %v373_v31  ;;  %v3259_v33 = vpop.f32.mrb[1].mxu0 }
  0xe9   :  { %v376_v34 = vpop.f32.mrb[2].mxu0 }
  0xea   :  { %v377_v35 = vadd.f32 %v4112_v30, %v376_v34  ;;  %v3260_v36 = vpop.f32.mrb[3].mxu0  ;;  %v571_v37 = vmax.f32 %v374_v32, 0.0 }
  0xec   :  { %v572_v38 = vmax.f32 %v377_v35, 0.0 }
  0xee   :  { %v4116_v39 = vpack.c.bf16 %v572_v38, %v571_v37 }
  0xef   :  { %v381_v40 = vpop.f32.mrb[4].mxu0 }
  0xf0   :  { %v382_v42 = vadd.f32 %v4112_v30, %v381_v40  ;;  %v3263_v43 = vpop.f32.mrb[5].mxu0 }
  0xf1   :  { %v384_v44 = vpop.f32.mrb[6].mxu0 }
  0xf2   :  { %v385_v45 = vadd.f32 %v4112_v30, %v384_v44  ;;  %v3264_v46 = vpop.f32.mrb[7].mxu0  ;;  %v573_v47 = vmax.f32 %v382_v42, 0.0 }
  0xf4   :  { %v574_v48 = vmax.f32 %v385_v45, 0.0 }
  0xf6   :  { %v4121_v49 = vpack.c.bf16 %v574_v48, %v573_v47  ;;  %v4151_v47 = vld [vmem:[%s4847_s22] sm:$0xff] }
  0xf7   :  { %v389_v50 = vpop.f32.mrb[8].mxu0 }
  0xf8   :  { %v390_v51 = vadd.f32 %v4112_v30, %v389_v50  ;;  %v3267_v52 = vpop.f32.mrb[9].mxu0  ;;  %v3013_v50 = vcombine.high %v4151_v47, %v4151_v47 }
  0xf9   :  { %v392_v53 = vpop.f32.mrb[10].mxu0 }
  0xfa   :  { %v393_v54 = vadd.f32 %v4112_v30, %v392_v53  ;;  %v3268_v55 = vpop.f32.mrb[11].mxu0  ;;  %v575_v56 = vmax.f32 %v390_v51, 0.0  ;;  %700 = vmatprep.mubr.bf16.mxu0 %v3013_v50 }
  0xfc   :  { %v576_v57 = vmax.f32 %v393_v54, 0.0 }
  0xfe   :  { %v4125_v58 = vpack.c.bf16 %v576_v57, %v575_v56  ;;  %v4159_v56 = vld [vmem:[%s4847_s22 + $0x8] sm:$0xff]  ;;  %s3845_s22 = smov 32  }
  0xff   :  { %v397_v59 = vpop.f32.mrb[12].mxu0 }
 0x100   :  { %v398_v60 = vadd.f32 %v4112_v30, %v397_v59  ;;  %v3271_v61 = vpop.f32.mrb[13].mxu0  ;;  %v3015_v59 = vcombine.high %v4159_v56, %v4159_v56 }
 0x101   :  { %v400_v62 = vpop.f32.mrb[14].mxu0 }
 0x102   :  { %v401_v63 = vadd.f32 %v4112_v30, %v400_v62  ;;  %v3272_v1 = vpop.f32.mrb[15].mxu0  ;;  %v577_v2 = vmax.f32 %v398_v60, 0.0  ;;  %3016 = vmatprep.mubr.msk.bf16.mxu1 %vm660_vm3, %v3015_v59 }
 0x104   :  { %v578_v3 = vmax.f32 %v401_v63, 0.0 }
 0x106   :  { %v4129_v4 = vpack.c.bf16 %v578_v3, %v577_v2 }
 0x107   :  { %v405_v5 = vpop.f32.mrb[16].mxu0 }
 0x108   :  { %v406_v6 = vadd.f32 %v4112_v30, %v405_v5  ;;  %v3275_v7 = vpop.f32.mrb[17].mxu0 }
 0x109   :  { %v408_v8 = vpop.f32.mrb[18].mxu0 }
 0x10a   :  { %v409_v9 = vadd.f32 %v4112_v30, %v408_v8  ;;  %v3276_v10 = vpop.f32.mrb[19].mxu0  ;;  %v579_v11 = vmax.f32 %v406_v6, 0.0 }
 0x10c   :  { %v580_v12 = vmax.f32 %v409_v9, 0.0 }
 0x10e   :  { %v4133_v13 = vpack.c.bf16 %v580_v12, %v579_v11 }
 0x10f   :  { %v413_v14 = vpop.f32.mrb[20].mxu0 }
 0x110   :  { %v414_v15 = vadd.f32 %v4112_v30, %v413_v14  ;;  %v3279_v16 = vpop.f32.mrb[21].mxu0 }
 0x111   :  { %v416_v17 = vpop.f32.mrb[22].mxu0 }
 0x112   :  { %v417_v18 = vadd.f32 %v4112_v30, %v416_v17  ;;  %v3280_v19 = vpop.f32.mrb[23].mxu0  ;;  %v581_v20 = vmax.f32 %v414_v15, 0.0 }
 0x114   :  { %v582_v21 = vmax.f32 %v417_v18, 0.0 }
 0x116   :  { %v4137_v22 = vpack.c.bf16 %v582_v21, %v581_v20 }
 0x117   :  { %v421_v23 = vpop.f32.mrb[24].mxu0 }
 0x118   :  { %v422_v24 = vadd.f32 %v4112_v30, %v421_v23  ;;  %v3283_v25 = vpop.f32.mrb[25].mxu0 }
 0x119   :  { %v424_v26 = vpop.f32.mrb[26].mxu0 }
 0x11a   :  { %v425_v27 = vadd.f32 %v4112_v30, %v424_v26  ;;  %v3284_v28 = vpop.f32.mrb[27].mxu0  ;;  %v583_v29 = vmax.f32 %v422_v24, 0.0 }
 0x11c   :  { %v584_v31 = vmax.f32 %v425_v27, 0.0 }
 0x11e   :  { %v4141_v32 = vpack.c.bf16 %v584_v31, %v583_v29 }
 0x11f   :  { %v429_v33 = vpop.f32.mrb[28].mxu0 }
 0x120   :  { %v430_v34 = vadd.f32 %v4112_v30, %v429_v33  ;;  %v3287_v35 = vpop.f32.mrb[29].mxu0 }
 0x121   :  { %v432_v36 = vpop.f32.mrb[30].mxu0 }
 0x122   :  { %v433_v37 = vadd.f32 %v4112_v30, %v432_v36  ;;  %v3288_v38 = vpop.f32.mrb[31].mxu0  ;;  %v585_v40 = vmax.f32 %v430_v34, 0.0 }
 0x124   :  { %v586_v42 = vmax.f32 %v433_v37, 0.0 }
 0x126   :  { %v4145_v43 = vpack.c.bf16 %v586_v42, %v585_v40 }
 0x127   :  { %v437_v44 = vpop.f32.mrb[32].mxu0 }
 0x128   :  { %v438_v45 = vadd.f32 %v4112_v30, %v437_v44  ;;  %v3291_v46 = vpop.f32.mrb[33].mxu0 }
 0x129   :  { %v440_v48 = vpop.f32.mrb[34].mxu0 }
 0x12a   :  { %v441_v51 = vadd.f32 %v4112_v30, %v440_v48  ;;  %v3292_v52 = vpop.f32.mrb[35].mxu0  ;;  %v587_v53 = vmax.f32 %v438_v45, 0.0 }
 0x12c   :  { %v588_v54 = vmax.f32 %v441_v51, 0.0 }
 0x12e   :  { %v630_v55 = vpack.c.bf16 %v588_v54, %v587_v53 }
 0x12f   :  { %v445_v57 = vpop.f32.mrb[36].mxu0 }
 0x130   :  { %v446_v60 = vadd.f32 %v4112_v30, %v445_v57  ;;  %v3295_v61 = vpop.f32.mrb[37].mxu0  ;;  %3127 = vmatprep.subr.bf16.mxu0 %v630_v55 }
 0x131   :  { %v448_v62 = vpop.f32.mrb[38].mxu0  ;;  %3128 = vmatpush3.bf16.msra.mxu0 %v4116_v39 }
 0x132   :  { %v449_v63 = vadd.f32 %v4112_v30, %v448_v62  ;;  %v3296_v1 = vpop.f32.mrb[39].mxu0  ;;  %v589_v2 = vmax.f32 %v446_v60, 0.0 }
 0x134   :  { %v590_v3 = vmax.f32 %v449_v63, 0.0 }
 0x136   :  { %v631_v5 = vpack.c.bf16 %v590_v3, %v589_v2 }
 0x137   :  { %v453_v6 = vpop.f32.mrb[40].mxu0 }
 0x138   :  { %v454_v7 = vadd.f32 %v4112_v30, %v453_v6  ;;  %v3299_v8 = vpop.f32.mrb[41].mxu0  ;;  %3129 = vmatprep.subr.bf16.mxu0 %v631_v5  ;;  %v3012_v6 = vcombine.low %v4151_v47, %v4151_v47 }
 0x139   :  { %v456_v9 = vpop.f32.mrb[42].mxu0  ;;  %3130 = vmatpush3.bf16.msra.mxu0 %v4121_v49 }
 0x13a   :  { %v457_v10 = vadd.f32 %v4112_v30, %v456_v9  ;;  %v3300_v11 = vpop.f32.mrb[43].mxu0  ;;  %v591_v12 = vmax.f32 %v454_v7, 0.0 }
 0x13c   :  { %v592_v39 = vmax.f32 %v457_v10, 0.0 }
 0x13e   :  { %v632_v14 = vpack.c.bf16 %v592_v39, %v591_v12 }
 0x13f   :  { %v461_v15 = vpop.f32.mrb[44].mxu0 }
 0x140   :  { %v462_v16 = vadd.f32 %v4112_v30, %v461_v15  ;;  %v3303_v17 = vpop.f32.mrb[45].mxu0  ;;  %3131 = vmatprep.subr.bf16.mxu0 %v632_v14 }
 0x141   :  { %v464_v18 = vpop.f32.mrb[46].mxu0  ;;  %3132 = vmatpush3.bf16.msra.mxu0 %v4125_v58 }
 0x142   :  { %v465_v19 = vadd.f32 %v4112_v30, %v464_v18  ;;  %v3304_v20 = vpop.f32.mrb[47].mxu0  ;;  %v593_v21 = vmax.f32 %v462_v16, 0.0 }
 0x144   :  { %v594_v23 = vmax.f32 %v465_v19, 0.0 }
 0x146   :  { %v633_v49 = vpack.c.bf16 %v594_v23, %v593_v21 }
 0x147   :  { %v469_v24 = vpop.f32.mrb[48].mxu0 }
 0x148   :  { %v470_v25 = vadd.f32 %v4112_v30, %v469_v24  ;;  %v3307_v26 = vpop.f32.mrb[49].mxu0  ;;  %3133 = vmatprep.subr.bf16.mxu0 %v633_v49 }
 0x149   :  { %v472_v27 = vpop.f32.mrb[50].mxu0  ;;  %3134 = vmatpush3.bf16.msra.mxu0 %v4129_v4 }
 0x14a   :  { %v473_v28 = vadd.f32 %v4112_v30, %v472_v27  ;;  %v3308_v29 = vpop.f32.mrb[51].mxu0  ;;  %v595_v31 = vmax.f32 %v470_v25, 0.0 }
 0x14c   :  { %v596_v33 = vmax.f32 %v473_v28, 0.0 }
 0x14e   :  { %v634_v58 = vpack.c.bf16 %v596_v33, %v595_v31 }
 0x14f   :  { %v477_v34 = vpop.f32.mrb[52].mxu0 }
 0x150   :  { %v478_v35 = vadd.f32 %v4112_v30, %v477_v34  ;;  %v3311_v36 = vpop.f32.mrb[53].mxu0  ;;  %3135 = vmatprep.subr.bf16.mxu0 %v634_v58 }
 0x151   :  { %v480_v37 = vpop.f32.mrb[54].mxu0  ;;  %3136 = vmatpush3.bf16.msra.mxu0 %v4133_v13 }
 0x152   :  { %v481_v38 = vadd.f32 %v4112_v30, %v480_v37  ;;  %v3312_v40 = vpop.f32.mrb[55].mxu0  ;;  %v597_v42 = vmax.f32 %v478_v35, 0.0 }
 0x154   :  { %v598_v44 = vmax.f32 %v481_v38, 0.0 }
 0x156   :  { %v635_v4 = vpack.c.bf16 %v598_v44, %v597_v42 }
 0x157   :  { %v485_v45 = vpop.f32.mrb[56].mxu0 }
 0x158   :  { %v486_v46 = vadd.f32 %v4112_v30, %v485_v45  ;;  %v3315_v48 = vpop.f32.mrb[57].mxu0  ;;  %3137 = vmatprep.subr.bf16.mxu0 %v635_v4 }
 0x159   :  { %v488_v50 = vpop.f32.mrb[58].mxu0  ;;  %3138 = vmatpush3.bf16.msra.mxu0 %v4137_v22 }
 0x15a   :  { %v489_v51 = vadd.f32 %v4112_v30, %v488_v50  ;;  %v3316_v52 = vpop.f32.mrb[59].mxu0  ;;  %v599_v53 = vmax.f32 %v486_v46, 0.0 }
 0x15c   :  { %v600_v54 = vmax.f32 %v489_v51, 0.0 }
 0x15e   :  { %v636_v13 = vpack.c.bf16 %v600_v54, %v599_v53 }
 0x15f   :  { %v493_v55 = vpop.f32.mrb[60].mxu0 }
 0x160   :  { %v494_v57 = vadd.f32 %v4112_v30, %v493_v55  ;;  %v3319_v59 = vpop.f32.mrb[61].mxu0  ;;  %3139 = vmatprep.subr.bf16.mxu0 %v636_v13 }
 0x161   :  { %v496_v60 = vpop.f32.mrb[62].mxu0  ;;  %3140 = vmatpush3.bf16.msra.mxu0 %v4141_v32 }
 0x162   :  { %v497_v61 = vadd.f32 %v4112_v30, %v496_v60  ;;  %v3320_v62 = vpop.f32.mrb[63].mxu0  ;;  %v601_v63 = vmax.f32 %v494_v57, 0.0 }
 0x164   :  { %v602_v1 = vmax.f32 %v497_v61, 0.0 }
 0x166   :  { %v637_v22 = vpack.c.bf16 %v602_v1, %v601_v63 }
 0x167   :  { %v501_v2 = vpop.f32.mrb[64].mxu0 }
 0x168   :  { %3141 = vmatprep.subr.bf16.mxu0 %v637_v22  ;;  %v502_v3 = vadd.f32 %v4112_v30, %v501_v2  ;;  %v3323_v5 = vpop.f32.mrb[65].mxu0 }
 0x169   :  { %3142 = vmatpush3.bf16.msra.mxu0 %v4145_v43  ;;  %v504_v7 = vpop.f32.mrb[66].mxu0 }
 0x16a   :  { %v505_v8 = vadd.f32 %v4112_v30, %v504_v7  ;;  %v3324_v32 = vpop.f32.mrb[67].mxu0  ;;  %3485 = vmatprep.subr.bf16.mxu0 %v3841_v0  ;;  %v603_v9 = vmax.f32 %v502_v3, 0.0 }
 0x16c   :  { %v604_v10 = vmax.f32 %v505_v8, 0.0  ;;  %701 = vmatmul.mubr.bf16.vlgmr.msra.gmra.mrb[100].mxu0 %v3012_v6 }
 0x16d   :  { %3489 = vmatprep.mubr.msk.bf16.mxu0 %vm3842_vm0, %v3841_v0 }
 0x16e   :  { %v638_v11 = vpack.c.bf16 %v604_v10, %v603_v9 }
 0x16f   :  { %v509_v12 = vpop.f32.mrb[68].mxu0 }
 0x170   :  { %v510_v39 = vadd.f32 %v4112_v30, %v509_v12  ;;  %v3327_v14 = vpop.f32.mrb[69].mxu0  ;;  %709 = vmatpush1.bf16.msra.mxu1 %v638_v11 }
 0x171   :  { %v512_v47 = vpop.f32.mrb[70].mxu0  ;;  %710 = vmatprep.subr.bf16.mxu1 %v3843_v41 }
 0x172   :  { %v513_v43 = vadd.f32 %v4112_v30, %v512_v47  ;;  %v3328_v15 = vpop.f32.mrb[71].mxu0  ;;  %v605_v16 = vmax.f32 %v510_v39, 0.0 }
 0x174   :  { %v606_v17 = vmax.f32 %v513_v43, 0.0 }
 0x176   :  { %v639_v18 = vpack.c.bf16 %v606_v17, %v605_v16 }
 0x177   :  { %v517_v19 = vpop.f32.mrb[72].mxu0 }
 0x178   :  { %v518_v20 = vadd.f32 %v4112_v30, %v517_v19  ;;  %v3331_v21 = vpop.f32.mrb[73].mxu0  ;;  %711 = vmatpush1.bf16.msra.mxu1 %v639_v18 }
 0x179   :  { %v520_v23 = vpop.f32.mrb[74].mxu0  ;;  %712 = vmatprep.subr.bf16.mxu1 %v3843_v41  ;;  %v3014_v21 = vcombine.low %v4159_v56, %v4159_v56  ;;  %v3675_v56 = vld [vmem:[%s4821_s4 + $0x18] sm:$0xff]  }
 0x17a   :  { %v521_v49 = vadd.f32 %v4112_v30, %v520_v23  ;;  %v3332_v24 = vpop.f32.mrb[75].mxu0  ;;  %v607_v25 = vmax.f32 %v518_v20, 0.0  ;;  %v3672_v23 = vld [vmem:[%s4821_s4] sm:$0xff]  }
 0x17c   :  { %v608_v26 = vmax.f32 %v521_v49, 0.0 }
 0x17e   :  { %v640_v27 = vpack.c.bf16 %v608_v26, %v607_v25 }
 0x17f   :  { %v525_v28 = vpop.f32.mrb[76].mxu0 }
 0x180   :  { %v526_v29 = vadd.f32 %v4112_v30, %v525_v28  ;;  %v3335_v31 = vpop.f32.mrb[77].mxu0  ;;  %713 = vmatpush1.bf16.msra.mxu1 %v640_v27 }
 0x181   :  { %v528_v33 = vpop.f32.mrb[78].mxu0  ;;  %714 = vmatprep.subr.bf16.mxu1 %v3843_v41 }
 0x182   :  { %v529_v58 = vadd.f32 %v4112_v30, %v528_v33  ;;  %v3336_v34 = vpop.f32.mrb[79].mxu0  ;;  %v609_v35 = vmax.f32 %v526_v29, 0.0 }
 0x184   :  { %v610_v36 = vmax.f32 %v529_v58, 0.0 }
 0x186   :  { %v641_v37 = vpack.c.bf16 %v610_v36, %v609_v35  ;;  %v3676_v35 = vld [vmem:[%s4822_s7] sm:$0xff]   ;;  %v3677_v36 = vld [vmem:[%s4822_s7 + $0x8] sm:$0xff]  }
 0x187   :  { %v533_v38 = vpop.f32.mrb[80].mxu0 }
 0x188   :  { %v534_v40 = vadd.f32 %v4112_v30, %v533_v38  ;;  %v3339_v42 = vpop.f32.mrb[81].mxu0  ;;  %715 = vmatpush1.bf16.msra.mxu1 %v641_v37  ;;  %v4248_v37 = vld [vmem:[%s4824_s9] sm:$0xff]   ;;  %v4255_v38 = vld [vmem:[%s4824_s9 + $0x8] sm:$0xff]  }
 0x189   :  { %v536_v44 = vpop.f32.mrb[82].mxu0  ;;  %716 = vmatprep.subr.bf16.mxu1 %v3843_v41  ;;  %3486 = vmatpush3.bf16.msra.mxu0 %v4248_v37 }
 0x18a   :  { %v537_v4 = vadd.f32 %v4112_v30, %v536_v44  ;;  %v3340_v45 = vpop.f32.mrb[83].mxu0  ;;  %v611_v46 = vmax.f32 %v534_v40, 0.0  ;;  %3487 = vmatprep.subr.bf16.mxu0 %v3841_v0  ;;  %v3017_v40 = vld [vmem:[%s4825_s5] ss:$0 sm:$0xff] }
 0x18c   :  { %v612_v48 = vmax.f32 %v537_v4, 0.0 }
 0x18d   :  { %3488 = vmatpush3.bf16.msra.mxu0 %v4255_v38 }
 0x18e   :  { %v642_v50 = vpack.c.bf16 %v612_v48, %v611_v46  ;;  %3501 = vmatprep.subr.bf16.mxu0 %v3841_v0 }
 0x18f   :  { %v541_v51 = vpop.f32.mrb[84].mxu0 }
 0x190   :  { %v542_v52 = vadd.f32 %v4112_v30, %v541_v51  ;;  %v3343_v53 = vpop.f32.mrb[85].mxu0  ;;  %717 = vmatpush1.bf16.msra.mxu1 %v642_v50  ;;  %v3678_v50 = vld [vmem:[%s4823_s6] sm:$0xff]  }
 0x191   :  { %v544_v54 = vpop.f32.mrb[86].mxu0  ;;  %718 = vmatprep.subr.bf16.mxu1 %v3843_v41  ;;  %v3680_v53 = vld [vmem:[%s4823_s6 + $0x10] sm:$0xff]  }
 0x192   :  { %v545_v13 = vadd.f32 %v4112_v30, %v544_v54  ;;  %v3344_v55 = vpop.f32.mrb[87].mxu0  ;;  %v613_v57 = vmax.f32 %v542_v52, 0.0  ;;  %v3679_v52 = vld [vmem:[%s4823_s6 + $0x8] sm:$0xff]   ;;  %v3681_v54 = vld [vmem:[%s4823_s6 + $0x18] sm:$0xff]  }
 0x194   :  { %v614_v59 = vmax.f32 %v545_v13, 0.0  ;;  %v1028_v13 = vld [vmem:[%s4826_s15] sm:$0xff] }
 0x195   :  { %v1035_v55 = vpack.c.bf16 %v1028_v13, %v1028_v13 }
 0x196   :  { %v643_v60 = vpack.c.bf16 %v614_v59, %v613_v57  ;;  %v3023_v57 = vld [vmem:[%s4827_s8] ss:$0 sm:$0xff]  ;;  %s3844_s8 = smov 64  }
 0x197   :  { %v549_v61 = vpop.f32.mrb[88].mxu0 }
 0x198   :  { %v550_v62 = vadd.f32 %v4112_v30, %v549_v61  ;;  %v3347_v63 = vpop.f32.mrb[89].mxu0  ;;  %719 = vmatpush1.bf16.msra.mxu1 %v643_v60 }
 0x199   :  { %v552_v1 = vpop.f32.mrb[90].mxu0  ;;  %720 = vmatprep.subr.bf16.mxu1 %v3843_v41 }
 0x19a   :  { %v553_v22 = vadd.f32 %v4112_v30, %v552_v1  ;;  %v3348_v2 = vpop.f32.mrb[91].mxu0  ;;  %v615_v3 = vmax.f32 %v550_v62, 0.0 }
 0x19c   :  { %v616_v5 = vmax.f32 %v553_v22, 0.0 }
 0x19e   :  { %v644_v6 = vpack.c.bf16 %v616_v5, %v615_v3 }
 0x19f   :  { %v557_v7 = vpop.f32.mrb[92].mxu0 }
 0x1a0   :  { %v558_v8 = vadd.f32 %v4112_v30, %v557_v7  ;;  %v3351_v32 = vpop.f32.mrb[93].mxu0  ;;  %721 = vmatpush1.bf16.msra.mxu1 %v644_v6 }
 0x1a1   :  { %v560_v9 = vpop.f32.mrb[94].mxu0  ;;  %722 = vmatprep.subr.bf16.mxu1 %v3843_v41 }
 0x1a2   :  { %v561_v10 = vadd.f32 %v4112_v30, %v560_v9  ;;  %v3352_v11 = vpop.f32.mrb[95].mxu0  ;;  %v617_v12 = vmax.f32 %v558_v8, 0.0 }
 0x1a4   :  { %v618_v39 = vmax.f32 %v561_v10, 0.0 }
 0x1a6   :  { %v645_v14 = vpack.c.bf16 %v618_v39, %v617_v12 }
 0x1a7   :  { %v565_v47 = vpop.f32.mrb[96].mxu0 }
 0x1a8   :  { %v566_v43 = vadd.f32 %v4112_v30, %v565_v47  ;;  %723 = vmatpush1.bf16.msra.mxu1 %v645_v14  ;;  %v3355_v15 = vpop.f32.mrb[97].mxu0  ;;  %v3673_v30 = vld [vmem:[%s4821_s4 + $0x8] sm:$0xff]  }
 0x1a9   :  { %724 = vmatprep.subr.bf16.mxu1 %v3843_v41  ;;  %v568_v16 = vpop.f32.mrb[98].mxu0  ;;  %v3674_v41 = vld [vmem:[%s4821_s4 + $0x10] sm:$0xff]   ;;  %v1031_v15 = vld [vmem:[%s4828_s16] sm:$0xff] }
 0x1aa   :  { %v619_v17 = vmax.f32 %v566_v43, 0.0  ;;  %v3356_v18 = vpop.f32.mrb[99].mxu0 }
 0x1ac   :  { %v646_v19 = vpack.c.bf16 %v619_v17, %v619_v17 }
 0x1ae   :  { %v666_v20 = vsel %vm664_vm4, %v646_v19, 0 }
 0x1af   :  { %725 = vmatpush1.bf16.msra.mxu1 %v666_v20 }
 0x1b0   :  { %3357 = vmatprep.subr.bf16.mxu1 %v3841_v0 }
 0x1b2   :  { %741 = vmatmul.mubr.bf16.vlgmr.msra.gmra.mrb[0].mxu1 %v3014_v21 }
 0x1b3   :  { %3358 = vmatpush3.bf16.msra.mxu1 %v3672_v23  ;;  %3365 = vmatprep.mubr.msk.bf16.mxu1 %vm3842_vm0, %v3841_v0 }
 0x1b4   :  { %3359 = vmatprep.subr.bf16.mxu1 %v3841_v0 }
 0x1b7   :  { %3360 = vmatpush3.bf16.msra.mxu1 %v3673_v30 }
 0x1b8   :  { %3361 = vmatprep.subr.bf16.mxu1 %v3841_v0 }
 0x1bb   :  { %3362 = vmatpush3.bf16.msra.mxu1 %v3674_v41 }
 0x1bc   :  { %3363 = vmatprep.subr.bf16.mxu1 %v3841_v0 }
 0x1bf   :  { %3364 = vmatpush3.bf16.msra.mxu1 %v3675_v56 }
 0x1c0   :  { %3369 = vmatprep.subr.bf16.mxu1 %v3841_v0 }
 0x23f   :  { %v3143_v49 = vpop.f32.mrb[100].mxu0 }
 0x240   :  { %v3144_v24 = vpop.f32.mrb[101].mxu0 }
 0x241   :  { %v3145_v25 = vadd.f32 %v3144_v24, %v3143_v49  ;;  %v3146_v26 = vpop.f32.mrb[102].mxu0  ;;  %v4323_v49 = vld [vmem:[%s4829_s11] sm:$0xff]   ;;  %v3035_v24 = vld [vmem:[%s4826_s15 + $0x8] sm:$0xff] }
 0x242   :  { %v3147_v27 = vpop.f32.mrb[103].mxu0  ;;  %v1121_v26 = vpack.c.bf16 %v3035_v24, %v3035_v24 }
 0x243   :  { %v4339_v27 = vld [vmem:[%s4830_s10] sm:$0xff]  }
 0x285   :  { %v742_v28 = vpop.f32.mrb[0].mxu1 }
 0x286   :  { %v743_v29 = vadd.f32 %v3145_v25, %v742_v28  ;;  %v744_v31 = vpop.f32.mrb[1].mxu1  ;;  %v4332_v25 = vld [vmem:[%s4829_s11 + $0x8] sm:$0xff]  }
 0x287   :  { %v745_v33 = vpop.f32.mrb[2].mxu1 }
 0x288   :  { %v748_v58 = vpack.c.bf16 %v743_v29, %v743_v29  ;;  %v746_v34 = vpop.f32.mrb[3].mxu1  ;;  %v4348_v29 = vld [vmem:[%s4830_s10 + $0x8] sm:$0xff]  }
 0x28a   :  { %3366 = vmatmul.mubr.msk.bf16.vlgmr.msra.gmra.mrb[4].mxu1 %vm788_vm5, %v748_v58 }
 0x28b   :  { %3373 = vmatprep.mubr.msk.bf16.mxu1 %vm3842_vm0, %v3841_v0  ;;  %3370 = vmatpush3.bf16.msra.mxu1 %v3676_v35 }
 0x28c   :  { %3371 = vmatprep.subr.bf16.mxu1 %v3841_v0 }
 0x28f   :  { %3372 = vmatpush3.bf16.msra.mxu1 %v3677_v36 }
 0x290   :  { %3377 = vmatprep.subr.bf16.mxu1 %v3676_v35 }
 0x35d   :  { %v826_v42 = vpop.f32.mrb[4].mxu1 }
 0x35e   :  { %v827_v44 = vadd.f32 %v3017_v40, %v826_v42  ;;  %v3367_v4 = vpop.f32.mrb[5].mxu1 }
 0x35f   :  { %v829_v45 = vpop.f32.mrb[6].mxu1 }
 0x360   :  { %v832_v46 = vmax.f32 %v827_v44, 0.0  ;;  %v3368_v48 = vpop.f32.mrb[7].mxu1  ;;  %v4373_v44 = vld [vmem:[%s4831_s12] ss:$0 sm:$0xff] }
 0x362   :  { %v838_v51 = vpack.c.bf16 %v832_v46, %v832_v46 }
 0x364   :  { %3374 = vmatmul.mubr.msk.bf16.vlgmr.msra.gmra.mrb[8].mxu1 %vm857_vm6, %v838_v51 }
 0x365   :  { %3378 = vmatpush3.bf16.msra.mxu1 %v3676_v35  ;;  %3381 = vmatprep.mubr.msk.bf16.mxu1 %vm857_vm6, %v3678_v50 }
 0x366   :  { %3379 = vmatprep.subr.bf16.mxu1 %v3677_v36 }
 0x369   :  { %3380 = vmatpush3.bf16.msra.mxu1 %v3677_v36 }
 0x36a   :  { %3389 = vmatprep.subr.bf16.mxu1 %v3841_v0 }
 0x36c   :  { %3382 = vmatmul.mubr.msk.bf16.vlgmr.msra.gmra.mrb[12].mxu1 %vm857_vm6, %v3679_v52 }
 0x36d   :  { %3385 = vmatprep.mubr.msk.bf16.mxu1 %vm857_vm6, %v3680_v53  ;;  %3390 = vmatpush3.bf16.msra.mxu1 %v4248_v37 }
 0x36e   :  { %3391 = vmatprep.subr.bf16.mxu1 %v3841_v0 }
 0x371   :  { %3392 = vmatpush3.bf16.msra.mxu1 %v4255_v38 }
 0x372   :  { %3397 = vmatprep.subr.bf16.mxu1 %v3841_v0 }
 0x374   :  { %3386 = vmatmul.mubr.msk.bf16.gmra.mrb[16].mxu1 %vm857_vm6, %v3681_v54 }
 0x375   :  { %3393 = vmatprep.mubr.msk.bf16.mxu1 %vm3842_vm0, %v3841_v0 }
 0x37c   :  { %3394 = vmatmul.mubr.msk.bf16.vlgmr.msra.gmra.mrb[8].mxu1 %vm857_vm6, %v1035_v55 }
 0x37d   :  { %3401 = vmatprep.mubr.msk.bf16.mxu1 %vm3842_vm0, %v3841_v0  ;;  %3398 = vmatpush3.bf16.msra.mxu1 %v4323_v49 }
 0x37e   :  { %3399 = vmatprep.subr.bf16.mxu1 %v3841_v0 }
 0x381   :  { %3400 = vmatpush3.bf16.msra.mxu1 %v4332_v25 }
 0x382   :  { %3405 = vmatprep.subr.bf16.mxu1 %v3841_v0 }
 0x384   :  { %3402 = vmatmul.mubr.msk.bf16.vlgmr.msra.gmra.mrb[20].mxu1 %vm857_vm6, %v1121_v26 }
 0x385   :  { %3406 = vmatpush3.bf16.msra.mxu1 %v4339_v27  ;;  %3409 = vmatprep.mubr.msk.bf16.mxu1 %vm3842_vm0, %v3841_v0 }
 0x386   :  { %3407 = vmatprep.subr.bf16.mxu1 %v3841_v0 }
 0x389   :  { %3408 = vmatpush3.bf16.msra.mxu1 %v4348_v29 }
 0x38a   :  { %3413 = vmatprep.subr.bf16.mxu1 %v3841_v0 }
 0x43f   :  { %v3383_v59 = vpop.f32.mrb[12].mxu1 }
 0x440   :  { %v4295_v60 = vadd.f32 %v3383_v59, %v3023_v57  ;;  %v976_v61 = vpop.f32.mrb[13].mxu1  ;;  %v3036_v59 = vld [vmem:[%s4828_s16 + $0x8] sm:$0xff] }
 0x441   :  { %v4297_v62 = vadd.f32 %v3023_v57, %v976_v61  ;;  %v3384_v63 = vpop.f32.mrb[14].mxu1 }
 0x442   :  { %v4299_v1 = vadd.f32 %v3384_v63, %v3023_v57  ;;  %v979_v22 = vpop.f32.mrb[15].mxu1 }
 0x443   :  { %v4301_v2 = vadd.f32 %v3023_v57, %v979_v22 }
 0x447   :  { %v3387_v3 = vpop.f32.mrb[16].mxu1 }
 0x448   :  { %v4303_v5 = vadd.f32 %v3387_v3, %v3023_v57  ;;  %v992_v6 = vpop.f32.mrb[17].mxu1 }
 0x449   :  { %v4305_v7 = vadd.f32 %v3023_v57, %v992_v6  ;;  %v3388_v8 = vpop.f32.mrb[18].mxu1 }
 0x44a   :  { %v4307_v32 = vadd.f32 %v3388_v8, %v3023_v57  ;;  %v995_v9 = vpop.f32.mrb[19].mxu1 }
 0x44b   :  { %v4309_v10 = vadd.f32 %v3023_v57, %v995_v9 }
 0x44f   :  { %v1085_v11 = vpop.f32.mrb[8].mxu1 }
 0x450   :  { %v3629_v12 = vadd.f32 %v3023_v57, %v1085_v11  ;;  %v3395_v39 = vpop.f32.mrb[9].mxu1 }
 0x451   :  { %v1088_v14 = vpop.f32.mrb[10].mxu1 }
 0x452   :  { %3690 = vtanh.f32 %v3629_v12  ;;  %v3396_v47 = vpop.f32.mrb[11].mxu1  ;;  %v3040_v16 = vmul.f32 -1.442695, %v3629_v12 }
 0x454   :  { %3692 = vpow2.f32 %v3040_v16 }
 0x457   :  { %v1171_v34 = vpop.f32.mrb[20].mxu1 }
 0x458   :  { %v3403_v35 = vpop.f32.mrb[21].mxu1 }
 0x459   :  { %v1174_v36 = vpop.f32.mrb[22].mxu1 }
 0x45a   :  { %v3404_v40 = vpop.f32.mrb[23].mxu1 }
 0x45c   :  { %v3691_v43 = vpop.eup %3690 }
 0x45d   :  { %1105 = vrot.lane.b32.xlu0 %v3691_v43, %s3844_s8 }
 0x45e   :  { %v3693_v17 = vpop.eup %3692 }
 0x45f   :  { %v1095_v18 = vadd.f32 1.0, %v3693_v17 }
 0x461   :  { %1100 = vrot.lane.b32.xlu0 %v1031_v15, %s3845_s22  ;;  %3694 = vrcp.f32 %v1095_v18 }
 0x46b   :  { %v3695_v19 = vpop.eup %3694 }
 0x4cf   :  { %v1106_v20 = vpop.permute.xlu0 %1105 }
 0x4d0   :  { %v1108_v21 = vmul.f32 %v3695_v19, %v1106_v20 }
 0x4d2   :  { %1110 = vrot.lane.b32.xlu1 %v1108_v21, %s3845_s22 }
 0x4d3   :  { %v1101_v23 = vpop.permute.xlu0 %1100 }
 0x4d4   :  { %v1103_v30 = vmul.f32 %v3695_v19, %v1101_v23 }
 0x544   :  { %v1111_v41 = vpop.permute.xlu1 %1110 }
 0x545   :  { %v4317_v56 = vadd.f32 %v1111_v41, %v1103_v30 }
 0x547   :  { %3696 = vtanh.f32 %v4317_v56 }
 0x551   :  { %v3697_v28 = vpop.eup %3696 }
 0x552   :  { %1116 = vrot.lane.b32.xlu1 %v3697_v28, %s3844_s8 }
 0x5c4   :  { %v1117_v31 = vpop.permute.xlu1 %1116 }
 0x5c5   :  { %v1119_v33 = vmul.f32 %v3695_v19, %v1117_v31 }
 0x5c7   :  { %v1120_v58 = vpack.c.bf16 %v1119_v33, %v1119_v33 }
 0x5c9   :  { %1178 = vrot.lane.b32.xlu0 %v1120_v58, %s3845_s22 }
 0x63b   :  { %v1179_v42 = vpop.permute.xlu0 %1178 }
 0x63c   :  { %3410 = vmatmul.mubr.msk.bf16.vlgmr.msra.gmra.mrb[24].mxu1 %vm857_vm6, %v1179_v42 }
 0x63d   :  { %3414 = vmatpush3.bf16.msra.mxu1 %v4248_v37  ;;  %3417 = vmatprep.mubr.msk.bf16.mxu1 %vm3842_vm0, %v3841_v0 }
 0x63e   :  { %3415 = vmatprep.subr.bf16.mxu1 %v3841_v0 }
 0x641   :  { %3416 = vmatpush3.bf16.msra.mxu1 %v4255_v38 }
 0x642   :  { %3421 = vmatprep.subr.bf16.mxu1 %v3841_v0 }
 0x644   :  { %3418 = vmatmul.mubr.msk.bf16.vlgmr.msra.gmra.mrb[28].mxu1 %vm857_vm6, %v1179_v42 }
 0x645   :  { %3422 = vmatpush3.bf16.msra.mxu1 %v4323_v49  ;;  %3425 = vmatprep.mubr.msk.bf16.mxu1 %vm3842_vm0, %v3841_v0 }
 0x646   :  { %3423 = vmatprep.subr.bf16.mxu1 %v3841_v0 }
 0x649   :  { %3424 = vmatpush3.bf16.msra.mxu1 %v4332_v25 }
 0x64a   :  { %3429 = vmatprep.subr.bf16.mxu1 %v3841_v0 }
 0x70f   :  { %v1229_v4 = vpop.f32.mrb[24].mxu1 }
 0x710   :  { %v1230_v45 = vadd.f32 %v1229_v4, %v1171_v34  ;;  %v3411_v46 = vpop.f32.mrb[25].mxu1 }
 0x711   :  { %v1232_v48 = vpop.f32.mrb[26].mxu1 }
 0x712   :  { %v1241_v50 = vadd.f32 %v4373_v44, %v1230_v45  ;;  %v3412_v51 = vpop.f32.mrb[27].mxu1 }
 0x714   :  { %3698 = vtanh.f32 %v1241_v50  ;;  %v3048_v63 = vmul.f32 -1.442695, %v1241_v50 }
 0x717   :  { %v1310_v52 = vpop.f32.mrb[28].mxu1 }
 0x718   :  { %v1316_v53 = vadd.f32 %v1310_v52, %v4297_v62  ;;  %v3419_v54 = vpop.f32.mrb[29].mxu1 }
 0x719   :  { %v1313_v13 = vpop.f32.mrb[30].mxu1 }
 0x71a   :  { %3700 = vtanh.f32 %v1316_v53  ;;  %v3420_v55 = vpop.f32.mrb[31].mxu1  ;;  %v3050_v22 = vmul.f32 -1.442695, %v1316_v53 }
 0x71b   :  { %3702 = vpow2.f32 %v3048_v63 }
 0x71c   :  { %3704 = vpow2.f32 %v3050_v22 }
 0x71e   :  { %v3699_v57 = vpop.eup %3698 }
 0x71f   :  { %1255 = vrot.lane.b32.xlu1 %v3699_v57, %s3844_s8 }
 0x723   :  { %1250 = vrot.lane.b32.xlu1 %v3036_v59, %s3845_s22 }
 0x724   :  { %v3701_v61 = vpop.eup %3700 }
 0x725   :  { %1326 = vrot.lane.b32.xlu0 %v3701_v61, %s3844_s8  ;;  %v3703_v62 = vpop.eup %3702 }
 0x726   :  { %v1245_v3 = vadd.f32 1.0, %v3703_v62  ;;  %v3705_v6 = vpop.eup %3704 }
 0x727   :  { %v1320_v8 = vadd.f32 1.0, %v3705_v6 }
 0x728   :  { %3706 = vrcp.f32 %v1245_v3 }
 0x729   :  { %3708 = vrcp.f32 %v1320_v8 }
 0x732   :  { %v3707_v9 = vpop.eup %3706 }
 0x733   :  { %v3709_v39 = vpop.eup %3708 }
 0x734   :  { %v1324_v18 = vmul.f32 %v3709_v39, %v4317_v56 }
 0x791   :  { %v1256_v11 = vpop.permute.xlu1 %1255 }
 0x792   :  { %v1258_v12 = vmul.f32 %v3707_v9, %v1256_v11 }
 0x794   :  { %1260 = vrot.lane.b32.xlu0 %v1258_v12, %s3845_s22 }
 0x795   :  { %v1251_v43 = vpop.permute.xlu1 %1250 }
 0x796   :  { %v1253_v15 = vmul.f32 %v3707_v9, %v1251_v43 }
 0x797   :  { %v1327_v14 = vpop.permute.xlu0 %1326 }
 0x798   :  { %v1329_v47 = vmul.f32 %v3709_v39, %v1327_v14 }
 0x79a   :  { %1331 = vrot.lane.b32.xlu1 %v1329_v47, %s3845_s22 }
 0x806   :  { %v1261_v16 = vpop.permute.xlu0 %1260 }
 0x807   :  { %v4385_v17 = vadd.f32 %v1261_v16, %v1253_v15 }
 0x809   :  { %3710 = vtanh.f32 %v4385_v17 }
 0x80c   :  { %v1332_v19 = vpop.permute.xlu1 %1331 }
 0x80d   :  { %v4389_v20 = vadd.f32 %v1332_v19, %v1324_v18 }
 0x80f   :  { %3712 = vtanh.f32 %v4389_v20 }
 0x813   :  { %v3711_v21 = vpop.eup %3710 }
 0x814   :  { %1266 = vrot.lane.b32.xlu0 %v3711_v21, %s3844_s8 }
 0x819   :  { %v3713_v23 = vpop.eup %3712 }
 0x81a   :  { %1337 = vrot.lane.b32.xlu1 %v3713_v23, %s3844_s8 }
 0x886   :  { %v1267_v30 = vpop.permute.xlu0 %1266 }
 0x887   :  { %v4394_v41 = vmul.f32 %v3707_v9, %v1267_v30 }
 0x889   :  { %v1342_v24 = vpack.c.bf16 %v4394_v41, %v4394_v41 }
 0x88b   :  { %1344 = vrot.lane.b32.xlu0 %v1342_v24, %s3845_s22 }
 0x88c   :  { %v1338_v56 = vpop.permute.xlu1 %1337 }
 0x88d   :  { %v1340_v26 = vmul.f32 %v3709_v39, %v1338_v56 }
 0x88f   :  { %v1341_v28 = vpack.c.bf16 %v1340_v26, %v1340_v26 }
 0x891   :  { %1390 = vrot.lane.b32.xlu1 %v1341_v28, %s3845_s22 }
 0x8fd   :  { %v1345_v31 = vpop.permute.xlu0 %1344 }
 0x8fe   :  { %3426 = vmatmul.mubr.msk.bf16.vlgmr.msra.gmra.mrb[32].mxu1 %vm857_vm6, %v1345_v31 }
 0x8ff   :  { %3430 = vmatpush3.bf16.msra.mxu1 %v4339_v27  ;;  %3433 = vmatprep.mubr.msk.bf16.mxu1 %vm3842_vm0, %v3841_v0 }
 0x900   :  { %3431 = vmatprep.subr.bf16.mxu1 %v3841_v0 }
 0x903   :  { %3432 = vmatpush3.bf16.msra.mxu1 %v4348_v29  ;;  %v1391_v33 = vpop.permute.xlu1 %1390 }
 0x904   :  { %3437 = vmatprep.subr.bf16.mxu1 %v3841_v0 }
 0x906   :  { %3434 = vmatmul.mubr.msk.bf16.vlgmr.msra.gmra.mrb[36].mxu1 %vm857_vm6, %v1391_v33 }
 0x907   :  { %3438 = vmatpush3.bf16.msra.mxu1 %v4248_v37  ;;  %3441 = vmatprep.mubr.msk.bf16.mxu1 %vm3842_vm0, %v3841_v0 }
 0x908   :  { %3439 = vmatprep.subr.bf16.mxu1 %v3841_v0 }
 0x90b   :  { %3440 = vmatpush3.bf16.msra.mxu1 %v4255_v38 }
 0x90c   :  { %3445 = vmatprep.subr.bf16.mxu1 %v3841_v0 }
 0x90e   :  { %3442 = vmatmul.mubr.msk.bf16.vlgmr.msra.gmra.mrb[40].mxu1 %vm857_vm6, %v1391_v33 }
 0x90f   :  { %3446 = vmatpush3.bf16.msra.mxu1 %v4323_v49  ;;  %3449 = vmatprep.mubr.msk.bf16.mxu1 %vm3842_vm0, %v3841_v0 }
 0x910   :  { %3447 = vmatprep.subr.bf16.mxu1 %v3841_v0 }
 0x913   :  { %3448 = vmatpush3.bf16.msra.mxu1 %v4332_v25 }
 0x914   :  { %3453 = vmatprep.subr.bf16.mxu1 %v3841_v0 }
 0x9d1   :  { %v1383_v58 = vpop.f32.mrb[32].mxu1 }
 0x9d2   :  { %v3427_v34 = vpop.f32.mrb[33].mxu1 }
 0x9d3   :  { %v1386_v35 = vpop.f32.mrb[34].mxu1 }
 0x9d4   :  { %v3428_v36 = vpop.f32.mrb[35].mxu1 }
 0x9d9   :  { %v1429_v40 = vpop.f32.mrb[36].mxu1 }
 0x9da   :  { %v1430_v42 = vadd.f32 %v1429_v40, %v1383_v58  ;;  %v3435_v4 = vpop.f32.mrb[37].mxu1 }
 0x9db   :  { %v1432_v45 = vpop.f32.mrb[38].mxu1 }
 0x9dc   :  { %v1435_v46 = vadd.f32 %v4373_v44, %v1430_v42  ;;  %v3436_v48 = vpop.f32.mrb[39].mxu1 }
 0x9de   :  { %3714 = vtanh.f32 %v1435_v46  ;;  %v3053_v57 = vmul.f32 -1.442695, %v1435_v46 }
 0x9e1   :  { %v1500_v50 = vpop.f32.mrb[40].mxu1 }
 0x9e2   :  { %v1506_v51 = vadd.f32 %v1500_v50, %v4301_v2  ;;  %v3443_v52 = vpop.f32.mrb[41].mxu1 }
 0x9e3   :  { %v1503_v53 = vpop.f32.mrb[42].mxu1 }
 0x9e4   :  { %3716 = vtanh.f32 %v1506_v51  ;;  %v3444_v54 = vpop.f32.mrb[43].mxu1  ;;  %v3055_v59 = vmul.f32 -1.442695, %v1506_v51 }
 0x9e5   :  { %3718 = vpow2.f32 %v3053_v57 }
 0x9e6   :  { %3720 = vpow2.f32 %v3055_v59 }
 0x9e8   :  { %v3715_v13 = vpop.eup %3714 }
 0x9e9   :  { %1445 = vrot.lane.b32.xlu0 %v3715_v13, %s3844_s8 }
 0x9ee   :  { %v3717_v55 = vpop.eup %3716 }
 0x9ef   :  { %1516 = vrot.lane.b32.xlu1 %v3717_v55, %s3844_s8  ;;  %v3719_v61 = vpop.eup %3718 }
 0x9f0   :  { %v1439_v63 = vadd.f32 1.0, %v3719_v61  ;;  %v3721_v22 = vpop.eup %3720 }
 0x9f1   :  { %v1510_v62 = vadd.f32 1.0, %v3721_v22 }
 0x9f2   :  { %3722 = vrcp.f32 %v1439_v63 }
 0x9f3   :  { %3724 = vrcp.f32 %v1510_v62 }
 0x9fc   :  { %v3723_v2 = vpop.eup %3722 }
 0x9fd   :  { %v3725_v8 = vpop.eup %3724  ;;  %v1443_v12 = vmul.f32 %v3723_v2, %v4385_v17 }
 0x9fe   :  { %v1514_v47 = vmul.f32 %v3725_v8, %v4389_v20 }
 0xa5b   :  { %v1446_v3 = vpop.permute.xlu0 %1445 }
 0xa5c   :  { %v1448_v6 = vmul.f32 %v3723_v2, %v1446_v3 }
 0xa5e   :  { %1450 = vrot.lane.b32.xlu0 %v1448_v6, %s3845_s22 }
 0xa61   :  { %v1517_v9 = vpop.permute.xlu1 %1516 }
 0xa62   :  { %v1519_v11 = vmul.f32 %v3725_v8, %v1517_v9 }
 0xa64   :  { %1521 = vrot.lane.b32.xlu1 %v1519_v11, %s3845_s22 }
 0xad0   :  { %v1451_v39 = vpop.permute.xlu0 %1450 }
 0xad1   :  { %v4428_v14 = vadd.f32 %v1451_v39, %v1443_v12 }
 0xad3   :  { %3726 = vtanh.f32 %v4428_v14 }
 0xad6   :  { %v1522_v43 = vpop.permute.xlu1 %1521 }
 0xad7   :  { %v4432_v15 = vadd.f32 %v1522_v43, %v1514_v47 }
 0xad9   :  { %3728 = vtanh.f32 %v4432_v15 }
 0xadd   :  { %v3727_v16 = vpop.eup %3726 }
 0xade   :  { %1456 = vrot.lane.b32.xlu0 %v3727_v16, %s3844_s8 }
 0xae3   :  { %v3729_v18 = vpop.eup %3728 }
 0xae4   :  { %1527 = vrot.lane.b32.xlu1 %v3729_v18, %s3844_s8 }
 0xb50   :  { %v1457_v19 = vpop.permute.xlu0 %1456 }
 0xb51   :  { %v4437_v17 = vmul.f32 %v3723_v2, %v1457_v19 }
 0xb53   :  { %v1532_v21 = vpack.c.bf16 %v4437_v17, %v4437_v17 }
 0xb55   :  { %1534 = vrot.lane.b32.xlu0 %v1532_v21, %s3845_s22 }
 0xb56   :  { %v1528_v20 = vpop.permute.xlu1 %1527 }
 0xb57   :  { %v1530_v23 = vmul.f32 %v3725_v8, %v1528_v20 }
 0xb59   :  { %v1531_v30 = vpack.c.bf16 %v1530_v23, %v1530_v23 }
 0xb5b   :  { %1580 = vrot.lane.b32.xlu1 %v1531_v30, %s3845_s22 }
 0xbc7   :  { %v1535_v24 = vpop.permute.xlu0 %1534 }
 0xbc8   :  { %3450 = vmatmul.mubr.msk.bf16.vlgmr.msra.gmra.mrb[44].mxu1 %vm857_vm6, %v1535_v24 }
 0xbc9   :  { %3454 = vmatpush3.bf16.msra.mxu1 %v4339_v27  ;;  %3457 = vmatprep.mubr.msk.bf16.mxu1 %vm3842_vm0, %v3841_v0 }
 0xbca   :  { %3455 = vmatprep.subr.bf16.mxu1 %v3841_v0 }
 0xbcd   :  { %3456 = vmatpush3.bf16.msra.mxu1 %v4348_v29  ;;  %v1581_v56 = vpop.permute.xlu1 %1580 }
 0xbce   :  { %3461 = vmatprep.subr.bf16.mxu1 %v3841_v0 }
 0xbd0   :  { %3458 = vmatmul.mubr.msk.bf16.vlgmr.msra.gmra.mrb[48].mxu1 %vm857_vm6, %v1581_v56 }
 0xbd1   :  { %3462 = vmatpush3.bf16.msra.mxu1 %v4248_v37  ;;  %3465 = vmatprep.mubr.msk.bf16.mxu1 %vm3842_vm0, %v3841_v0 }
 0xbd2   :  { %3463 = vmatprep.subr.bf16.mxu1 %v3841_v0 }
 0xbd5   :  { %3464 = vmatpush3.bf16.msra.mxu1 %v4255_v38 }
 0xbd6   :  { %3469 = vmatprep.subr.bf16.mxu1 %v3841_v0 }
 0xbd8   :  { %3466 = vmatmul.mubr.msk.bf16.vlgmr.msra.gmra.mrb[52].mxu1 %vm857_vm6, %v1581_v56 }
 0xbd9   :  { %3470 = vmatpush3.bf16.msra.mxu1 %v4323_v49  ;;  %3473 = vmatprep.mubr.msk.bf16.mxu1 %vm3842_vm0, %v3841_v0 }
 0xbda   :  { %3471 = vmatprep.subr.bf16.mxu1 %v3841_v0 }
 0xbdd   :  { %3472 = vmatpush3.bf16.msra.mxu1 %v4332_v25 }
 0xbde   :  { %3477 = vmatprep.subr.bf16.mxu1 %v3841_v0 }
 0xc9b   :  { %v1573_v26 = vpop.f32.mrb[44].mxu1 }
 0xc9c   :  { %v3451_v28 = vpop.f32.mrb[45].mxu1 }
 0xc9d   :  { %v1576_v31 = vpop.f32.mrb[46].mxu1 }
 0xc9e   :  { %v3452_v33 = vpop.f32.mrb[47].mxu1 }
 0xca3   :  { %v1619_v58 = vpop.f32.mrb[48].mxu1 }
 0xca4   :  { %v1620_v34 = vadd.f32 %v1619_v58, %v1573_v26  ;;  %v3459_v35 = vpop.f32.mrb[49].mxu1 }
 0xca5   :  { %v1622_v36 = vpop.f32.mrb[50].mxu1 }
 0xca6   :  { %v1625_v40 = vadd.f32 %v4373_v44, %v1620_v34  ;;  %v3460_v42 = vpop.f32.mrb[51].mxu1 }
 0xca8   :  { %3730 = vtanh.f32 %v1625_v40  ;;  %v3058_v53 = vmul.f32 -1.442695, %v1625_v40 }
 0xcab   :  { %v1690_v4 = vpop.f32.mrb[52].mxu1 }
 0xcac   :  { %v1696_v45 = vadd.f32 %v1690_v4, %v4295_v60  ;;  %v3467_v46 = vpop.f32.mrb[53].mxu1 }
 0xcad   :  { %v1693_v48 = vpop.f32.mrb[54].mxu1 }
 0xcae   :  { %3732 = vtanh.f32 %v1696_v45  ;;  %v3468_v50 = vpop.f32.mrb[55].mxu1  ;;  %v3060_v54 = vmul.f32 -1.442695, %v1696_v45 }
 0xcaf   :  { %3734 = vpow2.f32 %v3058_v53 }
 0xcb0   :  { %3736 = vpow2.f32 %v3060_v54 }
 0xcb2   :  { %v3731_v51 = vpop.eup %3730 }
 0xcb3   :  { %1635 = vrot.lane.b32.xlu0 %v3731_v51, %s3844_s8 }
 0xcb8   :  { %v3733_v52 = vpop.eup %3732 }
 0xcb9   :  { %1706 = vrot.lane.b32.xlu1 %v3733_v52, %s3844_s8  ;;  %v3735_v13 = vpop.eup %3734 }
 0xcba   :  { %v1629_v55 = vadd.f32 1.0, %v3735_v13  ;;  %v3737_v57 = vpop.eup %3736 }
 0xcbb   :  { %v1700_v59 = vadd.f32 1.0, %v3737_v57 }
 0xcbc   :  { %3738 = vrcp.f32 %v1629_v55 }
 0xcbd   :  { %3740 = vrcp.f32 %v1700_v59 }
 0xcc6   :  { %v3739_v60 = vpop.eup %3738 }
 0xcc7   :  { %v3741_v22 = vpop.eup %3740  ;;  %v1633_v3 = vmul.f32 %v3739_v60, %v4428_v14 }
 0xcc8   :  { %v1704_v9 = vmul.f32 %v3741_v22, %v4432_v15 }
 0xd25   :  { %v1636_v61 = vpop.permute.xlu0 %1635 }
 0xd26   :  { %v1638_v63 = vmul.f32 %v3739_v60, %v1636_v61 }
 0xd28   :  { %1640 = vrot.lane.b32.xlu0 %v1638_v63, %s3845_s22 }
 0xd2b   :  { %v1707_v62 = vpop.permute.xlu1 %1706 }
 0xd2c   :  { %v1709_v2 = vmul.f32 %v3741_v22, %v1707_v62 }
 0xd2e   :  { %1711 = vrot.lane.b32.xlu1 %v1709_v2, %s3845_s22 }
 0xd9a   :  { %v1641_v6 = vpop.permute.xlu0 %1640 }
 0xd9b   :  { %v4471_v8 = vadd.f32 %v1641_v6, %v1633_v3 }
 0xd9d   :  { %3742 = vtanh.f32 %v4471_v8 }
 0xda0   :  { %v1712_v11 = vpop.permute.xlu1 %1711 }
 0xda1   :  { %v4475_v12 = vadd.f32 %v1712_v11, %v1704_v9 }
 0xda3   :  { %3744 = vtanh.f32 %v4475_v12 }
 0xda7   :  { %v3743_v39 = vpop.eup %3742 }
 0xda8   :  { %1646 = vrot.lane.b32.xlu0 %v3743_v39, %s3844_s8 }
 0xdad   :  { %v3745_v47 = vpop.eup %3744 }
 0xdae   :  { %1717 = vrot.lane.b32.xlu1 %v3745_v47, %s3844_s8 }
 0xe1a   :  { %v1647_v43 = vpop.permute.xlu0 %1646 }
 0xe1b   :  { %v4480_v14 = vmul.f32 %v3739_v60, %v1647_v43 }
 0xe1d   :  { %v1722_v16 = vpack.c.bf16 %v4480_v14, %v4480_v14 }
 0xe1f   :  { %1724 = vrot.lane.b32.xlu0 %v1722_v16, %s3845_s22 }
 0xe20   :  { %v1718_v15 = vpop.permute.xlu1 %1717 }
 0xe21   :  { %v1720_v18 = vmul.f32 %v3741_v22, %v1718_v15 }
 0xe23   :  { %v1721_v19 = vpack.c.bf16 %v1720_v18, %v1720_v18 }
 0xe25   :  { %1770 = vrot.lane.b32.xlu1 %v1721_v19, %s3845_s22 }
 0xe91   :  { %v1725_v21 = vpop.permute.xlu0 %1724 }
 0xe92   :  { %3474 = vmatmul.mubr.msk.bf16.vlgmr.msra.gmra.mrb[56].mxu1 %vm857_vm6, %v1725_v21 }
 0xe93   :  { %3478 = vmatpush3.bf16.msra.mxu1 %v4339_v27  ;;  %3481 = vmatprep.mubr.msk.bf16.mxu1 %vm3842_vm0, %v3841_v0 }
 0xe94   :  { %3479 = vmatprep.subr.bf16.mxu1 %v3841_v0 }
 0xe97   :  { %3480 = vmatpush3.bf16.msra.mxu1 %v4348_v29  ;;  %v1771_v20 = vpop.permute.xlu1 %1770 }
 0xe98   :  { %3490 = vmatmul.mubr.msk.bf16.vlgmr.msra.gmra.mrb[104].mxu0 %vm857_vm6, %v1771_v20  ;;  %3493 = vmatprep.subr.bf16.mxu1 %v3841_v0 }
 0xe99   :  { %3502 = vmatpush3.bf16.msra.mxu0 %v4339_v27  ;;  %3505 = vmatprep.mubr.msk.bf16.mxu0 %vm3842_vm0, %v3841_v0 }
 0xe9a   :  { %3482 = vmatmul.mubr.msk.bf16.vlgmr.msra.gmra.mrb[60].mxu1 %vm857_vm6, %v1771_v20  ;;  %3503 = vmatprep.subr.bf16.mxu0 %v3841_v0 }
 0xe9b   :  { %3494 = vmatpush3.bf16.msra.mxu1 %v4323_v49  ;;  %3497 = vmatprep.mubr.msk.bf16.mxu1 %vm3842_vm0, %v3841_v0 }
 0xe9c   :  { %3495 = vmatprep.subr.bf16.mxu1 %v3841_v0 }
 0xe9d   :  { %3504 = vmatpush3.bf16.msra.mxu0 %v4348_v29 }
 0xe9e   :  { %3517 = vmatprep.subr.bf16.mxu0 %v3841_v0 }
 0xe9f   :  { %3496 = vmatpush3.bf16.msra.mxu1 %v4332_v25 }
 0xea0   :  { %3509 = vmatprep.subr.bf16.mxu1 %v3841_v0 }
 0xf65   :  { %v1763_v23 = vpop.f32.mrb[56].mxu1 }
 0xf66   :  { %v3475_v30 = vpop.f32.mrb[57].mxu1 }
 0xf67   :  { %v1766_v24 = vpop.f32.mrb[58].mxu1 }
 0xf68   :  { %v3476_v56 = vpop.f32.mrb[59].mxu1 }
 0xf6b   :  { %v1880_v26 = vpop.f32.mrb[104].mxu0 }
 0xf6c   :  { %v1886_v28 = vadd.f32 %v1880_v26, %v4299_v1  ;;  %v3491_v31 = vpop.f32.mrb[105].mxu0 }
 0xf6d   :  { %v1809_v33 = vpop.f32.mrb[60].mxu1  ;;  %v1883_v58 = vpop.f32.mrb[106].mxu0 }
 0xf6e   :  { %3746 = vtanh.f32 %v1886_v28  ;;  %v1810_v34 = vadd.f32 %v1809_v33, %v1763_v23  ;;  %v3483_v35 = vpop.f32.mrb[61].mxu1  ;;  %v3492_v36 = vpop.f32.mrb[107].mxu0  ;;  %v3065_v48 = vmul.f32 -1.442695, %v1886_v28 }
 0xf6f   :  { %v1812_v40 = vpop.f32.mrb[62].mxu1 }
 0xf70   :  { %v1815_v42 = vadd.f32 %v4373_v44, %v1810_v34  ;;  %v3484_v4 = vpop.f32.mrb[63].mxu1 }
 0xf72   :  { %3748 = vtanh.f32 %v1815_v42  ;;  %v3063_v1 = vmul.f32 -1.442695, %v1815_v42 }
 0xf73   :  { %3750 = vpow2.f32 %v3065_v48 }
 0xf74   :  { %3752 = vpow2.f32 %v3063_v1 }
 0xf78   :  { %v3747_v45 = vpop.eup %3746 }
 0xf79   :  { %1896 = vrot.lane.b32.xlu1 %v3747_v45, %s3844_s8 }
 0xf7c   :  { %v3749_v46 = vpop.eup %3748 }
 0xf7d   :  { %1825 = vrot.lane.b32.xlu0 %v3749_v46, %s3844_s8  ;;  %v3751_v50 = vpop.eup %3750 }
 0xf7e   :  { %v1890_v51 = vadd.f32 1.0, %v3751_v50  ;;  %v3753_v52 = vpop.eup %3752 }
 0xf7f   :  { %v1819_v53 = vadd.f32 1.0, %v3753_v52 }
 0xf80   :  { %3754 = vrcp.f32 %v1890_v51 }
 0xf81   :  { %3756 = vrcp.f32 %v1819_v53 }
 0xf8a   :  { %v3755_v54 = vpop.eup %3754 }
 0xf8b   :  { %v3757_v57 = vpop.eup %3756  ;;  %v1894_v61 = vmul.f32 %v3755_v54, %v4475_v12 }
 0xf8c   :  { %v1823_v62 = vmul.f32 %v3757_v57, %v4471_v8 }
 0xfeb   :  { %v1897_v13 = vpop.permute.xlu1 %1896 }
 0xfec   :  { %v1899_v55 = vmul.f32 %v3755_v54, %v1897_v13 }
 0xfee   :  { %1901 = vrot.lane.b32.xlu1 %v1899_v55, %s3845_s22 }
 0xfef   :  { %v1826_v59 = vpop.permute.xlu0 %1825 }
 0xff0   :  { %v1828_v60 = vmul.f32 %v3757_v57, %v1826_v59 }
 0xff2   :  { %1830 = vrot.lane.b32.xlu0 %v1828_v60, %s3845_s22 }
0x1060   :  { %v1902_v63 = vpop.permute.xlu1 %1901 }
0x1061   :  { %v4514_v22 = vadd.f32 %v1902_v63, %v1894_v61 }
0x1063   :  { %3758 = vtanh.f32 %v4514_v22 }
0x1064   :  { %v1831_v2 = vpop.permute.xlu0 %1830 }
0x1065   :  { %v4518_v3 = vadd.f32 %v1831_v2, %v1823_v62 }
0x1067   :  { %3760 = vtanh.f32 %v4518_v3 }
0x106d   :  { %v3759_v6 = vpop.eup %3758 }
0x106e   :  { %1907 = vrot.lane.b32.xlu1 %v3759_v6, %s3844_s8 }
0x1071   :  { %v3761_v9 = vpop.eup %3760 }
0x1072   :  { %1836 = vrot.lane.b32.xlu0 %v3761_v9, %s3844_s8 }
0x10e0   :  { %v1908_v11 = vpop.permute.xlu1 %1907 }
0x10e1   :  { %v1910_v12 = vmul.f32 %v3755_v54, %v1908_v11 }
0x10e3   :  { %v1911_v39 = vpack.c.bf16 %v1910_v12, %v1910_v12  ;;  %v4576_v12 = vld [vmem:[%s4824_s9] sm:$0xff]  }
0x10e4   :  { %v1837_v47 = vpop.permute.xlu0 %1836 }
0x10e5   :  { %v4523_v43 = vmul.f32 %v3757_v57, %v1837_v47  ;;  %1960 = vrot.lane.b32.xlu1 %v1911_v39, %s3845_s22 }
0x10e7   :  { %v1912_v8 = vpack.c.bf16 %v4523_v43, %v4523_v43 }
0x10e9   :  { %1914 = vrot.lane.b32.xlu0 %v1912_v8, %s3845_s22 }
0x1157   :  { %v1961_v16 = vpop.permute.xlu1 %1960 }
0x1158   :  { %3506 = vmatmul.mubr.msk.bf16.vlgmr.msra.gmra.mrb[108].mxu0 %vm857_vm6, %v1961_v16 }
0x1159   :  { %3518 = vmatpush3.bf16.msra.mxu0 %v4323_v49  ;;  %3521 = vmatprep.mubr.msk.bf16.mxu0 %vm3842_vm0, %v3841_v0 }
0x115a   :  { %3519 = vmatprep.subr.bf16.mxu0 %v3841_v0 }
0x115b   :  { %v1915_v15 = vpop.permute.xlu0 %1914 }
0x115c   :  { %3498 = vmatmul.mubr.msk.bf16.vlgmr.msra.gmra.mrb[64].mxu1 %vm857_vm6, %v1915_v15 }
0x115d   :  { %3510 = vmatpush3.bf16.msra.mxu1 %v4248_v37  ;;  %3513 = vmatprep.mubr.msk.bf16.mxu1 %vm3842_vm0, %v3841_v0 }
0x115e   :  { %3511 = vmatprep.subr.bf16.mxu1 %v3841_v0  ;;  %3520 = vmatpush3.bf16.msra.mxu0 %v4332_v25 }
0x115f   :  { %3533 = vmatprep.subr.bf16.mxu0 %v3841_v0 }
0x1161   :  { %3512 = vmatpush3.bf16.msra.mxu1 %v4255_v38 }
0x1162   :  { %3525 = vmatprep.subr.bf16.mxu1 %v3841_v0 }
0x1164   :  { %3514 = vmatmul.mubr.msk.bf16.vlgmr.msra.gmra.mrb[68].mxu1 %vm857_vm6, %v1961_v16 }
0x1165   :  { %3526 = vmatpush3.bf16.msra.mxu1 %v4339_v27  ;;  %3529 = vmatprep.mubr.msk.bf16.mxu1 %vm3842_vm0, %v3841_v0 }
0x1166   :  { %3527 = vmatprep.subr.bf16.mxu1 %v3841_v0 }
0x1169   :  { %3528 = vmatpush3.bf16.msra.mxu1 %v4348_v29 }
0x116a   :  { %3541 = vmatprep.subr.bf16.mxu1 %v3841_v0 }
0x122b   :  { %v1999_v37 = vpop.f32.mrb[108].mxu0 }
0x122c   :  { %v3507_v18 = vpop.f32.mrb[109].mxu0 }
0x122d   :  { %v2002_v19 = vpop.f32.mrb[110].mxu0 }
0x122e   :  { %v3508_v21 = vpop.f32.mrb[111].mxu0 }
0x122f   :  { %v1953_v20 = vpop.f32.mrb[64].mxu1 }
0x1230   :  { %v2000_v23 = vadd.f32 %v1999_v37, %v1953_v20  ;;  %v3499_v30 = vpop.f32.mrb[65].mxu1 }
0x1231   :  { %v1956_v24 = vpop.f32.mrb[66].mxu1 }
0x1232   :  { %v2005_v56 = vadd.f32 %v4373_v44, %v2000_v23  ;;  %v3500_v26 = vpop.f32.mrb[67].mxu1 }
0x1234   :  { %3762 = vtanh.f32 %v2005_v56  ;;  %v3068_v40 = vmul.f32 -1.442695, %v2005_v56 }
0x1237   :  { %v2070_v28 = vpop.f32.mrb[68].mxu1 }
0x1238   :  { %v2076_v31 = vadd.f32 %v2070_v28, %v4305_v7  ;;  %v3515_v33 = vpop.f32.mrb[69].mxu1 }
0x1239   :  { %v2073_v58 = vpop.f32.mrb[70].mxu1 }
0x123a   :  { %3764 = vtanh.f32 %v2076_v31  ;;  %v3516_v34 = vpop.f32.mrb[71].mxu1  ;;  %v3070_v42 = vmul.f32 -1.442695, %v2076_v31 }
0x123b   :  { %3766 = vpow2.f32 %v3068_v40 }
0x123c   :  { %3768 = vpow2.f32 %v3070_v42 }
0x123e   :  { %v3763_v35 = vpop.eup %3762 }
0x123f   :  { %2015 = vrot.lane.b32.xlu0 %v3763_v35, %s3844_s8 }
0x1244   :  { %v3765_v36 = vpop.eup %3764 }
0x1245   :  { %2086 = vrot.lane.b32.xlu1 %v3765_v36, %s3844_s8  ;;  %v3767_v4 = vpop.eup %3766 }
0x1246   :  { %v2009_v45 = vadd.f32 1.0, %v3767_v4  ;;  %v3769_v46 = vpop.eup %3768 }
0x1247   :  { %v2080_v48 = vadd.f32 1.0, %v3769_v46 }
0x1248   :  { %3770 = vrcp.f32 %v2009_v45 }
0x1249   :  { %3772 = vrcp.f32 %v2080_v48 }
0x1252   :  { %v3771_v7 = vpop.eup %3770 }
0x1253   :  { %v3773_v51 = vpop.eup %3772  ;;  %v2013_v54 = vmul.f32 %v3771_v7, %v4518_v3 }
0x1254   :  { %v2084_v57 = vmul.f32 %v3773_v51, %v4514_v22 }
0x12b1   :  { %v2016_v1 = vpop.permute.xlu0 %2015 }
0x12b2   :  { %v2018_v50 = vmul.f32 %v3771_v7, %v2016_v1 }
0x12b4   :  { %2020 = vrot.lane.b32.xlu0 %v2018_v50, %s3845_s22 }
0x12b7   :  { %v2087_v52 = vpop.permute.xlu1 %2086 }
0x12b8   :  { %v2089_v53 = vmul.f32 %v3773_v51, %v2087_v52 }
0x12ba   :  { %2091 = vrot.lane.b32.xlu1 %v2089_v53, %s3845_s22 }
0x1326   :  { %v2021_v13 = vpop.permute.xlu0 %2020 }
0x1327   :  { %v4557_v55 = vadd.f32 %v2021_v13, %v2013_v54 }
0x1329   :  { %3774 = vtanh.f32 %v4557_v55 }
0x132c   :  { %v2092_v59 = vpop.permute.xlu1 %2091 }
0x132d   :  { %v4561_v60 = vadd.f32 %v2092_v59, %v2084_v57 }
0x132f   :  { %3776 = vtanh.f32 %v4561_v60 }
0x1333   :  { %v3775_v61 = vpop.eup %3774 }
0x1334   :  { %2026 = vrot.lane.b32.xlu0 %v3775_v61, %s3844_s8 }
0x1339   :  { %v3777_v63 = vpop.eup %3776 }
0x133a   :  { %2097 = vrot.lane.b32.xlu1 %v3777_v63, %s3844_s8 }
0x13a6   :  { %v2027_v62 = vpop.permute.xlu0 %2026 }
0x13a7   :  { %v4566_v2 = vmul.f32 %v3771_v7, %v2027_v62 }
0x13a9   :  { %v2102_v3 = vpack.c.bf16 %v4566_v2, %v4566_v2 }
0x13ab   :  { %2104 = vrot.lane.b32.xlu0 %v2102_v3, %s3845_s22 }
0x13ac   :  { %v2098_v22 = vpop.permute.xlu1 %2097 }
0x13ad   :  { %v2100_v6 = vmul.f32 %v3773_v51, %v2098_v22  ;;  %v4633_v22 = vld [vmem:[%s4824_s9 + $0x8] sm:$0xff]  }
0x13af   :  { %v2101_v9 = vpack.c.bf16 %v2100_v6, %v2100_v6 }
0x13b1   :  { %2150 = vrot.lane.b32.xlu1 %v2101_v9, %s3845_s22 }
0x141d   :  { %v2105_v11 = vpop.permute.xlu0 %2104 }
0x141e   :  { %3522 = vmatmul.mubr.msk.bf16.vlgmr.msra.gmra.mrb[112].mxu0 %vm857_vm6, %v2105_v11 }
0x141f   :  { %3534 = vmatpush3.bf16.msra.mxu0 %v4576_v12  ;;  %3537 = vmatprep.mubr.msk.bf16.mxu0 %vm3842_vm0, %v3841_v0 }
0x1420   :  { %3535 = vmatprep.subr.bf16.mxu0 %v3841_v0 }
0x1423   :  { %3536 = vmatpush3.bf16.msra.mxu0 %v4255_v38  ;;  %v2151_v39 = vpop.permute.xlu1 %2150 }
0x1424   :  { %3530 = vmatmul.mubr.msk.bf16.vlgmr.msra.gmra.mrb[72].mxu1 %vm857_vm6, %v2151_v39  ;;  %3549 = vmatprep.subr.bf16.mxu0 %v3841_v0 }
0x1425   :  { %3542 = vmatpush3.bf16.msra.mxu1 %v4323_v49  ;;  %3545 = vmatprep.mubr.msk.bf16.mxu1 %vm3842_vm0, %v3841_v0 }
0x1426   :  { %3538 = vmatmul.mubr.msk.bf16.vlgmr.msra.gmra.mrb[116].mxu0 %vm857_vm6, %v2151_v39  ;;  %3543 = vmatprep.subr.bf16.mxu1 %v3841_v0 }
0x1427   :  { %3550 = vmatpush3.bf16.msra.mxu0 %v4339_v27  ;;  %3553 = vmatprep.mubr.msk.bf16.mxu0 %vm3842_vm0, %v3841_v0 }
0x1428   :  { %3551 = vmatprep.subr.bf16.mxu0 %v3841_v0 }
0x1429   :  { %3544 = vmatpush3.bf16.msra.mxu1 %v4332_v25 }
0x142a   :  { %3557 = vmatprep.subr.bf16.mxu1 %v3841_v0 }
0x142b   :  { %3552 = vmatpush3.bf16.msra.mxu0 %v4348_v29 }
0x142c   :  { %3565 = vmatprep.subr.bf16.mxu0 %v3841_v0 }
0x14f1   :  { %v2143_v38 = vpop.f32.mrb[112].mxu0 }
0x14f2   :  { %v3523_v47 = vpop.f32.mrb[113].mxu0 }
0x14f3   :  { %v2146_v8 = vpop.f32.mrb[114].mxu0 }
0x14f4   :  { %v3524_v16 = vpop.f32.mrb[115].mxu0 }
0x14f7   :  { %v2189_v15 = vpop.f32.mrb[72].mxu1 }
0x14f8   :  { %v2190_v37 = vadd.f32 %v2189_v15, %v2143_v38  ;;  %v3531_v18 = vpop.f32.mrb[73].mxu1 }
0x14f9   :  { %v2192_v19 = vpop.f32.mrb[74].mxu1  ;;  %v2260_v21 = vpop.f32.mrb[116].mxu0 }
0x14fa   :  { %v2195_v20 = vadd.f32 %v4373_v44, %v2190_v37  ;;  %v2266_v23 = vadd.f32 %v2260_v21, %v4309_v10  ;;  %v3532_v30 = vpop.f32.mrb[75].mxu1  ;;  %v3539_v24 = vpop.f32.mrb[117].mxu0 }
0x14fb   :  { %v2263_v56 = vpop.f32.mrb[118].mxu0 }
0x14fc   :  { %3778 = vtanh.f32 %v2195_v20  ;;  %v3540_v26 = vpop.f32.mrb[119].mxu0  ;;  %v3073_v33 = vmul.f32 -1.442695, %v2195_v20  ;;  %v3075_v58 = vmul.f32 -1.442695, %v2266_v23 }
0x14fd   :  { %3780 = vtanh.f32 %v2266_v23 }
0x14fe   :  { %3782 = vpow2.f32 %v3073_v33 }
0x14ff   :  { %3784 = vpow2.f32 %v3075_v58 }
0x1506   :  { %v3779_v28 = vpop.eup %3778 }
0x1507   :  { %v3781_v31 = vpop.eup %3780  ;;  %2205 = vrot.lane.b32.xlu0 %v3779_v28, %s3844_s8 }
0x1508   :  { %2276 = vrot.lane.b32.xlu1 %v3781_v31, %s3844_s8  ;;  %v3783_v34 = vpop.eup %3782 }
0x1509   :  { %v3785_v35 = vpop.eup %3784  ;;  %v2199_v36 = vadd.f32 1.0, %v3783_v34 }
0x150a   :  { %v2270_v10 = vadd.f32 1.0, %v3785_v35 }
0x150b   :  { %3786 = vrcp.f32 %v2199_v36 }
0x150c   :  { %3788 = vrcp.f32 %v2270_v10 }
0x1515   :  { %v3787_v40 = vpop.eup %3786 }
0x1516   :  { %v3789_v4 = vpop.eup %3788  ;;  %v2203_v7 = vmul.f32 %v3787_v40, %v4557_v55 }
0x1517   :  { %v2274_v1 = vmul.f32 %v3789_v4, %v4561_v60 }
0x1579   :  { %v2206_v42 = vpop.permute.xlu0 %2205 }
0x157a   :  { %v2277_v45 = vpop.permute.xlu1 %2276  ;;  %v2208_v46 = vmul.f32 %v3787_v40, %v2206_v42 }
0x157b   :  { %v2279_v48 = vmul.f32 %v3789_v4, %v2277_v45 }
0x157c   :  { %2210 = vrot.lane.b32.xlu0 %v2208_v46, %s3845_s22 }
0x157d   :  { %2281 = vrot.lane.b32.xlu1 %v2279_v48, %s3845_s22 }
0x15ee   :  { %v2211_v50 = vpop.permute.xlu0 %2210 }
0x15ef   :  { %v2282_v51 = vpop.permute.xlu1 %2281  ;;  %v4606_v52 = vadd.f32 %v2211_v50, %v2203_v7 }
0x15f0   :  { %v4608_v53 = vadd.f32 %v2282_v51, %v2274_v1 }
0x15f1   :  { %3790 = vtanh.f32 %v4606_v52 }
0x15f2   :  { %3792 = vtanh.f32 %v4608_v53 }
0x15fb   :  { %v3791_v54 = vpop.eup %3790 }
0x15fc   :  { %v3793_v13 = vpop.eup %3792  ;;  %2216 = vrot.lane.b32.xlu0 %v3791_v54, %s3844_s8  ;;  %v3836_v54 = vld [vmem:[%s4829_s11] sm:$0xff]  }
0x15fd   :  { %2287 = vrot.lane.b32.xlu1 %v3793_v13, %s3844_s8  ;;  %v3838_v13 = vld [vmem:[%s4829_s11 + $0x8] sm:$0xff]  }
0x166e   :  { %v2217_v57 = vpop.permute.xlu0 %2216 }
0x166f   :  { %v2288_v55 = vpop.permute.xlu1 %2287  ;;  %v4614_v59 = vmul.f32 %v3787_v40, %v2217_v57  ;;  %v3839_v57 = vld [vmem:[%s4830_s10 + $0x8] sm:$0xff]  }
0x1670   :  { %v2290_v60 = vmul.f32 %v3789_v4, %v2288_v55 }
0x1671   :  { %v2292_v61 = vpack.c.bf16 %v4614_v59, %v4614_v59 }
0x1672   :  { %v2291_v63 = vpack.c.bf16 %v2290_v60, %v2290_v60 }
0x1673   :  { %2294 = vrot.lane.b32.xlu0 %v2292_v61, %s3845_s22 }
0x1674   :  { %2340 = vrot.lane.b32.xlu1 %v2291_v63, %s3845_s22 }
0x16e5   :  { %v2295_v62 = vpop.permute.xlu0 %2294 }
0x16e6   :  { %v2341_v3 = vpop.permute.xlu1 %2340  ;;  %3546 = vmatmul.mubr.msk.bf16.vlgmr.msra.gmra.mrb[76].mxu1 %vm857_vm6, %v2295_v62 }
0x16e7   :  { %3554 = vmatmul.mubr.msk.bf16.vlgmr.msra.gmra.mrb[120].mxu0 %vm857_vm6, %v2341_v3  ;;  %3558 = vmatpush3.bf16.msra.mxu1 %v4576_v12 }
0x16e8   :  { %3559 = vmatprep.subr.bf16.mxu1 %v3841_v0  ;;  %3561 = vmatprep.mubr.msk.bf16.mxu1 %vm3842_vm0, %v3841_v0 }
0x16e9   :  { %3566 = vmatpush3.bf16.msra.mxu0 %v4323_v49  ;;  %3569 = vmatprep.mubr.msk.bf16.mxu0 %vm3842_vm0, %v3841_v0 }
0x16ea   :  { %3567 = vmatprep.subr.bf16.mxu0 %v3841_v0 }
0x16eb   :  { %3560 = vmatpush3.bf16.msra.mxu1 %v4633_v22 }
0x16ec   :  { %3573 = vmatprep.subr.bf16.mxu1 %v3841_v0 }
0x16ed   :  { %3568 = vmatpush3.bf16.msra.mxu0 %v4332_v25 }
0x16ee   :  { %3562 = vmatmul.mubr.msk.bf16.vlgmr.msra.gmra.mrb[80].mxu1 %vm857_vm6, %v2341_v3  ;;  %3581 = vmatprep.subr.bf16.mxu0 %v3841_v0 }
0x16ef   :  { %3574 = vmatpush3.bf16.msra.mxu1 %v4339_v27  ;;  %3577 = vmatprep.mubr.msk.bf16.mxu1 %vm3842_vm0, %v3841_v0 }
0x16f0   :  { %3575 = vmatprep.subr.bf16.mxu1 %v3841_v0 }
0x16f3   :  { %3576 = vmatpush3.bf16.msra.mxu1 %v4348_v29 }
0x16f4   :  { %3589 = vmatprep.subr.bf16.mxu1 %v3841_v0 }
0x17b9   :  { %v2333_v49 = vpop.f32.mrb[76].mxu1 }
0x17ba   :  { %v2379_v6 = vpop.f32.mrb[120].mxu0  ;;  %v3547_v9 = vpop.f32.mrb[77].mxu1 }
0x17bb   :  { %v2380_v11 = vadd.f32 %v2379_v6, %v2333_v49  ;;  %v3555_v25 = vpop.f32.mrb[121].mxu0  ;;  %v2336_v39 = vpop.f32.mrb[78].mxu1  ;;  %v4699_v6 = vld [vmem:[%s4831_s12] ss:$0 sm:$0xff] }
0x17bc   :  { %v2382_v38 = vpop.f32.mrb[122].mxu0  ;;  %v3548_v47 = vpop.f32.mrb[79].mxu1 }
0x17bd   :  { %v2385_v8 = vadd.f32 %v4373_v44, %v2380_v11  ;;  %v3556_v27 = vpop.f32.mrb[123].mxu0 }
0x17bf   :  { %3794 = vtanh.f32 %v2385_v8  ;;  %v3078_v20 = vmul.f32 -1.442695, %v2385_v8 }
0x17c1   :  { %v2450_v16 = vpop.f32.mrb[80].mxu1 }
0x17c2   :  { %v2456_v15 = vadd.f32 %v2450_v16, %v4303_v5  ;;  %v3563_v37 = vpop.f32.mrb[81].mxu1 }
0x17c3   :  { %v2453_v18 = vpop.f32.mrb[82].mxu1 }
0x17c4   :  { %3796 = vtanh.f32 %v2456_v15  ;;  %v3564_v29 = vpop.f32.mrb[83].mxu1  ;;  %v3080_v23 = vmul.f32 -1.442695, %v2456_v15 }
0x17c5   :  { %3798 = vpow2.f32 %v3078_v20 }
0x17c6   :  { %3800 = vpow2.f32 %v3080_v23 }
0x17c9   :  { %v3795_v19 = vpop.eup %3794 }
0x17ca   :  { %2395 = vrot.lane.b32.xlu0 %v3795_v19, %s3844_s8 }
0x17ce   :  { %v3797_v21 = vpop.eup %3796 }
0x17cf   :  { %2466 = vrot.lane.b32.xlu1 %v3797_v21, %s3844_s8  ;;  %v3799_v44 = vpop.eup %3798 }
0x17d0   :  { %v2389_v30 = vadd.f32 1.0, %v3799_v44  ;;  %v3801_v24 = vpop.eup %3800 }
0x17d1   :  { %v2460_v56 = vadd.f32 1.0, %v3801_v24 }
0x17d2   :  { %3802 = vrcp.f32 %v2389_v30 }
0x17d3   :  { %3804 = vrcp.f32 %v2460_v56 }
0x17dc   :  { %v3803_v5 = vpop.eup %3802 }
0x17dd   :  { %v3805_v31 = vpop.eup %3804  ;;  %v2393_v34 = vmul.f32 %v3803_v5, %v4606_v52 }
0x17de   :  { %v2464_v10 = vmul.f32 %v3805_v31, %v4608_v53 }
0x183c   :  { %v2396_v26 = vpop.permute.xlu0 %2395 }
0x183d   :  { %v2398_v28 = vmul.f32 %v3803_v5, %v2396_v26 }
0x183f   :  { %2400 = vrot.lane.b32.xlu0 %v2398_v28, %s3845_s22 }
0x1841   :  { %v2467_v33 = vpop.permute.xlu1 %2466 }
0x1842   :  { %v2469_v58 = vmul.f32 %v3805_v31, %v2467_v33 }
0x1844   :  { %2471 = vrot.lane.b32.xlu1 %v2469_v58, %s3845_s22 }
0x18b1   :  { %v2401_v35 = vpop.permute.xlu0 %2400 }
0x18b2   :  { %v4653_v36 = vadd.f32 %v2401_v35, %v2393_v34 }
0x18b4   :  { %3806 = vtanh.f32 %v4653_v36 }
0x18b6   :  { %v2472_v40 = vpop.permute.xlu1 %2471 }
0x18b7   :  { %v4657_v42 = vadd.f32 %v2472_v40, %v2464_v10 }
0x18b9   :  { %3808 = vtanh.f32 %v4657_v42 }
0x18be   :  { %v3807_v4 = vpop.eup %3806 }
0x18bf   :  { %2406 = vrot.lane.b32.xlu0 %v3807_v4, %s3844_s8 }
0x18c3   :  { %v3809_v45 = vpop.eup %3808 }
0x18c4   :  { %2477 = vrot.lane.b32.xlu1 %v3809_v45, %s3844_s8 }
0x1931   :  { %v2407_v46 = vpop.permute.xlu0 %2406 }
0x1932   :  { %v4662_v48 = vmul.f32 %v3803_v5, %v2407_v46 }
0x1934   :  { %v2482_v7 = vpack.c.bf16 %v4662_v48, %v4662_v48 }
0x1936   :  { %2484 = vrot.lane.b32.xlu0 %v2482_v7, %s3845_s22  ;;  %v2478_v1 = vpop.permute.xlu1 %2477 }
0x1937   :  { %v2480_v50 = vmul.f32 %v3805_v31, %v2478_v1 }
0x1939   :  { %v2481_v51 = vpack.c.bf16 %v2480_v50, %v2480_v50 }
0x193b   :  { %2530 = vrot.lane.b32.xlu1 %v2481_v51, %s3845_s22 }
0x19a8   :  { %v2485_v52 = vpop.permute.xlu0 %2484 }
0x19a9   :  { %3570 = vmatmul.mubr.msk.bf16.vlgmr.msra.gmra.mrb[124].mxu0 %vm857_vm6, %v2485_v52 }
0x19aa   :  { %3582 = vmatpush3.bf16.msra.mxu0 %v4576_v12  ;;  %3585 = vmatprep.mubr.msk.bf16.mxu0 %vm3842_vm0, %v3841_v0  ;;  %v3837_v12 = vld [vmem:[%s4830_s10] sm:$0xff]  }
0x19ab   :  { %3583 = vmatprep.subr.bf16.mxu0 %v3841_v0 }
0x19ad   :  { %v2531_v53 = vpop.permute.xlu1 %2530 }
0x19ae   :  { %3584 = vmatpush3.bf16.msra.mxu0 %v4633_v22  ;;  %3578 = vmatmul.mubr.msk.bf16.vlgmr.msra.gmra.mrb[84].mxu1 %vm857_vm6, %v2531_v53 }
0x19af   :  { %3597 = vmatprep.subr.bf16.mxu0 %v3841_v0  ;;  %3590 = vmatpush3.bf16.msra.mxu1 %v3836_v54 }
0x19b0   :  { %3591 = vmatprep.subr.bf16.mxu1 %v3841_v0  ;;  %3593 = vmatprep.mubr.msk.bf16.mxu1 %vm3842_vm0, %v3841_v0 }
0x19b1   :  { %3586 = vmatmul.mubr.msk.bf16.vlgmr.msra.gmra.mrb[128].mxu0 %vm857_vm6, %v2531_v53 }
0x19b2   :  { %3598 = vmatpush3.bf16.msra.mxu0 %v3837_v12  ;;  %3601 = vmatprep.mubr.msk.bf16.mxu0 %vm3842_vm0, %v3841_v0 }
0x19b3   :  { %3599 = vmatprep.subr.bf16.mxu0 %v3841_v0  ;;  %3592 = vmatpush3.bf16.msra.mxu1 %v3838_v13 }
0x19b4   :  { %3605 = vmatprep.subr.bf16.mxu1 %v3841_v0 }
0x19b6   :  { %3600 = vmatpush3.bf16.msra.mxu0 %v3839_v57 }
0x1a7c   :  { %v2523_v55 = vpop.f32.mrb[124].mxu0 }
0x1a7d   :  { %v3571_v60 = vpop.f32.mrb[125].mxu0 }
0x1a7e   :  { %v2526_v61 = vpop.f32.mrb[126].mxu0 }
0x1a7f   :  { %v3572_v63 = vpop.f32.mrb[127].mxu0 }
0x1a81   :  { %v2569_v62 = vpop.f32.mrb[84].mxu1 }
0x1a82   :  { %v2570_v3 = vadd.f32 %v2569_v62, %v2523_v55  ;;  %v3579_v22 = vpop.f32.mrb[85].mxu1 }
0x1a83   :  { %v2572_v49 = vpop.f32.mrb[86].mxu1 }
0x1a84   :  { %v2575_v9 = vadd.f32 %v4699_v6, %v2570_v3  ;;  %v2640_v11 = vpop.f32.mrb[128].mxu0  ;;  %v3580_v25 = vpop.f32.mrb[87].mxu1 }
0x1a85   :  { %v2646_v39 = vadd.f32 %v2640_v11, %v4307_v32  ;;  %v3587_v38 = vpop.f32.mrb[129].mxu0 }
0x1a86   :  { %3810 = vtanh.f32 %v2575_v9  ;;  %v2643_v47 = vpop.f32.mrb[130].mxu0  ;;  %v3083_v15 = vmul.f32 -1.442695, %v2575_v9 }
0x1a87   :  { %3812 = vtanh.f32 %v2646_v39  ;;  %v3588_v8 = vpop.f32.mrb[131].mxu0  ;;  %v3085_v37 = vmul.f32 -1.442695, %v2646_v39 }
0x1a88   :  { %3814 = vpow2.f32 %v3083_v15 }
0x1a89   :  { %3816 = vpow2.f32 %v3085_v37 }
0x1a90   :  { %v3811_v27 = vpop.eup %3810 }
0x1a91   :  { %v3813_v16 = vpop.eup %3812  ;;  %2585 = vrot.lane.b32.xlu0 %v3811_v27, %s3844_s8 }
0x1a92   :  { %2656 = vrot.lane.b32.xlu1 %v3813_v16, %s3844_s8  ;;  %v3815_v18 = vpop.eup %3814 }
0x1a93   :  { %v3817_v29 = vpop.eup %3816  ;;  %v2579_v19 = vadd.f32 1.0, %v3815_v18 }
0x1a94   :  { %v2650_v21 = vadd.f32 1.0, %v3817_v29 }
0x1a95   :  { %3818 = vrcp.f32 %v2579_v19 }
0x1a96   :  { %3820 = vrcp.f32 %v2650_v21 }
0x1a9f   :  { %v3819_v32 = vpop.eup %3818 }
0x1aa0   :  { %v3821_v23 = vpop.eup %3820  ;;  %v2583_v56 = vmul.f32 %v3819_v32, %v4653_v36 }
0x1aa1   :  { %v2654_v5 = vmul.f32 %v3821_v23, %v4657_v42 }
0x1b03   :  { %v2586_v20 = vpop.permute.xlu0 %2585 }
0x1b04   :  { %v2657_v44 = vpop.permute.xlu1 %2656  ;;  %v2588_v30 = vmul.f32 %v3819_v32, %v2586_v20 }
0x1b05   :  { %v2659_v24 = vmul.f32 %v3821_v23, %v2657_v44 }
0x1b06   :  { %2590 = vrot.lane.b32.xlu0 %v2588_v30, %s3845_s22 }
0x1b07   :  { %2661 = vrot.lane.b32.xlu1 %v2659_v24, %s3845_s22 }
0x1b78   :  { %v2591_v26 = vpop.permute.xlu0 %2590 }
0x1b79   :  { %v2662_v28 = vpop.permute.xlu1 %2661  ;;  %v2593_v31 = vadd.f32 %v2591_v26, %v2583_v56 }
0x1b7a   :  { %v4709_v33 = vadd.f32 %v2662_v28, %v2654_v5 }
0x1b7b   :  { %3822 = vtanh.f32 %v2593_v31 }
0x1b7c   :  { %3824 = vtanh.f32 %v4709_v33 }
0x1b85   :  { %v3823_v58 = vpop.eup %3822 }
0x1b86   :  { %v3825_v34 = vpop.eup %3824  ;;  %2596 = vrot.lane.b32.xlu0 %v3823_v58, %s3844_s8 }
0x1b87   :  { %2667 = vrot.lane.b32.xlu1 %v3825_v34, %s3844_s8 }
0x1bf8   :  { %v2597_v35 = vpop.permute.xlu0 %2596 }
0x1bf9   :  { %v2668_v10 = vpop.permute.xlu1 %2667  ;;  %v2599_v40 = vmul.f32 %v3819_v32, %v2597_v35 }
0x1bfa   :  { %v2670_v36 = vmul.f32 %v3821_v23, %v2668_v10 }
0x1bfb   :  { %v2672_v4 = vpack.c.bf16 %v2599_v40, %v2599_v40 }
0x1bfc   :  { %v2671_v42 = vpack.c.bf16 %v2670_v36, %v2670_v36 }
0x1bfd   :  { %2674 = vrot.lane.b32.xlu0 %v2672_v4, %s3845_s22 }
0x1bfe   :  { %2720 = vrot.lane.b32.xlu1 %v2671_v42, %s3845_s22 }
0x1c6f   :  { %v2675_v45 = vpop.permute.xlu0 %2674 }
0x1c70   :  { %v2721_v46 = vpop.permute.xlu1 %2720  ;;  %3594 = vmatmul.mubr.msk.bf16.vlgmr.msra.gmra.mrb[88].mxu1 %vm857_vm6, %v2675_v45 }
0x1c71   :  { %3602 = vmatmul.mubr.msk.bf16.vlgmr.msra.gmra.mrb[132].mxu0 %vm857_vm6, %v2721_v46  ;;  %3609 = vmatprep.mubr.msk.bf16.mxu1 %vm3842_vm0, %v3841_v0 }
0x1d43   :  { %v2713_v7 = vpop.f32.mrb[88].mxu1 }
0x1d44   :  { %v2759_v1 = vpop.f32.mrb[132].mxu0  ;;  %v3595_v50 = vpop.f32.mrb[89].mxu1 }
0x1d45   :  { %v2760_v51 = vadd.f32 %v2759_v1, %v2713_v7  ;;  %v3603_v52 = vpop.f32.mrb[133].mxu0  ;;  %v2716_v53 = vpop.f32.mrb[90].mxu1 }
0x1d46   :  { %v2762_v54 = vpop.f32.mrb[134].mxu0  ;;  %v3596_v12 = vpop.f32.mrb[91].mxu1 }
0x1d47   :  { %v2765_v13 = vadd.f32 %v4699_v6, %v2760_v51  ;;  %v3604_v57 = vpop.f32.mrb[135].mxu0 }
0x1d49   :  { %3826 = vtanh.f32 %v2765_v13  ;;  %v3088_v60 = vmul.f32 -1.442695, %v2765_v13 }
0x1d4b   :  { %3828 = vpow2.f32 %v3088_v60 }
0x1d53   :  { %v3827_v55 = vpop.eup %3826 }
0x1d54   :  { %2775 = vrot.lane.b32.xlu0 %v3827_v55, %s3844_s8 }
0x1d55   :  { %v3829_v61 = vpop.eup %3828 }
0x1d56   :  { %v2769_v63 = vadd.f32 1.0, %v3829_v61 }
0x1d58   :  { %3830 = vrcp.f32 %v2769_v63 }
0x1d62   :  { %v3831_v62 = vpop.eup %3830 }
0x1d63   :  { %v2773_v49 = vmul.f32 %v3831_v62, %v2593_v31 }
0x1dc6   :  { %v2776_v3 = vpop.permute.xlu0 %2775 }
0x1dc7   :  { %v2778_v22 = vmul.f32 %v3831_v62, %v2776_v3 }
0x1dc9   :  { %2780 = vrot.lane.b32.xlu1 %v2778_v22, %s3845_s22 }
0x1dcd   :  { %1271 = vrot.lane.b32.xlu1 %v4394_v41, %s3845_s22  ;;  %v3688_v41 = vld [vmem:[%s4832_s13] sm:$0xff]  }
0x1dce   :  { %3606 = vmatpush3.bf16.msra.mxu1 %v3688_v41 }
0x1dcf   :  { %3607 = vmatprep.subr.bf16.mxu1 %v3841_v0 }
0x1dd1   :  { %1651 = vrot.lane.b32.xlu1 %v4480_v14, %s3845_s22  ;;  %v3689_v14 = vld [vmem:[%s4832_s13 + $0x8] sm:$0xff]   ;;  %s3846_s13 = smov 96  }
0x1dd2   :  { %3608 = vmatpush3.bf16.msra.mxu1 %v3689_v14 }
0x1dd5   :  { %2031 = vrot.lane.b32.xlu1 %v4566_v2, %s3845_s22 }
0x1dd9   :  { %2411 = vrot.lane.b32.xlu1 %v4662_v48, %s3845_s22 }
0x1e3b   :  { %v2781_v6 = vpop.permute.xlu1 %2780 }
0x1e3c   :  { %v2783_v9 = vadd.f32 %v2781_v6, %v2773_v49 }
0x1e3e   :  { %3832 = vtanh.f32 %v2783_v9 }
0x1e3f   :  { %v1272_v11 = vpop.permute.xlu1 %1271 }
0x1e40   :  { %1274 = vst.msk [vmem:[#allocation3] sm:$0xff] %vm857_vm6, %v1272_v11 }
0x1e43   :  { %v1652_v25 = vpop.permute.xlu1 %1651 }
0x1e44   :  { %1654 = vst.msk [vmem:[#allocation3 + $0x10] sm:$0xff] %vm857_vm6, %v1652_v25 }
0x1e47   :  { %v2032_v2 = vpop.permute.xlu1 %2031 }
0x1e48   :  { %v3833_v48 = vpop.eup %3832  ;;  %2034 = vst.msk [vmem:[#allocation3 + $0x20] sm:$0xff] %vm857_vm6, %v2032_v2 }
0x1e49   :  { %2786 = vrot.lane.b32.xlu0 %v3833_v48, %s3844_s8 }
0x1e4b   :  { %v2412_v39 = vpop.permute.xlu1 %2411  ;;  %v2797_v29 = vld [vmem:[#allocation3 + $0x10] sm:$0xff] }
0x1e4c   :  { %2414 = vst.msk [vmem:[#allocation3 + $0x30] sm:$0xff] %vm857_vm6, %v2412_v39 }
0x1e4d   :  { %1461 = vrot.lane.b32.xlu0 %v4437_v17, %s3845_s22 }
0x1e4f   :  { %v2799_v20 = vld [vmem:[#allocation3 + $0x20] sm:$0xff] }
0x1e51   :  { %1841 = vrot.lane.b32.xlu0 %v4523_v43, %s3845_s22 }
0x1e53   :  { %v2801_v30 = vld [vmem:[#allocation3 + $0x30] sm:$0xff] }
0x1e55   :  { %2221 = vrot.lane.b32.xlu0 %v4614_v59, %s3845_s22  ;;  %v2795_v59 = vld [vmem:[#allocation3] sm:$0xff] }
0x1e59   :  { %2601 = vrot.lane.b32.xlu0 %v2599_v40, %s3845_s22 }
0x1e5d   :  { %2929 = vrot.lane.b32.xlu0 %v2670_v36, %s3845_s22 }
0x1e61   :  { %2941 = vrot.lane.b32.xlu0 %v2783_v9, %s3846_s13 }
0x1ebb   :  { %v2787_v38 = vpop.permute.xlu0 %2786 }
0x1ebc   :  { %v2789_v47 = vmul.f32 %v3831_v62, %v2787_v38 }
0x1ebe   :  { %2791 = vrot.lane.b32.xlu1 %v2789_v47, %s3845_s22 }
0x1ebf   :  { %v1462_v8 = vpop.permute.xlu0 %1461 }
0x1ec0   :  { %1464 = vst.msk [vmem:[#allocation3 + $0x8] sm:$0xff] %vm857_vm6, %v1462_v8 }
0x1ec2   :  { %2934 = vrot.lane.b32.xlu1 %v4709_v33, %s3846_s13 }
0x1ec3   :  { %v1842_v17 = vpop.permute.xlu0 %1841 }
0x1ec4   :  { %1844 = vst.msk [vmem:[#allocation3 + $0x18] sm:$0xff] %vm857_vm6, %v1842_v17 }
0x1ec7   :  { %v2222_v43 = vpop.permute.xlu0 %2221  ;;  %v2796_v27 = vld [vmem:[#allocation3 + $0x8] sm:$0xff] }
0x1ec8   :  { %2224 = vst.msk [vmem:[#allocation3 + $0x28] sm:$0xff] %vm857_vm6, %v2222_v43  ;;  %v2804_v16 = vpack.c.bf16 %v2796_v27, %v2795_v59 }
0x1eca   :  { %3610 = vmatmul.mubr.msk.bf16.vlgmr.msra.gmra.mrb[92].mxu1 %vm857_vm6, %v2804_v16 }
0x1ecb   :  { %v2602_v15 = vpop.permute.xlu0 %2601  ;;  %3613 = vmatprep.mubr.msk.bf16.mxu1 %vm3842_vm0, %v3841_v0  ;;  %v2798_v37 = vld [vmem:[#allocation3 + $0x18] sm:$0xff] }
0x1ecc   :  { %2604 = vst.msk [vmem:[#allocation3 + $0x38] sm:$0xff] %vm857_vm6, %v2602_v15  ;;  %v2805_v19 = vpack.c.bf16 %v2798_v37, %v2797_v29 }
0x1ecf   :  { %v2930_v18 = vpop.permute.xlu0 %2929  ;;  %v2800_v32 = vld [vmem:[#allocation3 + $0x28] sm:$0xff] }
0x1ed0   :  { %2932 = vst.msk [vmem:[%s4833_s18] sm:$0xff] %vm857_vm6, %v2930_v18  ;;  %v2806_v23 = vpack.c.bf16 %v2800_v32, %v2799_v20 }
0x1ed2   :  { %3614 = vmatmul.mubr.msk.bf16.gmra.mrb[96].mxu1 %vm857_vm6, %v2805_v19 }
0x1ed3   :  { %v2942_v21 = vpop.permute.xlu0 %2941  ;;  %3617 = vmatprep.mubr.msk.bf16.mxu1 %vm3842_vm0, %v3841_v0  ;;  %v2802_v44 = vld [vmem:[#allocation3 + $0x38] sm:$0xff] }
0x1ed4   :  { %3098 = vst.msk [vmem:[%s4834_s19 + $0x8] sm:$0xff] %vm857_vm6, %v2942_v21  ;;  %v2807_v24 = vpack.c.bf16 %v2802_v44, %v2801_v30 }
0x1eda   :  { %3618 = vmatmul.mubr.msk.bf16.gmra.mrb[100].mxu1 %vm857_vm6, %v2806_v23 }
0x1edb   :  { %3621 = vmatprep.mubr.msk.bf16.mxu1 %vm3842_vm0, %v3841_v0 }
0x1ee2   :  { %3622 = vmatmul.mubr.msk.bf16.gmra.mrb[104].mxu1 %vm857_vm6, %v2807_v24 }
0x1ee3   :  { %3625 = vmatprep.mubr.msk.bf16.mxu1 %vm3842_vm0, %v3841_v0  ;;  %v3089_v0 = vld [vmem:[%s4835_s14] ss:$0 sm:$0xff] }
0x1f30   :  { %v2792_v56 = vpop.permute.xlu1 %2791 }
0x1f31   :  { %2794 = vst.msk [vmem:[#allocation3 + $0x40] sm:$0xff] %vm857_vm6, %v2792_v56  ;;  %3097 = vst.msk [vmem:[%s4833_s18 + $0x8] sm:$0xff] %vm857_vm6, %v2792_v56 }
0x1f34   :  { %v2935_v5 = vpop.permute.xlu1 %2934 }
0x1f35   :  { %2937 = vst.msk [vmem:[%s4834_s19] sm:$0xff] %vm857_vm6, %v2935_v5 }
0x1f38   :  { %v2803_v26 = vld [vmem:[#allocation3 + $0x40] sm:$0xff] }
0x1f39   :  { %v2808_v28 = vpack.c.bf16 %v2803_v26, %v2803_v26 }
0x1f3b   :  { %3626 = vmatmul.mubr.msk.bf16.gmra.mrb[108].mxu1 %vm857_vm6, %v2808_v28 }
0x1f9d   :  { %v2881_v31 = vpop.f32.mrb[92].mxu1 }
0x1f9e   :  { %v2882_v33 = vadd.f32 %v3089_v0, %v2881_v31  ;;  %v3611_v58 = vpop.f32.mrb[93].mxu1 }
0x1f9f   :  { %v2884_v34 = vpop.f32.mrb[94].mxu1 }
0x1fa0   :  { %2919 = vst [vmem:[%s4836_s17] sm:$0xff] %v2882_v33  ;;  %v2885_v35 = vadd.f32 %v3089_v0, %v2884_v34  ;;  %v3612_v10 = vpop.f32.mrb[95].mxu1 }
0x1fa2   :  { %2920 = vst [vmem:[%s4836_s17 + $0x8] sm:$0xff] %v2885_v35 }
0x1fa5   :  { %v2889_v40 = vpop.f32.mrb[96].mxu1 }
0x1fa6   :  { %v2890_v36 = vadd.f32 %v3089_v0, %v2889_v40  ;;  %v3615_v4 = vpop.f32.mrb[97].mxu1 }
0x1fa7   :  { %v2892_v42 = vpop.f32.mrb[98].mxu1 }
0x1fa8   :  { %2921 = vst [vmem:[%s4836_s17 + $0x10] sm:$0xff] %v2890_v36  ;;  %v2893_v45 = vadd.f32 %v3089_v0, %v2892_v42  ;;  %v3616_v46 = vpop.f32.mrb[99].mxu1 }
0x1faa   :  { %2922 = vst [vmem:[%s4836_s17 + $0x18] sm:$0xff] %v2893_v45 }
0x1fad   :  { %v2897_v7 = vpop.f32.mrb[100].mxu1 }
0x1fae   :  { %v2898_v1 = vadd.f32 %v3089_v0, %v2897_v7  ;;  %v3619_v50 = vpop.f32.mrb[101].mxu1 }
0x1faf   :  { %v2900_v51 = vpop.f32.mrb[102].mxu1 }
0x1fb0   :  { %2923 = vst [vmem:[%s4836_s17 + $0x20] sm:$0xff] %v2898_v1  ;;  %v2901_v52 = vadd.f32 %v3089_v0, %v2900_v51  ;;  %v3620_v53 = vpop.f32.mrb[103].mxu1 }
0x1fb2   :  { %2924 = vst [vmem:[%s4836_s17 + $0x28] sm:$0xff] %v2901_v52 }
0x1fb5   :  { %v2905_v54 = vpop.f32.mrb[104].mxu1 }
0x1fb6   :  { %v2906_v12 = vadd.f32 %v3089_v0, %v2905_v54  ;;  %v3623_v13 = vpop.f32.mrb[105].mxu1 }
0x1fb7   :  { %v2908_v57 = vpop.f32.mrb[106].mxu1 }
0x1fb8   :  { %2925 = vst [vmem:[%s4836_s17 + $0x30] sm:$0xff] %v2906_v12  ;;  %v2909_v55 = vadd.f32 %v3089_v0, %v2908_v57  ;;  %v3624_v60 = vpop.f32.mrb[107].mxu1 }
0x1fba   :  { %2926 = vst [vmem:[%s4836_s17 + $0x38] sm:$0xff] %v2909_v55 }
0x200e   :  { %v2913_v61 = vpop.f32.mrb[108].mxu1 }
0x200f   :  { %v2914_v63 = vadd.f32 %v3089_v0, %v2913_v61  ;;  %v3627_v62 = vpop.f32.mrb[109].mxu1 }
0x2010   :  { %v2916_v3 = vpop.f32.mrb[110].mxu1 }
0x2011   :  { %2927 = vst [vmem:[%s4836_s17 + $0x40] sm:$0xff] %v2914_v63  ;;  %v3628_v22 = vpop.f32.mrb[111].mxu1 }

</bundles_post_ra>
